<compile_context>
chip_gen: v5e
topology: v5e:2x2
jax: 0.10.0
libtpu: 0.0.40
codegen_flags: <defaults>
</compile_context>

<pallas_src>
import jax
import jax.numpy as jnp
from jax.experimental import pallas as pl
from jax.experimental.pallas import tpu as pltpu

T_FRAMES = 8                      # hard-coded in the reference Model.forward
_VMEM_LIMIT = 32 * 1024 * 1024    # modest override: ok on v5e/v6e/v7x


# ---------------------------------------------------------------------------
# Pallas branch forward (one attention branch == reference `Model.forward`).
# ---------------------------------------------------------------------------
def _branch_forward_pallas(x_pool, prm, b, T):
    """x_pool: (b*T, C, H, W) f32 pooled branch feature (NCHW)."""
    B, C, H, W = x_pool.shape
    HW = H * W
    THW = T * HW
    c = prm['w_u'].shape[0]          # C // s
    s = C // c
    dps = prm['w_psi'].shape[0]      # HW // s
    bf16 = jnp.bfloat16
    f32 = jnp.float32

    # --- XLA glue (small, fuses): present x with T folded into the lane axis,
    # n = t*HW + pos, matching the reference's view/permute of F_all.
    x5 = x_pool.reshape(b, T, C, HW)                       # f32
    xf32 = jnp.swapaxes(x5, 1, 2).reshape(b, C, THW)       # f32: final weighted sum
    xbf = xf32.astype(bf16)                                # bf16: MXU operand
    fr = jnp.mean(x5, axis=1).astype(bf16)                 # F_R, (b, C, HW)

    # Stack W_u / W_phi -> one (2c, C) matmul per batch item (full MXU rows,
    # single lane-dense output store).
    w_up = jnp.concatenate([prm['w_u'], prm['w_phi']], axis=0)      # (2c, C) bf16
    b_up = jnp.concatenate([prm['b_u'], prm['b_phi']], axis=0)      # (2c, 1) f32

    # --- Kernel A: fused 1x1 conv + folded BN + ReLU for W_u/W_phi over all T
    # frames at once, plus the temporal-mean branch (F_R -> W_v). ---
    def proj_kernel(x_ref, fr_ref, wup_ref, bup_ref, wv_ref, bv_ref,
                    up_ref, v_ref):
        up = jnp.dot(wup_ref[...], x_ref[0],
                     preferred_element_type=f32) + bup_ref[...]      # (2c, THW)
        up_ref[0] = jnp.maximum(up, 0.0).astype(bf16)
        v = jnp.dot(wv_ref[...], fr_ref[0],
                    preferred_element_type=f32) + bv_ref[...]        # (c, HW)
        v_ref[0] = jnp.maximum(v, 0.0).astype(bf16)

    def _whole_a(shape):
        zeros = (0,) * len(shape)
        return pl.BlockSpec(shape, lambda i: zeros)

    up, v = pl.pallas_call(
        proj_kernel,
        grid=(b,),
        in_specs=[
            pl.BlockSpec((1, C, THW), lambda i: (i, 0, 0)),
            pl.BlockSpec((1, C, HW), lambda i: (i, 0, 0)),
            _whole_a(w_up.shape), _whole_a(b_up.shape),
            _whole_a(prm['w_v'].shape), _whole_a(prm['b_v'].shape),
        ],
        out_specs=(
            pl.BlockSpec((1, 2 * c, THW), lambda i: (i, 0, 0)),
            pl.BlockSpec((1, c, HW), lambda i: (i, 0, 0)),
        ),
        out_shape=(
            jax.ShapeDtypeStruct((b, 2 * c, THW), bf16),   # [F_all_u ; x1] stacked
            jax.ShapeDtypeStruct((b, c, HW), bf16),        # F_R_v
        ),
        compiler_params=pltpu.CompilerParams(
            dimension_semantics=("parallel",),
            vmem_limit_bytes=_VMEM_LIMIT),
    )(xbf, fr, w_up, b_up, prm['w_v'], prm['b_v'])

    u = up[:, :c, :]                 # (b, c, THW), n = t*HW + pos
    p = up[:, c:, :]                 # x1 already in the (b, c, T*HW) layout Kernel B needs

    # --- glue (bf16, small): reproduce the exact PyTorch view/permute shuffle
    # F_all_u -> (b, T*HW, c).  It interleaves channel and spatial indices and
    # cannot be folded into the matmul, so it stays as one (cheap) XLA transpose.
    uu = (u.reshape(b, c, T, HW)
            .transpose(0, 2, 1, 3)                 # (b, T, c, HW)
            .reshape(b, T, C, HW // s)             # re-chunk contiguous c*HW
            .transpose(0, 1, 3, 2)                 # (b, T, HW//s, C)
            .reshape(b, THW, c))
    uuT = jnp.swapaxes(uu, 1, 2)                   # (b, c, T*HW)
    vT = jnp.swapaxes(v, 1, 2)                     # (b, HW, c)

    wth_a = prm['w_theta'][:, :c]    # W_theta columns acting on x1
    wth_b = prm['w_theta'][:, c:]    # W_theta columns acting on Relation

    # --- Kernel B: relation matmul, W_psi / W_theta (+folded BN, ReLU), then a
    # full softmax over T*HW and the weighted reduction (V), all per batch item.
    def attn_kernel(vT_ref, uuT_ref, p_ref, xf_ref,
                    wpsi_ref, bpsi_ref, wta_ref, wtb_ref, bth_ref, out_ref):
        # Relation^T = F_R_v @ F_all_u^T  -> (HW, T*HW)
        relT = jnp.dot(vT_ref[0], uuT_ref[0], preferred_element_type=f32)
        rel2 = jnp.maximum(
            jnp.dot(wpsi_ref[...], relT.astype(bf16), preferred_element_type=f32)
            + bpsi_ref[...], 0.0).astype(bf16)                  # (HW/s, T*HW)

        # Logits for the whole slab at once (theta matmuls hoisted out of any
        # per-frame loop): (C, T*HW) f32.
        logits = jnp.maximum(
            jnp.dot(wta_ref[...], p_ref[0], preferred_element_type=f32)
            + jnp.dot(wtb_ref[...], rel2, preferred_element_type=f32)
            + bth_ref[...], 0.0)

        m = jnp.max(logits, axis=-1, keepdims=True)
        e = jnp.exp(logits - m)
        den = jnp.sum(e, axis=-1, keepdims=True)
        num = jnp.sum(e * xf_ref[0], axis=-1, keepdims=True)    # f32 F_all
        out_ref[0] = num / den                                  # (C, 1)

    def _whole_b(shape):
        zeros = (0,) * len(shape)
        return pl.BlockSpec(shape, lambda i: zeros)

    V = pl.pallas_call(
        attn_kernel,
        grid=(b,),
        in_specs=[
            pl.BlockSpec((1, HW, c), lambda i: (i, 0, 0)),
            pl.BlockSpec((1, c, THW), lambda i: (i, 0, 0)),
            pl.BlockSpec((1, c, THW), lambda i: (i, 0, 0)),
            pl.BlockSpec((1, C, THW), lambda i: (i, 0, 0)),
            _whole_b(prm['w_psi'].shape), _whole_b(prm['b_psi'].shape),
            _whole_b(wth_a.shape), _whole_b(wth_b.shape),
            _whole_b(prm['b_theta'].shape),
        ],
        # Output is only (C,1) f32 per item (tiny); kept in sublane layout to
        # avoid an in-kernel (C,1)->(1,C) transpose.
        out_specs=pl.BlockSpec((1, C, 1), lambda i: (i, 0, 0)),
        out_shape=jax.ShapeDtypeStruct((b, C, 1), f32),
        compiler_params=pltpu.CompilerParams(
            dimension_semantics=("parallel",),
            vmem_limit_bytes=_VMEM_LIMIT),
    )(vT, uuT, p, xf32, prm['w_psi'], prm['b_psi'], wth_a, wth_b,
      prm['b_theta'])

    return V[:, :, 0]                                      # (b, C)


# ---------------------------------------------------------------------------
# Plain-XLA fallback for tiny late branches (T*HW < 128, e.g. i >= 2 when
# N = 4): their lane extent sits below one 128-wide vreg, so a Pallas kernel
# would be nearly all masked lanes + grid overhead; their FLOPs are negligible.
# ---------------------------------------------------------------------------
def _branch_forward_xla(x_pool, prm, b, T):
    B, C, H, W = x_pool.shape
    HW = H * W
    THW = T * HW
    c = prm['w_u'].shape[0]
    s = C // c
    f32 = jnp.float32
    relu = lambda z: jnp.maximum(z, 0.0)
    x5 = x_pool.reshape(b, T, C, HW).astype(f32)
    xf = jnp.swapaxes(x5, 1, 2).reshape(b, C, THW)
    f_r = jnp.mean(x5, axis=1)
    wu = prm['w_u'].astype(f32); wv = prm['w_v'].astype(f32)
    wp = prm['w_phi'].astype(f32); wpsi = prm['w_psi'].astype(f32)
    wth = prm['w_theta'].astype(f32)
    u = relu(jnp.einsum('oc,bcn->bon', wu, xf) + prm['b_u'][None])
    p = relu(jnp.einsum('oc,bcn->bon', wp, xf) + prm['b_phi'][None])
    v = relu(jnp.einsum('oc,bch->boh', wv, f_r) + prm['b_v'][None])
    u4 = u.reshape(b, c, T, HW).transpose(0, 2, 1, 3)
    uu = u4.reshape(b, T, C, HW // s).transpose(0, 1, 3, 2).reshape(b, THW, c)
    relT = jnp.einsum('bmj,bjd->bdm', uu, v)               # (b, HW, T*HW)
    rel2 = relu(jnp.einsum('od,bdn->bon', wpsi, relT) + prm['b_psi'][None])
    a = relu(jnp.einsum('oc,bcn->bon', wth[:, :c], p)
             + jnp.einsum('od,bdn->bon', wth[:, c:], rel2)
             + prm['b_theta'][None])
    a = a - jnp.max(a, axis=-1, keepdims=True)
    e = jnp.exp(a)
    a = e / jnp.sum(e, axis=-1, keepdims=True)
    return jnp.sum(a * xf, axis=-1)                        # (b, C)


def model_branch_forward(x_pool, prm, b, T):
    H, W = x_pool.shape[2], x_pool.shape[3]
    if T * H * W < 128:
        return _branch_forward_xla(x_pool, prm, b, T)
    return _branch_forward_pallas(x_pool, prm, b, T)


# ---------------------------------------------------------------------------
# Deterministic parameter construction (eval-mode BN folded into 1x1 convs).
# ---------------------------------------------------------------------------
def _fold_conv_bn(key, out_ch, in_ch, zero_bias=True, eps=1e-5):
    kw, kb, kg, kbe, km, kv = jax.random.split(key, 6)
    w = jax.random.normal(kw, (out_ch, in_ch), jnp.float32) * jnp.sqrt(2.0 / out_ch)
    bias = (jnp.zeros((out_ch,), jnp.float32) if zero_bias
            else 0.05 * jax.random.normal(kb, (out_ch,), jnp.float32))
    gamma = 1.0 + 0.1 * jax.random.normal(kg, (out_ch,), jnp.float32)
    beta = 0.1 * jax.random.normal(kbe, (out_ch,), jnp.float32)
    rmean = 0.1 * jax.random.normal(km, (out_ch,), jnp.float32)
    rvar = 1.0 + 0.1 * jax.random.uniform(kv, (out_ch,), jnp.float32)
    scale = gamma / jnp.sqrt(rvar + eps)
    # Weights stored bf16 (MXU-native operand dtype); biases stay f32 and are
    # added in the f32 matmul epilogue inside the kernels.
    w_eff = (w * scale[:, None]).astype(jnp.bfloat16)
    b_eff = (((bias - rmean) * scale + beta)[:, None]).astype(jnp.float32)
    return w_eff, b_eff


def _bn1d_affine(key, ch, eps=1e-5):
    kg, kb, km, kv = jax.random.split(key, 4)
    gamma = 1.0 + 0.1 * jax.random.normal(kg, (ch,), jnp.float32)
    beta = 0.1 * jax.random.normal(kb, (ch,), jnp.float32)
    rmean = 0.1 * jax.random.normal(km, (ch,), jnp.float32)
    rvar = 1.0 + 0.1 * jax.random.uniform(kv, (ch,), jnp.float32)
    scale = gamma / jnp.sqrt(rvar + eps)
    shift = beta - rmean * scale
    return scale.astype(jnp.float32), shift.astype(jnp.float32)


def init_mg_rafa_params(key, num_feature, N, s):
    params = {'N': N, 's': s, 'branch': [], 'branch_bn': []}
    C = num_feature // N
    for i in range(N):
        key, k0, k1, k2, k3, k4, k5 = jax.random.split(key, 7)
        d = (16 // (2 ** i)) * (8 // (2 ** i))     # D / 2^(2i) with D = 16*8
        c = C // s
        dps = d // s
        br = {}
        br['w_u'], br['b_u'] = _fold_conv_bn(k0, c, C)
        br['w_v'], br['b_v'] = _fold_conv_bn(k1, c, C)
        br['w_phi'], br['b_phi'] = _fold_conv_bn(k2, c, C)
        br['w_psi'], br['b_psi'] = _fold_conv_bn(k3, dps, d, zero_bias=False)
        br['w_theta'], br['b_theta'] = _fold_conv_bn(k4, C, c + dps, zero_bias=False)
        params['branch'].append(br)
        params['branch_bn'].append(_bn1d_affine(k5, C))
    key, kf = jax.random.split(key)
    params['final_bn'] = _bn1d_affine(kf, N * C)
    return params


# ---------------------------------------------------------------------------
# MG_RAFA eval forward (post-backbone).
# ---------------------------------------------------------------------------
def mg_rafa_forward(x_feat, params):
    # x_feat: backbone feature map, NCHW, shape (b*T, num_feature, 16, 8)
    B, CF, H, W = x_feat.shape
    b = B // T_FRAMES
    N = params['N']
    stride = CF // N
    feats = []
    for i in range(N):
        xi = x_feat[:, i * stride:(i + 1) * stride]
        k = 2 ** i
        # AdaptiveAvgPool2d((16 // 2**i, 8 // 2**i)); H, W divisible by k here,
        # so adaptive pooling == block mean.
        xp = xi.reshape(B, stride, H // k, k, W // k, k).mean(axis=(3, 5))
        V = model_branch_forward(xp, params['branch'][i], b, T_FRAMES)   # (b, C)
        sc, sh = params['branch_bn'][i]          # eval-mode BatchNorm1d(C)
        feats.append(V * sc[None, :] + sh[None, :])
    ff = jnp.concatenate(feats, axis=1)          # final_features, (b, N*C)
    sc, sh = params['final_bn']                  # eval-mode BatchNorm1d(N*C)
    return ff * sc[None, :] + sh[None, :]        # bn_features


if __name__ == "__main__":
    key = jax.random.PRNGKey(0)
    b = 2
    num_feature, N, s = 64, 2, 2       # small stand-in for (2048, cfg.N, cfg.s)
    H, W = 16, 8                       # canonical backbone output spatial size
    kx, kp = jax.random.split(key)
    x_feat = jax.random.normal(kx, (b * T_FRAMES, num_feature, H, W), jnp.float32)
    params = init_mg_rafa_params(kp, num_feature, N, s)

    fwd = jax.jit(lambda xf: mg_rafa_forward(xf, params))
    out = jax.block_until_ready(fwd(x_feat))
    assert out.shape == (b, num_feature), out.shape
    assert jnp.all(jnp.isfinite(out))
    print("KERNEL_OK")
</pallas_src>

<mosaic_0001>
module attributes {stable_mosaic.version = 11 : i64} {
  func.func @proj_kernel(%arg0: i32, %arg1: memref<1x32x1024xbf16, #tpu.memory_space<vmem>>, %arg2: memref<1x32x128xbf16, #tpu.memory_space<vmem>>, %arg3: memref<32x32xbf16, #tpu.memory_space<vmem>>, %arg4: memref<32x1xf32, #tpu.memory_space<vmem>>, %arg5: memref<16x32xbf16, #tpu.memory_space<vmem>>, %arg6: memref<16x1xf32, #tpu.memory_space<vmem>>, %arg7: memref<1x32x1024xbf16, #tpu.memory_space<vmem>>, %arg8: memref<1x16x128xbf16, #tpu.memory_space<vmem>>) attributes {dimension_semantics = [#tpu.dimension_semantics<parallel>], iteration_bounds = array<i64: 2>, scalar_prefetch = 0 : i64, scratch_operands = 0 : i64, tpu.core_type = #tpu.core_type<tc>, window_params = [{transform_indices = @transform_0, window_bounds = array<i64: 1, 32, 1024>}, {transform_indices = @transform_1, window_bounds = array<i64: 1, 32, 128>}, {pipeline_mode = #tpu.pipeline_mode<synchronous>, transform_indices = @transform_2, window_bounds = array<i64: 32, 32>}, {pipeline_mode = #tpu.pipeline_mode<synchronous>, transform_indices = @transform_3, window_bounds = array<i64: 32, 1>}, {pipeline_mode = #tpu.pipeline_mode<synchronous>, transform_indices = @transform_4, window_bounds = array<i64: 16, 32>}, {pipeline_mode = #tpu.pipeline_mode<synchronous>, transform_indices = @transform_5, window_bounds = array<i64: 16, 1>}, {transform_indices = @transform_6, window_bounds = array<i64: 1, 32, 1024>}, {transform_indices = @transform_7, window_bounds = array<i64: 1, 16, 128>}]} {
    %c0 = arith.constant 0 : index
    %c0_0 = arith.constant 0 : index
    %0 = vector.load %arg3[%c0, %c0_0] : memref<32x32xbf16, #tpu.memory_space<vmem>>, vector<32x32xbf16>
    %c0_1 = arith.constant 0 : index
    %c0_2 = arith.constant 0 : index
    %c0_3 = arith.constant 0 : index
    %1 = vector.load %arg1[%c0_1, %c0_2, %c0_3] : memref<1x32x1024xbf16, #tpu.memory_space<vmem>>, vector<1x32x1024xbf16>
    %2 = vector.shape_cast %1 : vector<1x32x1024xbf16> to vector<32x1024xbf16>
    %cst = arith.constant dense<0.000000e+00> : vector<32x1024xf32>
    %3 = tpu.matmul %0, %2, %cst {dimension_numbers = #tpu.dot_dimension_numbers<[1], [0], [0], [1], [0, 0, 1, 1], [], []>} : vector<32x32xbf16>, vector<32x1024xbf16>, vector<32x1024xf32> -> vector<32x1024xf32>
    %c0_4 = arith.constant 0 : index
    %c0_5 = arith.constant 0 : index
    %4 = vector.load %arg4[%c0_4, %c0_5] : memref<32x1xf32, #tpu.memory_space<vmem>>, vector<32x1xf32>
    %5 = vector.broadcast %4 : vector<32x1xf32> to vector<32x1024xf32>
    %6 = arith.addf %3, %5 : vector<32x1024xf32>
    %cst_6 = arith.constant 0.000000e+00 : f32
    %7 = vector.broadcast %cst_6 : f32 to vector<32x1024xf32>
    %8 = arith.maximumf %6, %7 : vector<32x1024xf32>
    %9 = arith.truncf %8 : vector<32x1024xf32> to vector<32x1024xbf16>
    %c0_7 = arith.constant 0 : index
    %c0_8 = arith.constant 0 : index
    %c0_9 = arith.constant 0 : index
    %10 = vector.load %arg7[%c0_7, %c0_8, %c0_9] : memref<1x32x1024xbf16, #tpu.memory_space<vmem>>, vector<1x32x1024xbf16>
    %11 = vector.shape_cast %10 : vector<1x32x1024xbf16> to vector<32x1024xbf16>
    %12 = vector.shape_cast %9 : vector<32x1024xbf16> to vector<1x32x1024xbf16>
    tpu.vector_store %arg7[%c0_7, %c0_8, %c0_9], %12 {strides = array<i32>} : memref<1x32x1024xbf16, #tpu.memory_space<vmem>>, vector<1x32x1024xbf16>,
    %c0_10 = arith.constant 0 : index
    %c0_11 = arith.constant 0 : index
    %13 = vector.load %arg5[%c0_10, %c0_11] : memref<16x32xbf16, #tpu.memory_space<vmem>>, vector<16x32xbf16>
    %c0_12 = arith.constant 0 : index
    %c0_13 = arith.constant 0 : index
    %c0_14 = arith.constant 0 : index
    %14 = vector.load %arg2[%c0_12, %c0_13, %c0_14] : memref<1x32x128xbf16, #tpu.memory_space<vmem>>, vector<1x32x128xbf16>
    %15 = vector.shape_cast %14 : vector<1x32x128xbf16> to vector<32x128xbf16>
    %cst_15 = arith.constant dense<0.000000e+00> : vector<16x128xf32>
    %16 = tpu.matmul %13, %15, %cst_15 {dimension_numbers = #tpu.dot_dimension_numbers<[1], [0], [0], [1], [0, 0, 1, 1], [], []>} : vector<16x32xbf16>, vector<32x128xbf16>, vector<16x128xf32> -> vector<16x128xf32>
    %c0_16 = arith.constant 0 : index
    %c0_17 = arith.constant 0 : index
    %17 = vector.load %arg6[%c0_16, %c0_17] : memref<16x1xf32, #tpu.memory_space<vmem>>, vector<16x1xf32>
    %18 = vector.broadcast %17 : vector<16x1xf32> to vector<16x128xf32>
    %19 = arith.addf %16, %18 : vector<16x128xf32>
    %cst_18 = arith.constant 0.000000e+00 : f32
    %20 = vector.broadcast %cst_18 : f32 to vector<16x128xf32>
    %21 = arith.maximumf %19, %20 : vector<16x128xf32>
    %22 = arith.truncf %21 : vector<16x128xf32> to vector<16x128xbf16>
    %c0_19 = arith.constant 0 : index
    %c0_20 = arith.constant 0 : index
    %c0_21 = arith.constant 0 : index
    %23 = vector.load %arg8[%c0_19, %c0_20, %c0_21] : memref<1x16x128xbf16, #tpu.memory_space<vmem>>, vector<1x16x128xbf16>
    %24 = vector.shape_cast %23 : vector<1x16x128xbf16> to vector<16x128xbf16>
    %25 = vector.shape_cast %22 : vector<16x128xbf16> to vector<1x16x128xbf16>
    tpu.vector_store %arg8[%c0_19, %c0_20, %c0_21], %25 {strides = array<i32>} : memref<1x16x128xbf16, #tpu.memory_space<vmem>>, vector<1x16x128xbf16>,
    return
  }
  func.func @transform_0(%arg0: i32) -> (i32, i32, i32) {
    %c0_i32 = arith.constant 0 : i32
    %c0_i32_0 = arith.constant 0 : i32
    %c0_i32_1 = arith.constant 0 : i32
    return %arg0, %c0_i32, %c0_i32_0 : i32, i32, i32
  }
  func.func @transform_1(%arg0: i32) -> (i32, i32, i32) {
    %c0_i32 = arith.constant 0 : i32
    %c0_i32_0 = arith.constant 0 : i32
    %c0_i32_1 = arith.constant 0 : i32
    return %arg0, %c0_i32, %c0_i32_0 : i32, i32, i32
  }
  func.func @transform_2(%arg0: i32) -> (i32, i32) {
    %c0_i32 = arith.constant 0 : i32
    %c0_i32_0 = arith.constant 0 : i32
    %c0_i32_1 = arith.constant 0 : i32
    return %c0_i32, %c0_i32_0 : i32, i32
  }
  func.func @transform_3(%arg0: i32) -> (i32, i32) {
    %c0_i32 = arith.constant 0 : i32
    %c0_i32_0 = arith.constant 0 : i32
    %c0_i32_1 = arith.constant 0 : i32
    return %c0_i32, %c0_i32_0 : i32, i32
  }
  func.func @transform_4(%arg0: i32) -> (i32, i32) {
    %c0_i32 = arith.constant 0 : i32
    %c0_i32_0 = arith.constant 0 : i32
    %c0_i32_1 = arith.constant 0 : i32
    return %c0_i32, %c0_i32_0 : i32, i32
  }
  func.func @transform_5(%arg0: i32) -> (i32, i32) {
    %c0_i32 = arith.constant 0 : i32
    %c0_i32_0 = arith.constant 0 : i32
    %c0_i32_1 = arith.constant 0 : i32
    return %c0_i32, %c0_i32_0 : i32, i32
  }
  func.func @transform_6(%arg0: i32) -> (i32, i32, i32) {
    %c0_i32 = arith.constant 0 : i32
    %c0_i32_0 = arith.constant 0 : i32
    %c0_i32_1 = arith.constant 0 : i32
    return %arg0, %c0_i32, %c0_i32_0 : i32, i32, i32
  }
  func.func @transform_7(%arg0: i32) -> (i32, i32, i32) {
    %c0_i32 = arith.constant 0 : i32
    %c0_i32_0 = arith.constant 0 : i32
    %c0_i32_1 = arith.constant 0 : i32
    return %arg0, %c0_i32, %c0_i32_0 : i32, i32, i32
  }
}

module attributes {stable_mosaic.version = 11 : i64} {
  func.func @attn_kernel(%arg0: i32, %arg1: memref<1x128x16xbf16, #tpu.memory_space<vmem>>, %arg2: memref<1x16x1024xbf16, #tpu.memory_space<vmem>>, %arg3: memref<1x16x1024xbf16, #tpu.memory_space<vmem>>, %arg4: memref<1x32x1024xf32, #tpu.memory_space<vmem>>, %arg5: memref<64x128xbf16, #tpu.memory_space<vmem>>, %arg6: memref<64x1xf32, #tpu.memory_space<vmem>>, %arg7: memref<32x16xbf16, #tpu.memory_space<vmem>>, %arg8: memref<32x64xbf16, #tpu.memory_space<vmem>>, %arg9: memref<32x1xf32, #tpu.memory_space<vmem>>, %arg10: memref<1x32x1xf32, #tpu.memory_space<vmem>>) attributes {dimension_semantics = [#tpu.dimension_semantics<parallel>], iteration_bounds = array<i64: 2>, scalar_prefetch = 0 : i64, scratch_operands = 0 : i64, tpu.core_type = #tpu.core_type<tc>, window_params = [{transform_indices = @transform_0, window_bounds = array<i64: 1, 128, 16>}, {transform_indices = @transform_1, window_bounds = array<i64: 1, 16, 1024>}, {transform_indices = @transform_2, window_bounds = array<i64: 1, 16, 1024>}, {transform_indices = @transform_3, window_bounds = array<i64: 1, 32, 1024>}, {pipeline_mode = #tpu.pipeline_mode<synchronous>, transform_indices = @transform_4, window_bounds = array<i64: 64, 128>}, {pipeline_mode = #tpu.pipeline_mode<synchronous>, transform_indices = @transform_5, window_bounds = array<i64: 64, 1>}, {pipeline_mode = #tpu.pipeline_mode<synchronous>, transform_indices = @transform_6, window_bounds = array<i64: 32, 16>}, {pipeline_mode = #tpu.pipeline_mode<synchronous>, transform_indices = @transform_7, window_bounds = array<i64: 32, 64>}, {pipeline_mode = #tpu.pipeline_mode<synchronous>, transform_indices = @transform_8, window_bounds = array<i64: 32, 1>}, {transform_indices = @transform_9, window_bounds = array<i64: 1, 32, 1>}]} {
    %c0 = arith.constant 0 : index
    %c0_0 = arith.constant 0 : index
    %c0_1 = arith.constant 0 : index
    %0 = vector.load %arg1[%c0, %c0_0, %c0_1] : memref<1x128x16xbf16, #tpu.memory_space<vmem>>, vector<1x128x16xbf16>
    %1 = vector.shape_cast %0 : vector<1x128x16xbf16> to vector<128x16xbf16>
    %c0_2 = arith.constant 0 : index
    %c0_3 = arith.constant 0 : index
    %c0_4 = arith.constant 0 : index
    %2 = vector.load %arg2[%c0_2, %c0_3, %c0_4] : memref<1x16x1024xbf16, #tpu.memory_space<vmem>>, vector<1x16x1024xbf16>
    %3 = vector.shape_cast %2 : vector<1x16x1024xbf16> to vector<16x1024xbf16>
    %cst = arith.constant dense<0.000000e+00> : vector<128x1024xf32>
    %4 = tpu.matmul %1, %3, %cst {dimension_numbers = #tpu.dot_dimension_numbers<[1], [0], [0], [1], [0, 0, 1, 1], [], []>} : vector<128x16xbf16>, vector<16x1024xbf16>, vector<128x1024xf32> -> vector<128x1024xf32>
    %c0_5 = arith.constant 0 : index
    %c0_6 = arith.constant 0 : index
    %5 = vector.load %arg5[%c0_5, %c0_6] : memref<64x128xbf16, #tpu.memory_space<vmem>>, vector<64x128xbf16>
    %6 = arith.truncf %4 : vector<128x1024xf32> to vector<128x1024xbf16>
    %cst_7 = arith.constant dense<0.000000e+00> : vector<64x1024xf32>
    %7 = tpu.matmul %5, %6, %cst_7 {dimension_numbers = #tpu.dot_dimension_numbers<[1], [0], [0], [1], [0, 0, 1, 1], [], []>} : vector<64x128xbf16>, vector<128x1024xbf16>, vector<64x1024xf32> -> vector<64x1024xf32>
    %c0_8 = arith.constant 0 : index
    %c0_9 = arith.constant 0 : index
    %8 = vector.load %arg6[%c0_8, %c0_9] : memref<64x1xf32, #tpu.memory_space<vmem>>, vector<64x1xf32>
    %9 = vector.broadcast %8 : vector<64x1xf32> to vector<64x1024xf32>
    %10 = arith.addf %7, %9 : vector<64x1024xf32>
    %cst_10 = arith.constant 0.000000e+00 : f32
    %11 = vector.broadcast %cst_10 : f32 to vector<64x1024xf32>
    %12 = arith.maximumf %10, %11 : vector<64x1024xf32>
    %13 = arith.truncf %12 : vector<64x1024xf32> to vector<64x1024xbf16>
    %c0_11 = arith.constant 0 : index
    %c0_12 = arith.constant 0 : index
    %14 = vector.load %arg7[%c0_11, %c0_12] : memref<32x16xbf16, #tpu.memory_space<vmem>>, vector<32x16xbf16>
    %c0_13 = arith.constant 0 : index
    %c0_14 = arith.constant 0 : index
    %c0_15 = arith.constant 0 : index
    %15 = vector.load %arg3[%c0_13, %c0_14, %c0_15] : memref<1x16x1024xbf16, #tpu.memory_space<vmem>>, vector<1x16x1024xbf16>
    %16 = vector.shape_cast %15 : vector<1x16x1024xbf16> to vector<16x1024xbf16>
    %cst_16 = arith.constant dense<0.000000e+00> : vector<32x1024xf32>
    %17 = tpu.matmul %14, %16, %cst_16 {dimension_numbers = #tpu.dot_dimension_numbers<[1], [0], [0], [1], [0, 0, 1, 1], [], []>} : vector<32x16xbf16>, vector<16x1024xbf16>, vector<32x1024xf32> -> vector<32x1024xf32>
    %c0_17 = arith.constant 0 : index
    %c0_18 = arith.constant 0 : index
    %18 = vector.load %arg8[%c0_17, %c0_18] : memref<32x64xbf16, #tpu.memory_space<vmem>>, vector<32x64xbf16>
    %cst_19 = arith.constant dense<0.000000e+00> : vector<32x1024xf32>
    %19 = tpu.matmul %18, %13, %cst_19 {dimension_numbers = #tpu.dot_dimension_numbers<[1], [0], [0], [1], [0, 0, 1, 1], [], []>} : vector<32x64xbf16>, vector<64x1024xbf16>, vector<32x1024xf32> -> vector<32x1024xf32>
    %20 = arith.addf %17, %19 : vector<32x1024xf32>
    %c0_20 = arith.constant 0 : index
    %c0_21 = arith.constant 0 : index
    %21 = vector.load %arg9[%c0_20, %c0_21] : memref<32x1xf32, #tpu.memory_space<vmem>>, vector<32x1xf32>
    %22 = vector.broadcast %21 : vector<32x1xf32> to vector<32x1024xf32>
    %23 = arith.addf %20, %22 : vector<32x1024xf32>
    %cst_22 = arith.constant 0.000000e+00 : f32
    %24 = vector.broadcast %cst_22 : f32 to vector<32x1024xf32>
    %25 = arith.maximumf %23, %24 : vector<32x1024xf32>
    %cst_23 = arith.constant dense<0xFF800000> : vector<32xf32>
    %26 = vector.multi_reduction <maximumf>, %25, %cst_23 [1] : vector<32x1024xf32> to vector<32xf32>
    %27 = vector.shape_cast %26 : vector<32xf32> to vector<32x1xf32>
    %28 = vector.broadcast %27 : vector<32x1xf32> to vector<32x1024xf32>
    %29 = arith.subf %25, %28 : vector<32x1024xf32>
    %30 = math.exp %29 : vector<32x1024xf32>
    %cst_24 = arith.constant dense<0.000000e+00> : vector<32xf32>
    %31 = vector.multi_reduction <add>, %30, %cst_24 [1] : vector<32x1024xf32> to vector<32xf32>
    %32 = vector.shape_cast %31 : vector<32xf32> to vector<32x1xf32>
    %c0_25 = arith.constant 0 : index
    %c0_26 = arith.constant 0 : index
    %c0_27 = arith.constant 0 : index
    %33 = vector.load %arg4[%c0_25, %c0_26, %c0_27] : memref<1x32x1024xf32, #tpu.memory_space<vmem>>, vector<1x32x1024xf32>
    %34 = vector.shape_cast %33 : vector<1x32x1024xf32> to vector<32x1024xf32>
    %35 = arith.mulf %30, %34 : vector<32x1024xf32>
    %cst_28 = arith.constant dense<0.000000e+00> : vector<32xf32>
    %36 = vector.multi_reduction <add>, %35, %cst_28 [1] : vector<32x1024xf32> to vector<32xf32>
    %37 = vector.shape_cast %36 : vector<32xf32> to vector<32x1xf32>
    %38 = arith.divf %37, %32 : vector<32x1xf32>
    %c0_29 = arith.constant 0 : index
    %c0_30 = arith.constant 0 : index
    %c0_31 = arith.constant 0 : index
    %39 = vector.load %arg10[%c0_29, %c0_30, %c0_31] : memref<1x32x1xf32, #tpu.memory_space<vmem>>, vector<1x32x1xf32>
    %40 = vector.shape_cast %39 : vector<1x32x1xf32> to vector<32x1xf32>
    %41 = vector.shape_cast %38 : vector<32x1xf32> to vector<1x32x1xf32>
    tpu.vector_store %arg10[%c0_29, %c0_30, %c0_31], %41 {strides = array<i32>} : memref<1x32x1xf32, #tpu.memory_space<vmem>>, vector<1x32x1xf32>,
    return
  }
  func.func @transform_0(%arg0: i32) -> (i32, i32, i32) {
    %c0_i32 = arith.constant 0 : i32
    %c0_i32_0 = arith.constant 0 : i32
    %c0_i32_1 = arith.constant 0 : i32
    return %arg0, %c0_i32, %c0_i32_0 : i32, i32, i32
  }
  func.func @transform_1(%arg0: i32) -> (i32, i32, i32) {
    %c0_i32 = arith.constant 0 : i32
    %c0_i32_0 = arith.constant 0 : i32
    %c0_i32_1 = arith.constant 0 : i32
    return %arg0, %c0_i32, %c0_i32_0 : i32, i32, i32
  }
  func.func @transform_2(%arg0: i32) -> (i32, i32, i32) {
    %c0_i32 = arith.constant 0 : i32
    %c0_i32_0 = arith.constant 0 : i32
    %c0_i32_1 = arith.constant 0 : i32
    return %arg0, %c0_i32, %c0_i32_0 : i32, i32, i32
  }
  func.func @transform_3(%arg0: i32) -> (i32, i32, i32) {
    %c0_i32 = arith.constant 0 : i32
    %c0_i32_0 = arith.constant 0 : i32
    %c0_i32_1 = arith.constant 0 : i32
    return %arg0, %c0_i32, %c0_i32_0 : i32, i32, i32
  }
  func.func @transform_4(%arg0: i32) -> (i32, i32) {
    %c0_i32 = arith.constant 0 : i32
    %c0_i32_0 = arith.constant 0 : i32
    %c0_i32_1 = arith.constant 0 : i32
    return %c0_i32, %c0_i32_0 : i32, i32
  }
  func.func @transform_5(%arg0: i32) -> (i32, i32) {
    %c0_i32 = arith.constant 0 : i32
    %c0_i32_0 = arith.constant 0 : i32
    %c0_i32_1 = arith.constant 0 : i32
    return %c0_i32, %c0_i32_0 : i32, i32
  }
  func.func @transform_6(%arg0: i32) -> (i32, i32) {
    %c0_i32 = arith.constant 0 : i32
    %c0_i32_0 = arith.constant 0 : i32
    %c0_i32_1 = arith.constant 0 : i32
    return %c0_i32, %c0_i32_0 : i32, i32
  }
  func.func @transform_7(%arg0: i32) -> (i32, i32) {
    %c0_i32 = arith.constant 0 : i32
    %c0_i32_0 = arith.constant 0 : i32
    %c0_i32_1 = arith.constant 0 : i32
    return %c0_i32, %c0_i32_0 : i32, i32
  }
  func.func @transform_8(%arg0: i32) -> (i32, i32) {
    %c0_i32 = arith.constant 0 : i32
    %c0_i32_0 = arith.constant 0 : i32
    %c0_i32_1 = arith.constant 0 : i32
    return %c0_i32, %c0_i32_0 : i32, i32
  }
  func.func @transform_9(%arg0: i32) -> (i32, i32, i32) {
    %c0_i32 = arith.constant 0 : i32
    %c0_i32_0 = arith.constant 0 : i32
    %c0_i32_1 = arith.constant 0 : i32
    return %arg0, %c0_i32, %c0_i32_0 : i32, i32, i32
  }
}

module attributes {stable_mosaic.version = 11 : i64} {
  func.func @proj_kernel(%arg0: i32, %arg1: memref<1x32x256xbf16, #tpu.memory_space<vmem>>, %arg2: memref<1x32x32xbf16, #tpu.memory_space<vmem>>, %arg3: memref<32x32xbf16, #tpu.memory_space<vmem>>, %arg4: memref<32x1xf32, #tpu.memory_space<vmem>>, %arg5: memref<16x32xbf16, #tpu.memory_space<vmem>>, %arg6: memref<16x1xf32, #tpu.memory_space<vmem>>, %arg7: memref<1x32x256xbf16, #tpu.memory_space<vmem>>, %arg8: memref<1x16x32xbf16, #tpu.memory_space<vmem>>) attributes {dimension_semantics = [#tpu.dimension_semantics<parallel>], iteration_bounds = array<i64: 2>, scalar_prefetch = 0 : i64, scratch_operands = 0 : i64, tpu.core_type = #tpu.core_type<tc>, window_params = [{transform_indices = @transform_0, window_bounds = array<i64: 1, 32, 256>}, {transform_indices = @transform_1, window_bounds = array<i64: 1, 32, 32>}, {pipeline_mode = #tpu.pipeline_mode<synchronous>, transform_indices = @transform_2, window_bounds = array<i64: 32, 32>}, {pipeline_mode = #tpu.pipeline_mode<synchronous>, transform_indices = @transform_3, window_bounds = array<i64: 32, 1>}, {pipeline_mode = #tpu.pipeline_mode<synchronous>, transform_indices = @transform_4, window_bounds = array<i64: 16, 32>}, {pipeline_mode = #tpu.pipeline_mode<synchronous>, transform_indices = @transform_5, window_bounds = array<i64: 16, 1>}, {transform_indices = @transform_6, window_bounds = array<i64: 1, 32, 256>}, {transform_indices = @transform_7, window_bounds = array<i64: 1, 16, 32>}]} {
    %c0 = arith.constant 0 : index
    %c0_0 = arith.constant 0 : index
    %0 = vector.load %arg3[%c0, %c0_0] : memref<32x32xbf16, #tpu.memory_space<vmem>>, vector<32x32xbf16>
    %c0_1 = arith.constant 0 : index
    %c0_2 = arith.constant 0 : index
    %c0_3 = arith.constant 0 : index
    %1 = vector.load %arg1[%c0_1, %c0_2, %c0_3] : memref<1x32x256xbf16, #tpu.memory_space<vmem>>, vector<1x32x256xbf16>
    %2 = vector.shape_cast %1 : vector<1x32x256xbf16> to vector<32x256xbf16>
    %cst = arith.constant dense<0.000000e+00> : vector<32x256xf32>
    %3 = tpu.matmul %0, %2, %cst {dimension_numbers = #tpu.dot_dimension_numbers<[1], [0], [0], [1], [0, 0, 1, 1], [], []>} : vector<32x32xbf16>, vector<32x256xbf16>, vector<32x256xf32> -> vector<32x256xf32>
    %c0_4 = arith.constant 0 : index
    %c0_5 = arith.constant 0 : index
    %4 = vector.load %arg4[%c0_4, %c0_5] : memref<32x1xf32, #tpu.memory_space<vmem>>, vector<32x1xf32>
    %5 = vector.broadcast %4 : vector<32x1xf32> to vector<32x256xf32>
    %6 = arith.addf %3, %5 : vector<32x256xf32>
    %cst_6 = arith.constant 0.000000e+00 : f32
    %7 = vector.broadcast %cst_6 : f32 to vector<32x256xf32>
    %8 = arith.maximumf %6, %7 : vector<32x256xf32>
    %9 = arith.truncf %8 : vector<32x256xf32> to vector<32x256xbf16>
    %c0_7 = arith.constant 0 : index
    %c0_8 = arith.constant 0 : index
    %c0_9 = arith.constant 0 : index
    %10 = vector.load %arg7[%c0_7, %c0_8, %c0_9] : memref<1x32x256xbf16, #tpu.memory_space<vmem>>, vector<1x32x256xbf16>
    %11 = vector.shape_cast %10 : vector<1x32x256xbf16> to vector<32x256xbf16>
    %12 = vector.shape_cast %9 : vector<32x256xbf16> to vector<1x32x256xbf16>
    tpu.vector_store %arg7[%c0_7, %c0_8, %c0_9], %12 {strides = array<i32>} : memref<1x32x256xbf16, #tpu.memory_space<vmem>>, vector<1x32x256xbf16>,
    %c0_10 = arith.constant 0 : index
    %c0_11 = arith.constant 0 : index
    %13 = vector.load %arg5[%c0_10, %c0_11] : memref<16x32xbf16, #tpu.memory_space<vmem>>, vector<16x32xbf16>
    %c0_12 = arith.constant 0 : index
    %c0_13 = arith.constant 0 : index
    %c0_14 = arith.constant 0 : index
    %14 = vector.load %arg2[%c0_12, %c0_13, %c0_14] : memref<1x32x32xbf16, #tpu.memory_space<vmem>>, vector<1x32x32xbf16>
    %15 = vector.shape_cast %14 : vector<1x32x32xbf16> to vector<32x32xbf16>
    %cst_15 = arith.constant dense<0.000000e+00> : vector<16x32xf32>
    %16 = tpu.matmul %13, %15, %cst_15 {dimension_numbers = #tpu.dot_dimension_numbers<[1], [0], [0], [1], [0, 0, 1, 1], [], []>} : vector<16x32xbf16>, vector<32x32xbf16>, vector<16x32xf32> -> vector<16x32xf32>
    %c0_16 = arith.constant 0 : index
    %c0_17 = arith.constant 0 : index
    %17 = vector.load %arg6[%c0_16, %c0_17] : memref<16x1xf32, #tpu.memory_space<vmem>>, vector<16x1xf32>
    %18 = vector.broadcast %17 : vector<16x1xf32> to vector<16x32xf32>
    %19 = arith.addf %16, %18 : vector<16x32xf32>
    %cst_18 = arith.constant 0.000000e+00 : f32
    %20 = vector.broadcast %cst_18 : f32 to vector<16x32xf32>
    %21 = arith.maximumf %19, %20 : vector<16x32xf32>
    %22 = arith.truncf %21 : vector<16x32xf32> to vector<16x32xbf16>
    %c0_19 = arith.constant 0 : index
    %c0_20 = arith.constant 0 : index
    %c0_21 = arith.constant 0 : index
    %23 = vector.load %arg8[%c0_19, %c0_20, %c0_21] : memref<1x16x32xbf16, #tpu.memory_space<vmem>>, vector<1x16x32xbf16>
    %24 = vector.shape_cast %23 : vector<1x16x32xbf16> to vector<16x32xbf16>
    %25 = vector.shape_cast %22 : vector<16x32xbf16> to vector<1x16x32xbf16>
    tpu.vector_store %arg8[%c0_19, %c0_20, %c0_21], %25 {strides = array<i32>} : memref<1x16x32xbf16, #tpu.memory_space<vmem>>, vector<1x16x32xbf16>,
    return
  }
  func.func @transform_0(%arg0: i32) -> (i32, i32, i32) {
    %c0_i32 = arith.constant 0 : i32
    %c0_i32_0 = arith.constant 0 : i32
    %c0_i32_1 = arith.constant 0 : i32
    return %arg0, %c0_i32, %c0_i32_0 : i32, i32, i32
  }
  func.func @transform_1(%arg0: i32) -> (i32, i32, i32) {
    %c0_i32 = arith.constant 0 : i32
    %c0_i32_0 = arith.constant 0 : i32
    %c0_i32_1 = arith.constant 0 : i32
    return %arg0, %c0_i32, %c0_i32_0 : i32, i32, i32
  }
  func.func @transform_2(%arg0: i32) -> (i32, i32) {
    %c0_i32 = arith.constant 0 : i32
    %c0_i32_0 = arith.constant 0 : i32
    %c0_i32_1 = arith.constant 0 : i32
    return %c0_i32, %c0_i32_0 : i32, i32
  }
  func.func @transform_3(%arg0: i32) -> (i32, i32) {
    %c0_i32 = arith.constant 0 : i32
    %c0_i32_0 = arith.constant 0 : i32
    %c0_i32_1 = arith.constant 0 : i32
    return %c0_i32, %c0_i32_0 : i32, i32
  }
  func.func @transform_4(%arg0: i32) -> (i32, i32) {
    %c0_i32 = arith.constant 0 : i32
    %c0_i32_0 = arith.constant 0 : i32
    %c0_i32_1 = arith.constant 0 : i32
    return %c0_i32, %c0_i32_0 : i32, i32
  }
  func.func @transform_5(%arg0: i32) -> (i32, i32) {
    %c0_i32 = arith.constant 0 : i32
    %c0_i32_0 = arith.constant 0 : i32
    %c0_i32_1 = arith.constant 0 : i32
    return %c0_i32, %c0_i32_0 : i32, i32
  }
  func.func @transform_6(%arg0: i32) -> (i32, i32, i32) {
    %c0_i32 = arith.constant 0 : i32
    %c0_i32_0 = arith.constant 0 : i32
    %c0_i32_1 = arith.constant 0 : i32
    return %arg0, %c0_i32, %c0_i32_0 : i32, i32, i32
  }
  func.func @transform_7(%arg0: i32) -> (i32, i32, i32) {
    %c0_i32 = arith.constant 0 : i32
    %c0_i32_0 = arith.constant 0 : i32
    %c0_i32_1 = arith.constant 0 : i32
    return %arg0, %c0_i32, %c0_i32_0 : i32, i32, i32
  }
}

module attributes {stable_mosaic.version = 11 : i64} {
  func.func @attn_kernel(%arg0: i32, %arg1: memref<1x32x16xbf16, #tpu.memory_space<vmem>>, %arg2: memref<1x16x256xbf16, #tpu.memory_space<vmem>>, %arg3: memref<1x16x256xbf16, #tpu.memory_space<vmem>>, %arg4: memref<1x32x256xf32, #tpu.memory_space<vmem>>, %arg5: memref<16x32xbf16, #tpu.memory_space<vmem>>, %arg6: memref<16x1xf32, #tpu.memory_space<vmem>>, %arg7: memref<32x16xbf16, #tpu.memory_space<vmem>>, %arg8: memref<32x16xbf16, #tpu.memory_space<vmem>>, %arg9: memref<32x1xf32, #tpu.memory_space<vmem>>, %arg10: memref<1x32x1xf32, #tpu.memory_space<vmem>>) attributes {dimension_semantics = [#tpu.dimension_semantics<parallel>], iteration_bounds = array<i64: 2>, scalar_prefetch = 0 : i64, scratch_operands = 0 : i64, tpu.core_type = #tpu.core_type<tc>, window_params = [{transform_indices = @transform_0, window_bounds = array<i64: 1, 32, 16>}, {transform_indices = @transform_1, window_bounds = array<i64: 1, 16, 256>}, {transform_indices = @transform_2, window_bounds = array<i64: 1, 16, 256>}, {transform_indices = @transform_3, window_bounds = array<i64: 1, 32, 256>}, {pipeline_mode = #tpu.pipeline_mode<synchronous>, transform_indices = @transform_4, window_bounds = array<i64: 16, 32>}, {pipeline_mode = #tpu.pipeline_mode<synchronous>, transform_indices = @transform_5, window_bounds = array<i64: 16, 1>}, {pipeline_mode = #tpu.pipeline_mode<synchronous>, transform_indices = @transform_6, window_bounds = array<i64: 32, 16>}, {pipeline_mode = #tpu.pipeline_mode<synchronous>, transform_indices = @transform_7, window_bounds = array<i64: 32, 16>}, {pipeline_mode = #tpu.pipeline_mode<synchronous>, transform_indices = @transform_8, window_bounds = array<i64: 32, 1>}, {transform_indices = @transform_9, window_bounds = array<i64: 1, 32, 1>}]} {
    %c0 = arith.constant 0 : index
    %c0_0 = arith.constant 0 : index
    %c0_1 = arith.constant 0 : index
    %0 = vector.load %arg1[%c0, %c0_0, %c0_1] : memref<1x32x16xbf16, #tpu.memory_space<vmem>>, vector<1x32x16xbf16>
    %1 = vector.shape_cast %0 : vector<1x32x16xbf16> to vector<32x16xbf16>
    %c0_2 = arith.constant 0 : index
    %c0_3 = arith.constant 0 : index
    %c0_4 = arith.constant 0 : index
    %2 = vector.load %arg2[%c0_2, %c0_3, %c0_4] : memref<1x16x256xbf16, #tpu.memory_space<vmem>>, vector<1x16x256xbf16>
    %3 = vector.shape_cast %2 : vector<1x16x256xbf16> to vector<16x256xbf16>
    %cst = arith.constant dense<0.000000e+00> : vector<32x256xf32>
    %4 = tpu.matmul %1, %3, %cst {dimension_numbers = #tpu.dot_dimension_numbers<[1], [0], [0], [1], [0, 0, 1, 1], [], []>} : vector<32x16xbf16>, vector<16x256xbf16>, vector<32x256xf32> -> vector<32x256xf32>
    %c0_5 = arith.constant 0 : index
    %c0_6 = arith.constant 0 : index
    %5 = vector.load %arg5[%c0_5, %c0_6] : memref<16x32xbf16, #tpu.memory_space<vmem>>, vector<16x32xbf16>
    %6 = arith.truncf %4 : vector<32x256xf32> to vector<32x256xbf16>
    %cst_7 = arith.constant dense<0.000000e+00> : vector<16x256xf32>
    %7 = tpu.matmul %5, %6, %cst_7 {dimension_numbers = #tpu.dot_dimension_numbers<[1], [0], [0], [1], [0, 0, 1, 1], [], []>} : vector<16x32xbf16>, vector<32x256xbf16>, vector<16x256xf32> -> vector<16x256xf32>
    %c0_8 = arith.constant 0 : index
    %c0_9 = arith.constant 0 : index
    %8 = vector.load %arg6[%c0_8, %c0_9] : memref<16x1xf32, #tpu.memory_space<vmem>>, vector<16x1xf32>
    %9 = vector.broadcast %8 : vector<16x1xf32> to vector<16x256xf32>
    %10 = arith.addf %7, %9 : vector<16x256xf32>
    %cst_10 = arith.constant 0.000000e+00 : f32
    %11 = vector.broadcast %cst_10 : f32 to vector<16x256xf32>
    %12 = arith.maximumf %10, %11 : vector<16x256xf32>
    %13 = arith.truncf %12 : vector<16x256xf32> to vector<16x256xbf16>
    %c0_11 = arith.constant 0 : index
    %c0_12 = arith.constant 0 : index
    %14 = vector.load %arg7[%c0_11, %c0_12] : memref<32x16xbf16, #tpu.memory_space<vmem>>, vector<32x16xbf16>
    %c0_13 = arith.constant 0 : index
    %c0_14 = arith.constant 0 : index
    %c0_15 = arith.constant 0 : index
    %15 = vector.load %arg3[%c0_13, %c0_14, %c0_15] : memref<1x16x256xbf16, #tpu.memory_space<vmem>>, vector<1x16x256xbf16>
    %16 = vector.shape_cast %15 : vector<1x16x256xbf16> to vector<16x256xbf16>
    %cst_16 = arith.constant dense<0.000000e+00> : vector<32x256xf32>
    %17 = tpu.matmul %14, %16, %cst_16 {dimension_numbers = #tpu.dot_dimension_numbers<[1], [0], [0], [1], [0, 0, 1, 1], [], []>} : vector<32x16xbf16>, vector<16x256xbf16>, vector<32x256xf32> -> vector<32x256xf32>
    %c0_17 = arith.constant 0 : index
    %c0_18 = arith.constant 0 : index
    %18 = vector.load %arg8[%c0_17, %c0_18] : memref<32x16xbf16, #tpu.memory_space<vmem>>, vector<32x16xbf16>
    %cst_19 = arith.constant dense<0.000000e+00> : vector<32x256xf32>
    %19 = tpu.matmul %18, %13, %cst_19 {dimension_numbers = #tpu.dot_dimension_numbers<[1], [0], [0], [1], [0, 0, 1, 1], [], []>} : vector<32x16xbf16>, vector<16x256xbf16>, vector<32x256xf32> -> vector<32x256xf32>
    %20 = arith.addf %17, %19 : vector<32x256xf32>
    %c0_20 = arith.constant 0 : index
    %c0_21 = arith.constant 0 : index
    %21 = vector.load %arg9[%c0_20, %c0_21] : memref<32x1xf32, #tpu.memory_space<vmem>>, vector<32x1xf32>
    %22 = vector.broadcast %21 : vector<32x1xf32> to vector<32x256xf32>
    %23 = arith.addf %20, %22 : vector<32x256xf32>
    %cst_22 = arith.constant 0.000000e+00 : f32
    %24 = vector.broadcast %cst_22 : f32 to vector<32x256xf32>
    %25 = arith.maximumf %23, %24 : vector<32x256xf32>
    %cst_23 = arith.constant dense<0xFF800000> : vector<32xf32>
    %26 = vector.multi_reduction <maximumf>, %25, %cst_23 [1] : vector<32x256xf32> to vector<32xf32>
    %27 = vector.shape_cast %26 : vector<32xf32> to vector<32x1xf32>
    %28 = vector.broadcast %27 : vector<32x1xf32> to vector<32x256xf32>
    %29 = arith.subf %25, %28 : vector<32x256xf32>
    %30 = math.exp %29 : vector<32x256xf32>
    %cst_24 = arith.constant dense<0.000000e+00> : vector<32xf32>
    %31 = vector.multi_reduction <add>, %30, %cst_24 [1] : vector<32x256xf32> to vector<32xf32>
    %32 = vector.shape_cast %31 : vector<32xf32> to vector<32x1xf32>
    %c0_25 = arith.constant 0 : index
    %c0_26 = arith.constant 0 : index
    %c0_27 = arith.constant 0 : index
    %33 = vector.load %arg4[%c0_25, %c0_26, %c0_27] : memref<1x32x256xf32, #tpu.memory_space<vmem>>, vector<1x32x256xf32>
    %34 = vector.shape_cast %33 : vector<1x32x256xf32> to vector<32x256xf32>
    %35 = arith.mulf %30, %34 : vector<32x256xf32>
    %cst_28 = arith.constant dense<0.000000e+00> : vector<32xf32>
    %36 = vector.multi_reduction <add>, %35, %cst_28 [1] : vector<32x256xf32> to vector<32xf32>
    %37 = vector.shape_cast %36 : vector<32xf32> to vector<32x1xf32>
    %38 = arith.divf %37, %32 : vector<32x1xf32>
    %c0_29 = arith.constant 0 : index
    %c0_30 = arith.constant 0 : index
    %c0_31 = arith.constant 0 : index
    %39 = vector.load %arg10[%c0_29, %c0_30, %c0_31] : memref<1x32x1xf32, #tpu.memory_space<vmem>>, vector<1x32x1xf32>
    %40 = vector.shape_cast %39 : vector<1x32x1xf32> to vector<32x1xf32>
    %41 = vector.shape_cast %38 : vector<32x1xf32> to vector<1x32x1xf32>
    tpu.vector_store %arg10[%c0_29, %c0_30, %c0_31], %41 {strides = array<i32>} : memref<1x32x1xf32, #tpu.memory_space<vmem>>, vector<1x32x1xf32>,
    return
  }
  func.func @transform_0(%arg0: i32) -> (i32, i32, i32) {
    %c0_i32 = arith.constant 0 : i32
    %c0_i32_0 = arith.constant 0 : i32
    %c0_i32_1 = arith.constant 0 : i32
    return %arg0, %c0_i32, %c0_i32_0 : i32, i32, i32
  }
  func.func @transform_1(%arg0: i32) -> (i32, i32, i32) {
    %c0_i32 = arith.constant 0 : i32
    %c0_i32_0 = arith.constant 0 : i32
    %c0_i32_1 = arith.constant 0 : i32
    return %arg0, %c0_i32, %c0_i32_0 : i32, i32, i32
  }
  func.func @transform_2(%arg0: i32) -> (i32, i32, i32) {
    %c0_i32 = arith.constant 0 : i32
    %c0_i32_0 = arith.constant 0 : i32
    %c0_i32_1 = arith.constant 0 : i32
    return %arg0, %c0_i32, %c0_i32_0 : i32, i32, i32
  }
  func.func @transform_3(%arg0: i32) -> (i32, i32, i32) {
    %c0_i32 = arith.constant 0 : i32
    %c0_i32_0 = arith.constant 0 : i32
    %c0_i32_1 = arith.constant 0 : i32
    return %arg0, %c0_i32, %c0_i32_0 : i32, i32, i32
  }
  func.func @transform_4(%arg0: i32) -> (i32, i32) {
    %c0_i32 = arith.constant 0 : i32
    %c0_i32_0 = arith.constant 0 : i32
    %c0_i32_1 = arith.constant 0 : i32
    return %c0_i32, %c0_i32_0 : i32, i32
  }
  func.func @transform_5(%arg0: i32) -> (i32, i32) {
    %c0_i32 = arith.constant 0 : i32
    %c0_i32_0 = arith.constant 0 : i32
    %c0_i32_1 = arith.constant 0 : i32
    return %c0_i32, %c0_i32_0 : i32, i32
  }
  func.func @transform_6(%arg0: i32) -> (i32, i32) {
    %c0_i32 = arith.constant 0 : i32
    %c0_i32_0 = arith.constant 0 : i32
    %c0_i32_1 = arith.constant 0 : i32
    return %c0_i32, %c0_i32_0 : i32, i32
  }
  func.func @transform_7(%arg0: i32) -> (i32, i32) {
    %c0_i32 = arith.constant 0 : i32
    %c0_i32_0 = arith.constant 0 : i32
    %c0_i32_1 = arith.constant 0 : i32
    return %c0_i32, %c0_i32_0 : i32, i32
  }
  func.func @transform_8(%arg0: i32) -> (i32, i32) {
    %c0_i32 = arith.constant 0 : i32
    %c0_i32_0 = arith.constant 0 : i32
    %c0_i32_1 = arith.constant 0 : i32
    return %c0_i32, %c0_i32_0 : i32, i32
  }
  func.func @transform_9(%arg0: i32) -> (i32, i32, i32) {
    %c0_i32 = arith.constant 0 : i32
    %c0_i32_0 = arith.constant 0 : i32
    %c0_i32_1 = arith.constant 0 : i32
    return %arg0, %c0_i32, %c0_i32_0 : i32, i32, i32
  }
}

</mosaic_0001>

<bundles_post_ra>
// kernel: _lambda_.4
= control target key start
LH: loop header
LB: loop body
LE: loop exit
PB: predicated region body
PF: predicated region fallthrough
CT: control target
= control target key end

     0   :  { %s1035_s24 = smov 0   ;;  %s1209_s0 = inlined_call_operand.vmem [shape: bf16[2,32,1024], index: 0, kind: input, shape index: {}]   ;;  %s1210_s1 = inlined_call_operand.vmem [shape: bf16[2,32,128], index: 1, kind: input, shape index: {}]   ;;  %s1211_s2 = inlined_call_operand.vmem [shape: bf16[32,32], index: 2, kind: input, shape index: {}]   ;;  %s1212_s3 = inlined_call_operand.vmem [shape: f32[32,1], index: 3, kind: input, shape index: {}]   ;;  %s1213_s4 = inlined_call_operand.vmem [shape: bf16[16,32], index: 4, kind: input, shape index: {}]   ;;  %s1214_s5 = inlined_call_operand.vmem [shape: f32[16,1], index: 5, kind: input, shape index: {}]   ;;  %s1215_s6 = inlined_call_operand.vmem [shape: bf16[2,32,1024], index: 6, kind: output, shape index: {0}]   ;;  %s1216_s7 = inlined_call_operand.vmem [shape: bf16[2,16,128], index: 7, kind: output, shape index: {1}]  }
   0x1 LB: > { %s828_s25 = sadd.s32 4294967295, %s992_s24   ;;  %p832_p0 = scmp.ge.s32.totalorder %s992_s24, 1  ;;  %s992_s24 = sphi %s1035_s24, %s18_s24  }
   0x2   : > { %p250_p1 = scmp.lt.s32.totalorder %s992_s24, 3 }
   0x4   : > { %p251_p2 = pnand %p832_p0, %p250_p1 }
   0x5   : > { %p292_p3 = scmp.lt.s32.totalorder (!%p251_p2), %s828_s25, 1 }
   0x6   : > { %254 = sbr.rel (%p251_p2) target bundleno = 230 (0xe6), region = 44 }
   0xb   : > { %v333_v0 = vld [vmem:[%s1212_s3] sm:$0xff]  ;;  %v994_v1 = vmov 0   ;;  %s1218_s25 = smov (!%p292_p3, %s828_s25), 1  ;;  %v335_v2 = vld [vmem:[%s1212_s3 + $0x10] sm:$0xff]  ;;  %vm447_vm0 = vcmask 261120   ;;  %v334_v6 = vld [vmem:[%s1212_s3 + $0x8] sm:$0xff] }
   0xc   : > { %983 = vset.pattern.permute.xlu0 %v994_v1  ;;  %984 = vset.pattern.permute.xlu1 %v994_v1  ;;  %s944_s30 = sshll.u32 %s1218_s25, 7  ;;  %s945_s11 = sshll.u32 %s1218_s25, 4  ;;  %v948_v25 = vld [vmem:[%s1211_s2] sm:$0xff]  ;;  %v336_v53 = vld [vmem:[%s1212_s3 + $0x18] sm:$0xff]  ;;  %v949_v55 = vld [vmem:[%s1211_s2 + $0x8] sm:$0xff] }
   0xd   : > { %339 = vperm.xlu0 %983, %v333_v0   ;;  %985 = vset.pattern.permute.xlu2 %v994_v1  ;;  %s1057_s10 = scalar_lea.vmem %s1209_s0, %s944_s30  ;;  %s1098_s18 = scalar_lea.vmem %s1210_s1, %s945_s11  ;;  %v676_v57 = vld [vmem:[%s1214_s5] sm:$0xff]  ;;  %v677_v58 = vld [vmem:[%s1214_s5 + $0x8] sm:$0xff] }
   0xe   : > { %349 = vperm.xlu1 %984, %v335_v2   ;;  %v883_v3 = vld [vmem:[%s1057_s10 + $0x40] sm:$0xf]  ;;  %v958_v5 = vld [vmem:[%s1057_s10 + $0x44] sm:$0xf]  ;;  %v891_v9 = vld [vmem:[%s1057_s10 + $0x48] sm:$0xf]  ;;  %680 = vperm.xlu2 %985, %v676_v57   ;;  %s1148_s11 = scalar_lea.vmem %s1215_s6, %s944_s30 }
   0xf   : > { %v962_v4 = vld [vmem:[%s1057_s10 + $0x5c] sm:$0xf0]  ;;  %v885_v8 = vld [vmem:[%s1057_s10 + $0x60] sm:$0xf0]  ;;  %v963_v10 = vld [vmem:[%s1057_s10 + $0x64] sm:$0xf0] }
  0x10   : > { %v884_v7 = vor.u32 %v962_v4, %v883_v3  ;;  %v888_v11 = vor.u32 %v958_v5, %v885_v8  ;;  %v892_v12 = vor.u32 %v963_v10, %v891_v9  ;;  %v959_v13 = vld [vmem:[%s1057_s10 + $0x4c] sm:$0xf]  ;;  %v851_v15 = vld [vmem:[%s1057_s10] sm:$0xf]  ;;  %v950_v18 = vld [vmem:[%s1057_s10 + $0x4] sm:$0xf] }
  0x11   : > { %v893_v14 = vld [vmem:[%s1057_s10 + $0x68] sm:$0xf0]  ;;  %v954_v17 = vld [vmem:[%s1057_s10 + $0x1c] sm:$0xf0]  ;;  %v853_v19 = vld [vmem:[%s1057_s10 + $0x20] sm:$0xf0] }
  0x12   : > { %460 = vmatpush.bf16.msra.mxu0 %v884_v7  ;;  %v896_v16 = vor.u32 %v959_v13, %v893_v14  ;;  %479 = vmatpush.bf16.msra.mxu1 %v888_v11  ;;  %v852_v20 = vor.u32 %v954_v17, %v851_v15  ;;  %v856_v21 = vor.u32 %v950_v18, %v853_v19  ;;  %v859_v22 = vld [vmem:[%s1057_s10 + $0x8] sm:$0xf]  ;;  %v951_v24 = vld [vmem:[%s1057_s10 + $0xc] sm:$0xf]  ;;  %v899_v28 = vld [vmem:[%s1057_s10 + $0x50] sm:$0xf] }
  0x13   : > { %498 = vmatpush.bf16.msra.mxu2 %v892_v12  ;;  %v955_v23 = vld [vmem:[%s1057_s10 + $0x24] sm:$0xf0]  ;;  %v861_v27 = vld [vmem:[%s1057_s10 + $0x28] sm:$0xf0]  ;;  %v964_v29 = vld [vmem:[%s1057_s10 + $0x6c] sm:$0xf0] }
  0x14   : > { %517 = vmatpush.bf16.msra.mxu3 %v896_v16  ;;  %v860_v26 = vor.u32 %v955_v23, %v859_v22  ;;  %v864_v30 = vor.u32 %v951_v24, %v861_v27  ;;  %v900_v31 = vor.u32 %v964_v29, %v899_v28  ;;  %v907_v32 = vld [vmem:[%s1057_s10 + $0x58] sm:$0xf]  ;;  %v961_v34 = vld [vmem:[%s1057_s10 + $0x5c] sm:$0xf]  ;;  %v867_v37 = vld [vmem:[%s1057_s10 + $0x10] sm:$0xf] }
  0x15   : > { %344 = vperm.xlu0 %983, %v334_v6   ;;  %v965_v33 = vld [vmem:[%s1057_s10 + $0x74] sm:$0xf0]  ;;  %v909_v36 = vld [vmem:[%s1057_s10 + $0x78] sm:$0xf0]  ;;  %v956_v38 = vld [vmem:[%s1057_s10 + $0x2c] sm:$0xf0] }
  0x16   : > { %461 = vmatpush.bf16.msra.mxu0 %v852_v20  ;;  %v908_v35 = vor.u32 %v965_v33, %v907_v32  ;;  %480 = vmatpush.bf16.msra.mxu1 %v856_v21  ;;  %v960_v39 = vld [vmem:[%s1057_s10 + $0x54] sm:$0xf]  ;;  %v875_v41 = vld [vmem:[%s1057_s10 + $0x18] sm:$0xf]  ;;  %v912_v42 = vor.u32 %v961_v34, %v909_v36  ;;  %v868_v43 = vor.u32 %v956_v38, %v867_v37  ;;  %v953_v46 = vld [vmem:[%s1057_s10 + $0x1c] sm:$0xf] }
  0x17   : > { %499 = vmatpush.bf16.msra.mxu2 %v860_v26  ;;  %v901_v40 = vld [vmem:[%s1057_s10 + $0x70] sm:$0xf0]  ;;  %v957_v45 = vld [vmem:[%s1057_s10 + $0x34] sm:$0xf0]  ;;  %v877_v48 = vld [vmem:[%s1057_s10 + $0x38] sm:$0xf0]  ;;  %354 = vperm.xlu1 %984, %v336_v53  }
  0x18   : > { %518 = vmatpush.bf16.msra.mxu3 %v864_v30  ;;  %v904_v44 = vor.u32 %v960_v39, %v901_v40  ;;  %v876_v47 = vor.u32 %v957_v45, %v875_v41  ;;  %v952_v49 = vld [vmem:[%s1057_s10 + $0x14] sm:$0xf]  ;;  %v968_v51 = vld [vmem:[%s1098_s18 + $0x8] sm:$0xff]  ;;  %v880_v54 = vor.u32 %v953_v46, %v877_v48  ;;  %v967_v56 = vld [vmem:[%s1098_s18] sm:$0xff]  ;;  %685 = vperm.xlu2 %985, %v677_v58   ;;  %s947_s30 = sshll.u32 %s1218_s25, 3 }
  0x19   : > { %913 = vmatmul.msk.bf16.vlgmr.msra.gmra.mxu0 %vm447_vm0, %v948_v25  ;;  %v869_v50 = vld [vmem:[%s1057_s10 + $0x30] sm:$0xf0]  ;;  %915 = vmatmul.msk.bf16.vlgmr.msra.gmra.mxu1 %vm447_vm0, %v948_v25  ;;  %v966_v59 = vld [vmem:[%s1213_s4] sm:$0xff]  ;;  %s311_s14 = scalar_lea.vmem %s1216_s7, %s947_s30 }
  0x1a   : > { %536 = vmatpush.bf16.msrb.mxu0 %v900_v31  ;;  %917 = vmatmul.msk.bf16.vlgmr.msra.gmra.mxu2 %vm447_vm0, %v948_v25  ;;  %v872_v52 = vor.u32 %v952_v49, %v869_v50 }
  0x1b   : > { %574 = vmatpush.bf16.msrb.mxu2 %v908_v35  ;;  %919 = vmatmul.msk.bf16.vlgmr.msra.gmra.mxu3 %vm447_vm0, %v948_v25 }
  0x1c   : > { %555 = vmatpush.bf16.msrb.mxu1 %v904_v44  ;;  %593 = vmatpush.bf16.msrb.mxu3 %v912_v42 }
  0x1e   : > { %537 = vmatpush.bf16.msrb.mxu0 %v868_v43 }
  0x1f   : > { %575 = vmatpush.bf16.msrb.mxu2 %v876_v47 }
  0x20   : > { %556 = vmatpush.bf16.msrb.mxu1 %v872_v52  ;;  %594 = vmatpush.bf16.msrb.mxu3 %v880_v54 }
  0x22   : > { %714 = vmatpush.bf16.msra.mxu0 %v968_v51 }
  0x26   : > { %715 = vmatpush.bf16.msra.mxu0 %v967_v56 }
  0x29   : > { %914 = vmatmul.msk.bf16.gmra.mxu0 %vm447_vm0, %v949_v55  ;;  %916 = vmatmul.msk.bf16.gmra.mxu1 %vm447_vm0, %v949_v55 }
  0x2a   : > { %918 = vmatmul.msk.bf16.gmra.mxu2 %vm447_vm0, %v949_v55 }
  0x2b   : > { %920 = vmatmul.msk.bf16.gmra.mxu3 %vm447_vm0, %v949_v55 }
  0x39   : > { %921 = vmatmul.msk.bf16.vlgmr.msrb.gmra.mxu0 %vm447_vm0, %v948_v25  ;;  %923 = vmatmul.msk.bf16.vlgmr.msrb.gmra.mxu1 %vm447_vm0, %v948_v25 }
  0x3a   : > { %925 = vmatmul.msk.bf16.vlgmr.msrb.gmra.mxu2 %vm447_vm0, %v948_v25 }
  0x3b   : > { %927 = vmatmul.msk.bf16.vlgmr.msrb.gmra.mxu3 %vm447_vm0, %v948_v25 }
  0x49   : > { %922 = vmatmul.msk.bf16.gmra.mxu0 %vm447_vm0, %v949_v55  ;;  %924 = vmatmul.msk.bf16.gmra.mxu1 %vm447_vm0, %v949_v55 }
  0x4a   : > { %926 = vmatmul.msk.bf16.gmra.mxu2 %vm447_vm0, %v949_v55 }
  0x4b   : > { %928 = vmatmul.msk.bf16.gmra.mxu3 %vm447_vm0, %v949_v55 }
  0x59   : > { %941 = vmatmul.msk.bf16.vlgmr.msra.gmra.mxu0 %vm447_vm0, %v966_v59 }
  0x7f   : > { %v1139_v60 = vpop.permute.xlu0 %339 }
  0x80   : > { %v1157_v17 = vpop.permute.xlu1 %349 }
  0x87   : > { %v1150_v4 = vpop.permute.xlu0 %344 }
  0x89   : > { %v1165_v34 = vpop.permute.xlu1 %354 }
  0x96   : > { %v463_v61 = vpop.f32.mrf.mxu0  ;;  %v482_v63 = vpop.f32.mrf.mxu1 }
  0x97   : > { %v464_v62 = vadd.f32 %v463_v61, %v1139_v60  ;;  %v483_v0 = vadd.f32 %v482_v63, %v1139_v60 }
  0x99   : > { %v606_v1 = vmax.f32 %v464_v62, 0.0  ;;  %v607_v2 = vmax.f32 %v483_v0, 0.0 }
  0x9b   : > { %v638_v3 = vpack.c.bf16 %v607_v2, %v606_v1 }
  0x9d   : > { %v501_v5 = vpop.f32.mrf.mxu2  ;;  %654 = vst [vmem:[%s1148_s11] sm:$0xff] %v638_v3 }
  0x9e   : > { %v465_v6 = vpop.f32.mrf.mxu0  ;;  %v502_v7 = vadd.f32 %v501_v5, %v1139_v60  ;;  %v520_v8 = vpop.f32.mrf.mxu3 }
  0x9f   : > { %v466_v9 = vadd.f32 %v465_v6, %v1150_v4  ;;  %v484_v10 = vpop.f32.mrf.mxu1  ;;  %v521_v11 = vadd.f32 %v520_v8, %v1139_v60 }
  0xa0   : > { %v485_v12 = vadd.f32 %v484_v10, %v1150_v4  ;;  %v608_v13 = vmax.f32 %v502_v7, 0.0 }
  0xa1   : > { %v614_v14 = vmax.f32 %v466_v9, 0.0  ;;  %v609_v15 = vmax.f32 %v521_v11, 0.0 }
  0xa2   : > { %v615_v16 = vmax.f32 %v485_v12, 0.0 }
  0xa3   : > { %v639_v18 = vpack.c.bf16 %v609_v15, %v608_v13 }
  0xa4   : > { %v642_v19 = vpack.c.bf16 %v615_v16, %v614_v14 }
  0xa5   : > { %655 = vst [vmem:[%s1148_s11 + $0x8] sm:$0xff] %v639_v18  ;;  %v503_v20 = vpop.f32.mrf.mxu2 }
  0xa6   : > { %658 = vst [vmem:[%s1148_s11 + $0x20] sm:$0xff] %v642_v19  ;;  %v468_v21 = vpop.f32.mrf.mxu0  ;;  %v504_v22 = vadd.f32 %v503_v20, %v1150_v4  ;;  %v522_v23 = vpop.f32.mrf.mxu3 }
  0xa7   : > { %v469_v24 = vadd.f32 %v468_v21, %v1157_v17  ;;  %v487_v25 = vpop.f32.mrf.mxu1  ;;  %v523_v26 = vadd.f32 %v522_v23, %v1150_v4 }
  0xa8   : > { %v488_v27 = vadd.f32 %v487_v25, %v1157_v17  ;;  %v616_v28 = vmax.f32 %v504_v22, 0.0 }
  0xa9   : > { %v622_v29 = vmax.f32 %v469_v24, 0.0  ;;  %v617_v30 = vmax.f32 %v523_v26, 0.0 }
  0xaa   : > { %v623_v31 = vmax.f32 %v488_v27, 0.0 }
  0xab   : > { %v643_v32 = vpack.c.bf16 %v617_v30, %v616_v28 }
  0xac   : > { %v646_v33 = vpack.c.bf16 %v623_v31, %v622_v29 }
  0xad   : > { %659 = vst [vmem:[%s1148_s11 + $0x28] sm:$0xff] %v643_v32  ;;  %v506_v35 = vpop.f32.mrf.mxu2 }
  0xae   : > { %662 = vst [vmem:[%s1148_s11 + $0x40] sm:$0xff] %v646_v33  ;;  %v470_v36 = vpop.f32.mrf.mxu0  ;;  %v507_v37 = vadd.f32 %v506_v35, %v1157_v17  ;;  %v525_v38 = vpop.f32.mrf.mxu3 }
  0xaf   : > { %v471_v39 = vadd.f32 %v470_v36, %v1165_v34  ;;  %v489_v40 = vpop.f32.mrf.mxu1  ;;  %v526_v41 = vadd.f32 %v525_v38, %v1157_v17 }
  0xb0   : > { %v490_v42 = vadd.f32 %v489_v40, %v1165_v34  ;;  %v624_v43 = vmax.f32 %v507_v37, 0.0 }
  0xb1   : > { %v630_v44 = vmax.f32 %v471_v39, 0.0  ;;  %v625_v45 = vmax.f32 %v526_v41, 0.0 }
  0xb2   : > { %v631_v46 = vmax.f32 %v490_v42, 0.0  ;;  %v681_v42 = vpop.permute.xlu2 %680 }
  0xb3   : > { %v647_v47 = vpack.c.bf16 %v625_v45, %v624_v43 }
  0xb4   : > { %v650_v48 = vpack.c.bf16 %v631_v46, %v630_v44 }
  0xb5   : > { %663 = vst [vmem:[%s1148_s11 + $0x48] sm:$0xff] %v647_v47  ;;  %v508_v49 = vpop.f32.mrf.mxu2 }
  0xb6   : > { %666 = vst [vmem:[%s1148_s11 + $0x60] sm:$0xff] %v650_v48  ;;  %v509_v50 = vadd.f32 %v508_v49, %v1165_v34  ;;  %v527_v51 = vpop.f32.mrf.mxu3  ;;  %v539_v52 = vpop.f32.mrf.mxu0 }
  0xb7   : > { %v528_v53 = vadd.f32 %v527_v51, %v1165_v34  ;;  %v540_v54 = vadd.f32 %v539_v52, %v1139_v60  ;;  %v558_v55 = vpop.f32.mrf.mxu1 }
  0xb8   : > { %v632_v56 = vmax.f32 %v509_v50, 0.0  ;;  %v559_v57 = vadd.f32 %v558_v55, %v1139_v60 }
  0xb9   : > { %v633_v58 = vmax.f32 %v528_v53, 0.0  ;;  %v610_v59 = vmax.f32 %v540_v54, 0.0 }
  0xba   : > { %v611_v61 = vmax.f32 %v559_v57, 0.0  ;;  %v686_v52 = vpop.permute.xlu2 %685 }
  0xbb   : > { %v651_v62 = vpack.c.bf16 %v633_v58, %v632_v56 }
  0xbc   : > { %v640_v63 = vpack.c.bf16 %v611_v61, %v610_v59 }
  0xbd   : > { %667 = vst [vmem:[%s1148_s11 + $0x68] sm:$0xff] %v651_v62  ;;  %v577_v0 = vpop.f32.mrf.mxu2 }
  0xbe   : > { %656 = vst [vmem:[%s1148_s11 + $0x10] sm:$0xff] %v640_v63  ;;  %v541_v1 = vpop.f32.mrf.mxu0  ;;  %v578_v2 = vadd.f32 %v577_v0, %v1139_v60  ;;  %v596_v3 = vpop.f32.mrf.mxu3 }
  0xbf   : > { %v542_v5 = vadd.f32 %v541_v1, %v1150_v4  ;;  %v560_v6 = vpop.f32.mrf.mxu1  ;;  %v597_v7 = vadd.f32 %v596_v3, %v1139_v60 }
  0xc0   : > { %v561_v8 = vadd.f32 %v560_v6, %v1150_v4  ;;  %v612_v9 = vmax.f32 %v578_v2, 0.0 }
  0xc1   : > { %v618_v10 = vmax.f32 %v542_v5, 0.0  ;;  %v613_v11 = vmax.f32 %v597_v7, 0.0 }
  0xc2   : > { %v619_v12 = vmax.f32 %v561_v8, 0.0 }
  0xc3   : > { %v641_v13 = vpack.c.bf16 %v613_v11, %v612_v9 }
  0xc4   : > { %v644_v14 = vpack.c.bf16 %v619_v12, %v618_v10 }
  0xc5   : > { %657 = vst [vmem:[%s1148_s11 + $0x18] sm:$0xff] %v641_v13  ;;  %v579_v15 = vpop.f32.mrf.mxu2 }
  0xc6   : > { %660 = vst [vmem:[%s1148_s11 + $0x30] sm:$0xff] %v644_v14  ;;  %v544_v16 = vpop.f32.mrf.mxu0  ;;  %v580_v18 = vadd.f32 %v579_v15, %v1150_v4  ;;  %v598_v19 = vpop.f32.mrf.mxu3 }
  0xc7   : > { %v545_v20 = vadd.f32 %v544_v16, %v1157_v17  ;;  %v563_v60 = vpop.f32.mrf.mxu1  ;;  %v599_v21 = vadd.f32 %v598_v19, %v1150_v4 }
  0xc8   : > { %v564_v22 = vadd.f32 %v563_v60, %v1157_v17  ;;  %v620_v23 = vmax.f32 %v580_v18, 0.0 }
  0xc9   : > { %v626_v24 = vmax.f32 %v545_v20, 0.0  ;;  %v621_v25 = vmax.f32 %v599_v21, 0.0 }
  0xca   : > { %v627_v26 = vmax.f32 %v564_v22, 0.0 }
  0xcb   : > { %v645_v27 = vpack.c.bf16 %v621_v25, %v620_v23 }
  0xcc   : > { %v648_v28 = vpack.c.bf16 %v627_v26, %v626_v24 }
  0xcd   : > { %661 = vst [vmem:[%s1148_s11 + $0x38] sm:$0xff] %v645_v27  ;;  %v582_v29 = vpop.f32.mrf.mxu2 }
  0xce   : > { %664 = vst [vmem:[%s1148_s11 + $0x50] sm:$0xff] %v648_v28  ;;  %v546_v30 = vpop.f32.mrf.mxu0  ;;  %v583_v31 = vadd.f32 %v582_v29, %v1157_v17  ;;  %v601_v32 = vpop.f32.mrf.mxu3 }
  0xcf   : > { %v547_v33 = vadd.f32 %v546_v30, %v1165_v34  ;;  %v565_v4 = vpop.f32.mrf.mxu1  ;;  %v602_v35 = vadd.f32 %v601_v32, %v1157_v17 }
  0xd0   : > { %v566_v36 = vadd.f32 %v565_v4, %v1165_v34  ;;  %v628_v37 = vmax.f32 %v583_v31, 0.0 }
  0xd1   : > { %v634_v38 = vmax.f32 %v547_v33, 0.0  ;;  %v629_v39 = vmax.f32 %v602_v35, 0.0 }
  0xd2   : > { %v635_v40 = vmax.f32 %v566_v36, 0.0 }
  0xd3   : > { %v649_v41 = vpack.c.bf16 %v629_v39, %v628_v37 }
  0xd4   : > { %v652_v43 = vpack.c.bf16 %v635_v40, %v634_v38 }
  0xd5   : > { %665 = vst [vmem:[%s1148_s11 + $0x58] sm:$0xff] %v649_v41  ;;  %v584_v44 = vpop.f32.mrf.mxu2 }
  0xd6   : > { %668 = vst [vmem:[%s1148_s11 + $0x70] sm:$0xff] %v652_v43  ;;  %v585_v45 = vadd.f32 %v584_v44, %v1165_v34  ;;  %v603_v46 = vpop.f32.mrf.mxu3  ;;  %v717_v47 = vpop.f32.mrf.mxu0 }
  0xd7   : > { %v604_v17 = vadd.f32 %v603_v46, %v1165_v34  ;;  %v718_v51 = vadd.f32 %v717_v47, %v681_v42 }
  0xd8   : > { %v636_v48 = vmax.f32 %v585_v45, 0.0 }
  0xd9   : > { %v637_v49 = vmax.f32 %v604_v17, 0.0  ;;  %v722_v55 = vmax.f32 %v718_v51, 0.0 }
  0xdb   : > { %v653_v50 = vpack.c.bf16 %v637_v49, %v636_v48 }
  0xdd   : > { %669 = vst [vmem:[%s1148_s11 + $0x78] sm:$0xff] %v653_v50 }
  0xde   : > { %v719_v53 = vpop.f32.mrf.mxu0 }
  0xdf   : > { %v720_v54 = vadd.f32 %v719_v53, %v686_v52 }
  0xe1   : > { %v723_v56 = vmax.f32 %v720_v54, 0.0 }
  0xe3   : > { %v972_v57 = vpack.c.bf16 %v723_v56, %v722_v55 }
  0xe5   : > { %973 = vst [vmem:[%s311_s14] sm:$0xff] %v972_v57  }
  0xe6 PF: > { %s18_s24 = sadd.s32 1, %s992_s24  }
  0xe7   : > { %p15_p4 = scmp.ge.s32.totalorder %s18_s24, 4  }
  0xe9   :  { %17 = sbr.rel (!%p15_p4) target bundleno = 1 (0x1), region = 89 }

// kernel: _lambda_.5
= control target key start
LH: loop header
LB: loop body
LE: loop exit
PB: predicated region body
PF: predicated region fallthrough
CT: control target
= control target key end

     0   :  { %s2713_s30 = smov 0   ;;  %s3983_s0 = inlined_call_operand.vmem [shape: bf16[2,128,16], index: 0, kind: input, shape index: {}]   ;;  %s3984_s1 = inlined_call_operand.vmem [shape: bf16[2,16,1024], index: 1, kind: input, shape index: {}]   ;;  %s3985_s2 = inlined_call_operand.vmem [shape: bf16[2,16,1024], index: 2, kind: input, shape index: {}]   ;;  %s3986_s3 = inlined_call_operand.vmem [shape: f32[2,32,1024], index: 3, kind: input, shape index: {}]   ;;  %s3987_s4 = inlined_call_operand.vmem [shape: bf16[64,128], index: 4, kind: input, shape index: {}]   ;;  %s3988_s5 = inlined_call_operand.vmem [shape: f32[64,1], index: 5, kind: input, shape index: {}]   ;;  %s3989_s6 = inlined_call_operand.vmem [shape: bf16[32,16], index: 6, kind: input, shape index: {}]   ;;  %s3990_s7 = inlined_call_operand.vmem [shape: bf16[32,64], index: 7, kind: input, shape index: {}]   ;;  %s3991_s8 = inlined_call_operand.vmem [shape: f32[32,1], index: 8, kind: input, shape index: {}]   ;;  %s3992_s9 = inlined_call_operand.vmem [shape: f32[2,32,1], index: 9, kind: output, shape index: {}]  }
   0x1 LB: > { %s2292_s10 = sadd.s32 4294967295, %s2660_s30   ;;  %p2296_p0 = scmp.ge.s32.totalorder %s2660_s30, 1  ;;  %s2660_s30 = sphi %s2713_s30, %s19_s30  }
   0x2   : > { %p317_p1 = scmp.lt.s32.totalorder %s2660_s30, 3 }
   0x4   : > { %p318_p2 = pnand %p2296_p0, %p317_p1 }
   0x6   : > { %321 = sbr.rel (%p318_p2) target bundleno = 1160 (0x488), region = 56 }
   0xb   : > { %p368_p3 = scmp.lt.s32.totalorder %s2292_s10, 1  ;;  %vm498_vm0 = vcmask 130048   ;;  %vm1413_vm1 = vcmask 523264   ;;  %vm2196_vm6 = vcmask 7168  }
   0xd   : > { %s4092_s10 = smov (!%p368_p3, %s2292_s10), 1 }
   0xe   : > { %s2724_s11 = sshll.u32 %s4092_s10, 6  ;;  %s2536_s24 = sshll.u32 %s4092_s10, 8 }
   0xf   : > { %s2730_s14 = scalar_lea.vmem %s3983_s0, %s2724_s11  ;;  %s2736_s17 = scalar_lea.vmem %s3984_s1, %s2724_s11 }
  0x10   : > { %v2341_v0 = vld [vmem:[%s2736_s17] sm:$0xf]  ;;  %v2546_v2 = vld [vmem:[%s2736_s17 + $0x4] sm:$0xf]  ;;  %v2349_v5 = vld [vmem:[%s2736_s17 + $0x8] sm:$0xf]  ;;  %s3438_s20 = scalar_lea.vmem %s3985_s2, %s2724_s11  ;;  %s3828_s27 = scalar_lea.vmem %s3986_s3, %s2536_s24 }
  0x11   : > { %v2550_v1 = vld [vmem:[%s2736_s17 + $0x1c] sm:$0xf0]  ;;  %v2343_v4 = vld [vmem:[%s2736_s17 + $0x20] sm:$0xf0]  ;;  %v2551_v6 = vld [vmem:[%s2736_s17 + $0x24] sm:$0xf0] }
  0x12   : > { %v2342_v3 = vor.u32 %v2550_v1, %v2341_v0  ;;  %v2346_v7 = vor.u32 %v2546_v2, %v2343_v4  ;;  %v2350_v8 = vor.u32 %v2551_v6, %v2349_v5  ;;  %v2547_v9 = vld [vmem:[%s2736_s17 + $0xc] sm:$0xf]  ;;  %v2747_v11 = vld [vmem:[%s2730_s14] sm:$0xff]  ;;  %v2365_v13 = vld [vmem:[%s2736_s17 + $0x18] sm:$0xf]  ;;  %s2537_s28 = sshll.u32 %s4092_s10, 5 }
  0x13   : > { %v2351_v10 = vld [vmem:[%s2736_s17 + $0x28] sm:$0xf0]  ;;  %v2553_v14 = vld [vmem:[%s2736_s17 + $0x34] sm:$0xf0]  ;;  %v2549_v15 = vld [vmem:[%s2736_s17 + $0x1c] sm:$0xf]  ;;  %s3970_s13 = scalar_lea.vmem %s3992_s9, %s2537_s28 }
  0x14   : > { %530 = vmatpush.bf16.msra.mxu0 %v2342_v3  ;;  %v2354_v12 = vor.u32 %v2547_v9, %v2351_v10  ;;  %579 = vmatpush.bf16.msra.mxu1 %v2346_v7  ;;  %v2366_v16 = vor.u32 %v2553_v14, %v2365_v13  ;;  %v2367_v17 = vld [vmem:[%s2736_s17 + $0x38] sm:$0xf0]  ;;  %v2357_v18 = vld [vmem:[%s2736_s17 + $0x10] sm:$0xf]  ;;  %v2539_v22 = vld [vmem:[%s2730_s14 + $0x8] sm:$0xff] }
  0x15   : > { %628 = vmatpush.bf16.msra.mxu2 %v2350_v8  ;;  %v2552_v19 = vld [vmem:[%s2736_s17 + $0x2c] sm:$0xf0]  ;;  %v2370_v20 = vor.u32 %v2549_v15, %v2367_v17  ;;  %v2548_v23 = vld [vmem:[%s2736_s17 + $0x14] sm:$0xf]  ;;  %v2782_v27 = vld [vmem:[%s2730_s14 + $0x18] sm:$0xff] }
  0x16   : > { %677 = vmatpush.bf16.msra.mxu3 %v2354_v12  ;;  %v2358_v21 = vor.u32 %v2552_v19, %v2357_v18  ;;  %v2359_v24 = vld [vmem:[%s2736_s17 + $0x30] sm:$0xf0]  ;;  %v2793_v28 = vld [vmem:[%s2730_s14 + $0x20] sm:$0xff]  ;;  %v2804_v29 = vld [vmem:[%s2730_s14 + $0x28] sm:$0xff] }
  0x17   : > { %2371 = vmatmul.msk.bf16.vlgmr.msra.gmra.mxu0 %vm498_vm0, %v2747_v11  ;;  %2379 = vmatmul.msk.bf16.vlgmr.msra.gmra.mxu1 %vm498_vm0, %v2747_v11  ;;  %v2362_v25 = vor.u32 %v2548_v23, %v2359_v24  ;;  %v2771_v26 = vld [vmem:[%s2730_s14 + $0x10] sm:$0xff]  ;;  %v2826_v31 = vld [vmem:[%s2730_s14 + $0x38] sm:$0xff] }
  0x18   : > { %2387 = vmatmul.msk.bf16.vlgmr.msra.gmra.mxu2 %vm498_vm0, %v2747_v11  ;;  %726 = vmatpush.bf16.msrb.mxu0 %v2358_v21  ;;  %v2815_v30 = vld [vmem:[%s2730_s14 + $0x30] sm:$0xff] }
  0x19   : > { %2395 = vmatmul.msk.bf16.vlgmr.msra.gmra.mxu3 %vm498_vm0, %v2747_v11  ;;  %824 = vmatpush.bf16.msrb.mxu2 %v2366_v16 }
  0x1a   : > { %873 = vmatpush.bf16.msrb.mxu3 %v2370_v20  ;;  %775 = vmatpush.bf16.msrb.mxu1 %v2362_v25 }
  0x27   : > { %2372 = vmatmul.msk.bf16.gmra.mxu0 %vm498_vm0, %v2539_v22  ;;  %2380 = vmatmul.msk.bf16.gmra.mxu1 %vm498_vm0, %v2539_v22 }
  0x28   : > { %2388 = vmatmul.msk.bf16.gmra.mxu2 %vm498_vm0, %v2539_v22 }
  0x29   : > { %2396 = vmatmul.msk.bf16.gmra.mxu3 %vm498_vm0, %v2539_v22 }
  0x37   : > { %2373 = vmatmul.msk.bf16.gmra.mxu0 %vm498_vm0, %v2771_v26  ;;  %2381 = vmatmul.msk.bf16.gmra.mxu1 %vm498_vm0, %v2771_v26 }
  0x38   : > { %2389 = vmatmul.msk.bf16.gmra.mxu2 %vm498_vm0, %v2771_v26 }
  0x39   : > { %2397 = vmatmul.msk.bf16.gmra.mxu3 %vm498_vm0, %v2771_v26 }
  0x47   : > { %2374 = vmatmul.msk.bf16.gmra.mxu0 %vm498_vm0, %v2782_v27  ;;  %2382 = vmatmul.msk.bf16.gmra.mxu1 %vm498_vm0, %v2782_v27 }
  0x48   : > { %2390 = vmatmul.msk.bf16.gmra.mxu2 %vm498_vm0, %v2782_v27 }
  0x49   : > { %2398 = vmatmul.msk.bf16.gmra.mxu3 %vm498_vm0, %v2782_v27 }
  0x57   : > { %2375 = vmatmul.msk.bf16.gmra.mxu0 %vm498_vm0, %v2793_v28  ;;  %2383 = vmatmul.msk.bf16.gmra.mxu1 %vm498_vm0, %v2793_v28 }
  0x58   : > { %2391 = vmatmul.msk.bf16.gmra.mxu2 %vm498_vm0, %v2793_v28 }
  0x59   : > { %2399 = vmatmul.msk.bf16.gmra.mxu3 %vm498_vm0, %v2793_v28 }
  0x67   : > { %2376 = vmatmul.msk.bf16.gmra.mxu0 %vm498_vm0, %v2804_v29  ;;  %2384 = vmatmul.msk.bf16.gmra.mxu1 %vm498_vm0, %v2804_v29 }
  0x68   : > { %2392 = vmatmul.msk.bf16.gmra.mxu2 %vm498_vm0, %v2804_v29 }
  0x69   : > { %2400 = vmatmul.msk.bf16.gmra.mxu3 %vm498_vm0, %v2804_v29 }
  0x77   : > { %2377 = vmatmul.msk.bf16.gmra.mxu0 %vm498_vm0, %v2815_v30  ;;  %2385 = vmatmul.msk.bf16.gmra.mxu1 %vm498_vm0, %v2815_v30 }
  0x78   : > { %2393 = vmatmul.msk.bf16.gmra.mxu2 %vm498_vm0, %v2815_v30 }
  0x79   : > { %2401 = vmatmul.msk.bf16.gmra.mxu3 %vm498_vm0, %v2815_v30 }
  0x87   : > { %2378 = vmatmul.msk.bf16.gmra.mxu0 %vm498_vm0, %v2826_v31  ;;  %2386 = vmatmul.msk.bf16.gmra.mxu1 %vm498_vm0, %v2826_v31 }
  0x88   : > { %2394 = vmatmul.msk.bf16.gmra.mxu2 %vm498_vm0, %v2826_v31 }
  0x89   : > { %2402 = vmatmul.msk.bf16.gmra.mxu3 %vm498_vm0, %v2826_v31 }
  0x94   : > { %v2836_v32 = vpop.f32.mrf.mxu0  ;;  %v2838_v33 = vpop.f32.mrf.mxu1 }
  0x95   : > { %4020 = vst [vmem:[#allocation2_spill] sm:$0xff] %v2838_v33 }
  0x97   : > { %2403 = vmatmul.msk.bf16.vlgmr.msrb.gmra.mxu0 %vm498_vm0, %v2747_v11  ;;  %2411 = vmatmul.msk.bf16.vlgmr.msrb.gmra.mxu1 %vm498_vm0, %v2747_v11 }
  0x98   : > { %2419 = vmatmul.msk.bf16.vlgmr.msrb.gmra.mxu2 %vm498_vm0, %v2747_v11 }
  0x99   : > { %2427 = vmatmul.msk.bf16.vlgmr.msrb.gmra.mxu3 %vm498_vm0, %v2747_v11 }
  0x9b   : > { %v2848_v34 = vpop.f32.mrf.mxu2 }
  0x9c   : > { %4021 = vst [vmem:[#allocation3_spill] sm:$0xff] %v2848_v34  ;;  %v2850_v35 = vpop.f32.mrf.mxu3  ;;  %v2852_v36 = vpop.f32.mrf.mxu0 }
  0x9d   : > { %4022 = vst [vmem:[#allocation4_spill] sm:$0xff] %v2850_v35  ;;  %v2856_v38 = vpop.f32.mrf.mxu1 }
  0x9e   : > { %4023 = vst [vmem:[#allocation5_spill] sm:$0xff] %v2856_v38 }
  0xa3   : > { %v2860_v40 = vpop.f32.mrf.mxu2 }
  0xa4   : > { %4024 = vst [vmem:[#allocation6_spill] sm:$0xff] %v2860_v40  ;;  %v2864_v42 = vpop.f32.mrf.mxu3  ;;  %v2866_v43 = vpop.f32.mrf.mxu0 }
  0xa5   : > { %4025 = vst [vmem:[#allocation7_spill] sm:$0xff] %v2864_v42  ;;  %v2870_v45 = vpop.f32.mrf.mxu1 }
  0xa7   : > { %2404 = vmatmul.msk.bf16.gmra.mxu0 %vm498_vm0, %v2539_v22  ;;  %2412 = vmatmul.msk.bf16.gmra.mxu1 %vm498_vm0, %v2539_v22 }
  0xa8   : > { %2420 = vmatmul.msk.bf16.gmra.mxu2 %vm498_vm0, %v2539_v22 }
  0xa9   : > { %2428 = vmatmul.msk.bf16.gmra.mxu3 %vm498_vm0, %v2539_v22 }
  0xab   : > { %v2876_v46 = vpop.f32.mrf.mxu2 }
  0xac   : > { %4026 = vst [vmem:[#allocation8_spill] sm:$0xff] %v2876_v46  ;;  %v2878_v47 = vpop.f32.mrf.mxu3  ;;  %v2880_v48 = vpop.f32.mrf.mxu0 }
  0xad   : > { %4027 = vst [vmem:[#allocation9_spill] sm:$0xff] %v2878_v47  ;;  %v2884_v50 = vpop.f32.mrf.mxu1 }
  0xb3   : > { %v2888_v52 = vpop.f32.mrf.mxu2 }
  0xb4   : > { %4028 = vst [vmem:[#allocation10_spill] sm:$0xff] %v2888_v52  ;;  %v2892_v54 = vpop.f32.mrf.mxu3  ;;  %v2894_v55 = vpop.f32.mrf.mxu0 }
  0xb5   : > { %4029 = vst [vmem:[#allocation11_spill] sm:$0xff] %v2892_v54  ;;  %v2898_v57 = vpop.f32.mrf.mxu1 }
  0xb7   : > { %2405 = vmatmul.msk.bf16.gmra.mxu0 %vm498_vm0, %v2771_v26  ;;  %2413 = vmatmul.msk.bf16.gmra.mxu1 %vm498_vm0, %v2771_v26 }
  0xb8   : > { %2421 = vmatmul.msk.bf16.gmra.mxu2 %vm498_vm0, %v2771_v26 }
  0xb9   : > { %2429 = vmatmul.msk.bf16.gmra.mxu3 %vm498_vm0, %v2771_v26 }
  0xbb   : > { %v2908_v58 = vpop.f32.mrf.mxu2 }
  0xbc   : > { %v2910_v59 = vpop.f32.mrf.mxu3  ;;  %v2912_v60 = vpop.f32.mrf.mxu0 }
  0xbd   : > { %v2916_v62 = vpop.f32.mrf.mxu1 }
  0xc3   : > { %v2920_v0 = vpop.f32.mrf.mxu2 }
  0xc4   : > { %v2924_v2 = vpop.f32.mrf.mxu3  ;;  %v2926_v3 = vpop.f32.mrf.mxu0 }
  0xc5   : > { %v2930_v5 = vpop.f32.mrf.mxu1 }
  0xc7   : > { %2406 = vmatmul.msk.bf16.gmra.mxu0 %vm498_vm0, %v2782_v27  ;;  %2414 = vmatmul.msk.bf16.gmra.mxu1 %vm498_vm0, %v2782_v27 }
  0xc8   : > { %2422 = vmatmul.msk.bf16.gmra.mxu2 %vm498_vm0, %v2782_v27 }
  0xc9   : > { %2430 = vmatmul.msk.bf16.gmra.mxu3 %vm498_vm0, %v2782_v27 }
  0xcb   : > { %v2940_v6 = vpop.f32.mrf.mxu2 }
  0xcc   : > { %v2942_v7 = vpop.f32.mrf.mxu3  ;;  %v2944_v8 = vpop.f32.mrf.mxu0 }
  0xcd   : > { %v2948_v10 = vpop.f32.mrf.mxu1 }
  0xd3   : > { %v2952_v12 = vpop.f32.mrf.mxu2 }
  0xd4   : > { %v2956_v14 = vpop.f32.mrf.mxu3  ;;  %v2958_v15 = vpop.f32.mrf.mxu0 }
  0xd5   : > { %v2962_v17 = vpop.f32.mrf.mxu1 }
  0xd7   : > { %2407 = vmatmul.msk.bf16.gmra.mxu0 %vm498_vm0, %v2793_v28  ;;  %2415 = vmatmul.msk.bf16.gmra.mxu1 %vm498_vm0, %v2793_v28 }
  0xd8   : > { %2423 = vmatmul.msk.bf16.gmra.mxu2 %vm498_vm0, %v2793_v28 }
  0xd9   : > { %2431 = vmatmul.msk.bf16.gmra.mxu3 %vm498_vm0, %v2793_v28 }
  0xdb   : > { %v2972_v18 = vpop.f32.mrf.mxu2 }
  0xdc   : > { %v2974_v19 = vpop.f32.mrf.mxu3  ;;  %v2976_v20 = vpop.f32.mrf.mxu0 }
  0xdd   : > { %v2978_v21 = vpop.f32.mrf.mxu1 }
  0xe3   : > { %v2980_v22 = vpop.f32.mrf.mxu2 }
  0xe4   : > { %v2982_v23 = vpop.f32.mrf.mxu3  ;;  %v557_v24 = vpop.f32.mrf.mxu0 }
  0xe5   : > { %v606_v25 = vpop.f32.mrf.mxu1 }
  0xe7   : > { %2408 = vmatmul.msk.bf16.gmra.mxu0 %vm498_vm0, %v2804_v29  ;;  %2416 = vmatmul.msk.bf16.gmra.mxu1 %vm498_vm0, %v2804_v29 }
  0xe8   : > { %2424 = vmatmul.msk.bf16.gmra.mxu2 %vm498_vm0, %v2804_v29 }
  0xe9   : > { %2432 = vmatmul.msk.bf16.gmra.mxu3 %vm498_vm0, %v2804_v29 }
  0xeb   : > { %v655_v26 = vpop.f32.mrf.mxu2 }
  0xec   : > { %v704_v27 = vpop.f32.mrf.mxu3  ;;  %v559_v28 = vpop.f32.mrf.mxu0 }
  0xed   : > { %v608_v44 = vpop.f32.mrf.mxu1  ;;  %v963_v52 = vpack.c.bf16 %v559_v28, %v557_v24 }
  0xee   : > { %v964_v38 = vpack.c.bf16 %v608_v44, %v606_v25 }
  0xf3   : > { %v657_v41 = vpop.f32.mrf.mxu2 }
  0xf4   : > { %v706_v56 = vpop.f32.mrf.mxu3  ;;  %v562_v53 = vpop.f32.mrf.mxu0 }
  0xf5   : > { %v611_v39 = vpop.f32.mrf.mxu1  ;;  %v966_v44 = vpack.c.bf16 %v706_v56, %v704_v27  ;;  %v4038_v56 = vpack.c.bf16 %v2916_v62, %v2898_v57  ;;  %v4042_v57 = vpack.c.bf16 %v2884_v50, %v2870_v45  ;;  %v4044_v62 = vpack.c.bf16 %v2924_v2, %v2910_v59  ;;  %v4053_v2 = vld [vmem:[#allocation8_spill] sm:$0xff] }
  0xf7   : > { %2409 = vmatmul.msk.bf16.gmra.mxu0 %vm498_vm0, %v2815_v30  ;;  %2417 = vmatmul.msk.bf16.gmra.mxu1 %vm498_vm0, %v2815_v30 }
  0xf8   : > { %2425 = vmatmul.msk.bf16.gmra.mxu2 %vm498_vm0, %v2815_v30 }
  0xf9   : > { %2433 = vmatmul.msk.bf16.gmra.mxu3 %vm498_vm0, %v2815_v30 }
  0xfb   : > { %v660_v29 = vpop.f32.mrf.mxu2 }
  0xfc   : > { %v709_v37 = vpop.f32.mrf.mxu3  ;;  %v564_v4 = vpop.f32.mrf.mxu0 }
  0xfd   : > { %v613_v1 = vpop.f32.mrf.mxu1  ;;  %v971_v42 = vpack.c.bf16 %v564_v4, %v562_v53  ;;  %v4040_v4 = vpack.c.bf16 %v2956_v14, %v2942_v7  ;;  %v4049_v7 = vld [vmem:[#allocation2_spill] sm:$0xff]  ;;  %v4062_v14 = vld [vmem:[#allocation4_spill] sm:$0xff] }
  0xfe   : > { %v972_v34 = vpack.c.bf16 %v613_v1, %v611_v39 }
 0x103   : > { %v662_v51 = vpop.f32.mrf.mxu2 }
 0x104   : > { %v711_v49 = vpop.f32.mrf.mxu3  ;;  %v567_v16 = vpop.f32.mrf.mxu0 }
 0x105   : > { %v616_v13 = vpop.f32.mrf.mxu1  ;;  %v974_v39 = vpack.c.bf16 %v711_v49, %v709_v37  ;;  %v4033_v37 = vpack.c.bf16 %v2944_v8, %v2926_v3  ;;  %v958_v49 = vpack.c.bf16 %v2982_v23, %v2974_v19  ;;  %v4039_v3 = vpack.c.bf16 %v2952_v12, %v2940_v6  ;;  %v3118_v23 = vld [vmem:[%s3987_s4 + $0x8] sm:$0xff] }
 0x106   : > { %v4046_v6 = vpack.c.bf16 %v2852_v36, %v2836_v32  ;;  %v4055_v32 = vld [vmem:[#allocation11_spill] sm:$0xff]  ;;  %v4056_v36 = vld [vmem:[#allocation9_spill] sm:$0xff]  ;;  %4066 = vst [vmem:[#allocation8_spill] sm:$0xff] %v3118_v23 }
 0x107   : > { %2410 = vmatmul.msk.bf16.gmra.mxu0 %vm498_vm0, %v2826_v31  ;;  %2418 = vmatmul.msk.bf16.gmra.mxu1 %vm498_vm0, %v2826_v31 }
 0x108   : > { %2426 = vmatmul.msk.bf16.gmra.mxu2 %vm498_vm0, %v2826_v31 }
 0x109   : > { %2434 = vmatmul.msk.bf16.gmra.mxu3 %vm498_vm0, %v2826_v31 }
 0x10b   : > { %v665_v30 = vpop.f32.mrf.mxu2 }
 0x10c   : > { %v714_v63 = vpop.f32.mrf.mxu3  ;;  %v569_v61 = vpop.f32.mrf.mxu0 }
 0x10d   : > { %v979_v11 = vpack.c.bf16 %v569_v61, %v567_v16  ;;  %v618_v9 = vpop.f32.mrf.mxu1  ;;  %v973_v61 = vpack.c.bf16 %v662_v51, %v660_v29 }
 0x10e   : > { %v980_v35 = vpack.c.bf16 %v618_v9, %v616_v13  ;;  %v4057_v9 = vpack.c.bf16 %v4055_v32, %v4056_v36  ;;  %v4061_v13 = vld [vmem:[#allocation7_spill] sm:$0xff] }
 0x10f   : > { %1059 = vmatpush.bf16.msra.mxu0 %v979_v11  ;;  %v4059_v11 = vld [vmem:[#allocation3_spill] sm:$0xff] }
 0x110   : > { %1088 = vmatpush.bf16.msra.mxu1 %v980_v35  ;;  %v955_v35 = vpack.c.bf16 %v2976_v20, %v2958_v15  ;;  %v4063_v15 = vpack.c.bf16 %v4061_v13, %v4062_v14 }
 0x113   : > { %v667_v40 = vpop.f32.mrf.mxu2  ;;  %1060 = vmatpush.bf16.msra.mxu0 %v971_v42  ;;  %v965_v42 = vpack.c.bf16 %v657_v41, %v655_v26  ;;  %v4034_v41 = vpack.c.bf16 %v2948_v10, %v2930_v5  ;;  %v4058_v10 = vld [vmem:[#allocation6_spill] sm:$0xff] }
 0x114   : > { %v981_v47 = vpack.c.bf16 %v667_v40, %v665_v30  ;;  %v716_v54 = vpop.f32.mrf.mxu3  ;;  %1089 = vmatpush.bf16.msra.mxu1 %v972_v34  ;;  %v3008_v46 = vpop.f32.mrf.mxu0  ;;  %v956_v40 = vpack.c.bf16 %v2978_v21, %v2962_v17  ;;  %v4060_v12 = vpack.c.bf16 %v4058_v10, %v4059_v11 }
 0x115   : > { %v982_v33 = vpack.c.bf16 %v716_v54, %v714_v63  ;;  %v3010_v31 = vpop.f32.mrf.mxu1 }
 0x116   : > { %1117 = vmatpush.bf16.msra.mxu2 %v981_v47  ;;  %v957_v47 = vpack.c.bf16 %v2980_v22, %v2972_v18 }
 0x117   : > { %1146 = vmatpush.bf16.msra.mxu3 %v982_v33  ;;  %1061 = vmatpush.bf16.msra.mxu0 %v963_v52  ;;  %v4036_v52 = vpack.c.bf16 %v2912_v60, %v2894_v55  ;;  %v4041_v55 = vpack.c.bf16 %v2880_v48, %v2866_v43  ;;  %v4043_v60 = vpack.c.bf16 %v2920_v0, %v2908_v58  ;;  %v4048_v48 = vld [vmem:[#allocation5_spill] sm:$0xff]  ;;  %v3081_v58 = vld [vmem:[%s3987_s4] sm:$0xff] }
 0x118   : > { %1090 = vmatpush.bf16.msra.mxu1 %v964_v38  ;;  %v4050_v45 = vpack.c.bf16 %v4048_v48, %v4049_v7  ;;  %4051 = vst [vmem:[#allocation5_spill] sm:$0xff] %v3081_v58  ;;  %v4052_v0 = vld [vmem:[#allocation10_spill] sm:$0xff] }
 0x119   : > { %v4054_v8 = vpack.c.bf16 %v4052_v0, %v4053_v2  ;;  %v987_v0 = vld [vmem:[%s3988_s5] sm:$0xff] }
 0x11a   : > { %1118 = vmatpush.bf16.msra.mxu2 %v973_v61 }
 0x11b   : > { %1147 = vmatpush.bf16.msra.mxu3 %v974_v39  ;;  %v3016_v34 = vpop.f32.mrf.mxu2  ;;  %1062 = vmatpush.bf16.msra.mxu0 %v955_v35  ;;  %v3143_v35 = vld [vmem:[%s3987_s4 + $0x10] sm:$0xff] }
 0x11c   : > { %4030 = vst [vmem:[#allocation12_spill] sm:$0xff] %v3016_v34  ;;  %v3018_v53 = vpop.f32.mrf.mxu3  ;;  %1091 = vmatpush.bf16.msra.mxu1 %v956_v40  ;;  %v3020_v33 = vpop.f32.mrf.mxu0 }
 0x11d   : > { %4031 = vst [vmem:[#allocation13_spill] sm:$0xff] %v3018_v53  ;;  %v3022_v38 = vpop.f32.mrf.mxu1 }
 0x11e   : > { %4032 = vst [vmem:[#allocation14_spill] sm:$0xff] %v3022_v38  ;;  %1119 = vmatpush.bf16.msra.mxu2 %v965_v42 }
 0x11f   : > { %1148 = vmatpush.bf16.msra.mxu3 %v966_v44  ;;  %1063 = vmatpush.bf16.msra.mxu0 %v4033_v37  ;;  %4067 = vst [vmem:[#allocation11_spill] sm:$0xff] %v3143_v35  ;;  %v2662_v37 = vmov 0  }
 0x120   : > { %1092 = vmatpush.bf16.msra.mxu1 %v4034_v41  ;;  %2579 = vset.pattern.permute.xlu0 %v2662_v37 }
 0x121   : > { %2580 = vset.pattern.permute.xlu1 %v2662_v37  ;;  %2581 = vset.pattern.permute.xlu2 %v2662_v37 }
 0x122   : > { %1120 = vmatpush.bf16.msra.mxu2 %v957_v47  ;;  %v993_v47 = vld [vmem:[%s3988_s5 + $0x30] sm:$0xff] }
 0x123   : > { %1149 = vmatpush.bf16.msra.mxu3 %v958_v49  ;;  %v3034_v51 = vpop.f32.mrf.mxu2  ;;  %1064 = vmatpush.bf16.msra.mxu0 %v4036_v52  ;;  %v991_v49 = vld [vmem:[%s3988_s5 + $0x20] sm:$0xff] }
 0x124   : > { %4035 = vst [vmem:[#allocation15_spill] sm:$0xff] %v3034_v51  ;;  %v3039_v54 = vpop.f32.mrf.mxu3  ;;  %1093 = vmatpush.bf16.msra.mxu1 %v4038_v56  ;;  %v3044_v63 = vpop.f32.mrf.mxu0  ;;  %1027 = vperm.xlu0 %2579, %v993_v47   ;;  %v990_v47 = vld [vmem:[%s3988_s5 + $0x18] sm:$0xff] }
 0x125   : > { %4037 = vst [vmem:[#allocation16_spill] sm:$0xff] %v3039_v54  ;;  %v3046_v1 = vpop.f32.mrf.mxu1  ;;  %1017 = vperm.xlu1 %2580, %v991_v49  }
 0x126   : > { %1121 = vmatpush.bf16.msra.mxu2 %v4039_v3 }
 0x127   : > { %1150 = vmatpush.bf16.msra.mxu3 %v4040_v4  ;;  %1065 = vmatpush.bf16.msra.mxu0 %v4041_v55  ;;  %v3174_v4 = vld [vmem:[%s3987_s4 + $0x18] sm:$0xff] }
 0x128   : > { %1094 = vmatpush.bf16.msra.mxu1 %v4042_v57  ;;  %4068 = vst [vmem:[#allocation9_spill] sm:$0xff] %v3174_v4  ;;  %v994_v55 = vld [vmem:[%s3988_s5 + $0x38] sm:$0xff] }
 0x12a   : > { %1122 = vmatpush.bf16.msra.mxu2 %v4043_v60  ;;  %v992_v60 = vld [vmem:[%s3988_s5 + $0x28] sm:$0xff] }
 0x12b   : > { %1151 = vmatpush.bf16.msra.mxu3 %v4044_v62  ;;  %v3066_v5 = vpop.f32.mrf.mxu2  ;;  %1066 = vmatpush.bf16.msra.mxu0 %v4046_v6 }
 0x12c   : > { %4045 = vst [vmem:[#allocation17_spill] sm:$0xff] %v3066_v5  ;;  %v3071_v43 = vpop.f32.mrf.mxu3  ;;  %1095 = vmatpush.bf16.msra.mxu1 %v4050_v45  ;;  %v3076_v50 = vpop.f32.mrf.mxu0  ;;  %1032 = vperm.xlu0 %2579, %v994_v55   ;;  %v988_v45 = vld [vmem:[%s3988_s5 + $0x8] sm:$0xff] }
 0x12d   : > { %4047 = vst [vmem:[#allocation18_spill] sm:$0xff] %v3071_v43  ;;  %v3083_v59 = vpop.f32.mrf.mxu1  ;;  %1022 = vperm.xlu1 %2580, %v992_v60  }
 0x12e   : > { %1123 = vmatpush.bf16.msra.mxu2 %v4054_v8  ;;  %1067 = vmatmul.bf16.vlgmr.msra.gmra.mxu0 %v3081_v58 }
 0x12f   : > { %1152 = vmatpush.bf16.msra.mxu3 %v4057_v9  ;;  %1096 = vmatmul.bf16.vlgmr.msra.gmra.mxu1 %v3081_v58 }
 0x132   : > { %1124 = vmatpush.bf16.msra.mxu2 %v4060_v12  ;;  %v989_v12 = vld [vmem:[%s3988_s5 + $0x10] sm:$0xff] }
 0x133   : > { %1153 = vmatpush.bf16.msra.mxu3 %v4063_v15  ;;  %v3099_v16 = vpop.f32.mrf.mxu2  ;;  %1007 = vperm.xlu2 %2581, %v989_v12  }
 0x134   : > { %4064 = vst [vmem:[#allocation2_spill] sm:$0xff] %v3099_v16  ;;  %v3101_v17 = vpop.f32.mrf.mxu3  ;;  %v3103_v18 = vpop.f32.mrf.mxu0  ;;  %997 = vperm.xlu0 %2579, %v987_v0  }
 0x135   : > { %4065 = vst [vmem:[#allocation10_spill] sm:$0xff] %v3101_v17  ;;  %v3105_v19 = vpop.f32.mrf.mxu1  ;;  %1125 = vmatmul.bf16.vlgmr.msra.gmra.mxu2 %v3081_v58  ;;  %1002 = vperm.xlu1 %2580, %v988_v45  }
 0x136   : > { %1154 = vmatmul.bf16.vlgmr.msra.gmra.mxu3 %v3081_v58 }
 0x13b   : > { %v3109_v20 = vpop.f32.mrf.mxu2  ;;  %1012 = vperm.xlu2 %2581, %v990_v47  }
 0x13c   : > { %v3111_v21 = vpop.f32.mrf.mxu3  ;;  %v3113_v22 = vpop.f32.mrf.mxu0 }
 0x13d   : > { %v3120_v24 = vpop.f32.mrf.mxu1 }
 0x13e   : > { %1072 = vmatmul.bf16.gmra.mxu0 %v3118_v23 }
 0x13f   : > { %1101 = vmatmul.bf16.gmra.mxu1 %v3118_v23 }
 0x143   : > { %v3124_v25 = vpop.f32.mrf.mxu2 }
 0x144   : > { %v3126_v26 = vpop.f32.mrf.mxu3  ;;  %v3128_v27 = vpop.f32.mrf.mxu0 }
 0x145   : > { %v3130_v28 = vpop.f32.mrf.mxu1  ;;  %1130 = vmatmul.bf16.gmra.mxu2 %v3118_v23 }
 0x146   : > { %1159 = vmatmul.bf16.gmra.mxu3 %v3118_v23 }
 0x14b   : > { %v3134_v29 = vpop.f32.mrf.mxu2 }
 0x14c   : > { %v3136_v30 = vpop.f32.mrf.mxu3  ;;  %v3138_v61 = vpop.f32.mrf.mxu0 }
 0x14d   : > { %v3145_v39 = vpop.f32.mrf.mxu1 }
 0x14e   : > { %1077 = vmatmul.bf16.gmra.mxu0 %v3143_v35 }
 0x14f   : > { %1106 = vmatmul.bf16.gmra.mxu1 %v3143_v35 }
 0x153   : > { %v3149_v40 = vpop.f32.mrf.mxu2 }
 0x154   : > { %v3151_v42 = vpop.f32.mrf.mxu3  ;;  %v3153_v44 = vpop.f32.mrf.mxu0 }
 0x155   : > { %v3158_v41 = vpop.f32.mrf.mxu1  ;;  %1135 = vmatmul.bf16.gmra.mxu2 %v3143_v35 }
 0x156   : > { %1164 = vmatmul.bf16.gmra.mxu3 %v3143_v35 }
 0x15b   : > { %v3165_v52 = vpop.f32.mrf.mxu2 }
 0x15c   : > { %v3167_v56 = vpop.f32.mrf.mxu3  ;;  %v3169_v3 = vpop.f32.mrf.mxu0 }
 0x15d   : > { %v3179_v57 = vpop.f32.mrf.mxu1 }
 0x15e   : > { %1082 = vmatmul.bf16.gmra.mxu0 %v3174_v4 }
 0x15f   : > { %1111 = vmatmul.bf16.gmra.mxu1 %v3174_v4 }
 0x163   : > { %v3186_v62 = vpop.f32.mrf.mxu2 }
 0x164   : > { %v3188_v6 = vpop.f32.mrf.mxu3  ;;  %v753_v48 = vpop.f32.mrf.mxu0 }
 0x165   : > { %v802_v7 = vpop.f32.mrf.mxu1  ;;  %1140 = vmatmul.bf16.gmra.mxu2 %v3174_v4 }
 0x166   : > { %1169 = vmatmul.bf16.gmra.mxu3 %v3174_v4 }
 0x16b   : > { %v851_v2 = vpop.f32.mrf.mxu2 }
 0x16c   : > { %v900_v8 = vpop.f32.mrf.mxu3  ;;  %v755_v32 = vpop.f32.mrf.mxu0 }
 0x16d   : > { %v804_v36 = vpop.f32.mrf.mxu1  ;;  %v967_v47 = vpack.c.bf16 %v755_v32, %v753_v48 }
 0x16e   : > { %v968_v5 = vpack.c.bf16 %v804_v36, %v802_v7 }
 0x173   : > { %v853_v9 = vpop.f32.mrf.mxu2 }
 0x174   : > { %v902_v10 = vpop.f32.mrf.mxu3  ;;  %v758_v11 = vpop.f32.mrf.mxu0 }
 0x175   : > { %v807_v13 = vpop.f32.mrf.mxu1 }
 0x17b   : > { %v856_v14 = vpop.f32.mrf.mxu2 }
 0x17c   : > { %v905_v15 = vpop.f32.mrf.mxu3  ;;  %v760_v37 = vpop.f32.mrf.mxu0 }
 0x17d   : > { %v809_v49 = vpop.f32.mrf.mxu1  ;;  %v975_v12 = vpack.c.bf16 %v760_v37, %v758_v11 }
 0x17e   : > { %v976_v34 = vpack.c.bf16 %v809_v49, %v807_v13  ;;  %v4080_v13 = vld [vmem:[#allocation11_spill] sm:$0xff] }
 0x183   : > { %v858_v55 = vpop.f32.mrf.mxu2 }
 0x184   : > { %v907_v60 = vpop.f32.mrf.mxu3  ;;  %v763_v45 = vpop.f32.mrf.mxu0  ;;  %v977_v38 = vpack.c.bf16 %v858_v55, %v856_v14 }
 0x185   : > { %v812_v0 = vpop.f32.mrf.mxu1 }
 0x18b   : > { %v861_v4 = vpop.f32.mrf.mxu2 }
 0x18c   : > { %v910_v35 = vpop.f32.mrf.mxu3  ;;  %v765_v23 = vpop.f32.mrf.mxu0 }
 0x18d   : > { %v983_v54 = vpack.c.bf16 %v765_v23, %v763_v45  ;;  %v814_v53 = vpop.f32.mrf.mxu1  ;;  %v944_v23 = vpack.c.bf16 %v3120_v24, %v3105_v19  ;;  %v1781_v19 = vld [vmem:[%s3991_s8 + $0x8] sm:$0xff] }
 0x18e   : > { %v984_v51 = vpack.c.bf16 %v814_v53, %v812_v0  ;;  %v959_v53 = vpack.c.bf16 %v3169_v3, %v3153_v44  ;;  %1791 = vperm.xlu0 %2579, %v1781_v19  }
 0x18f   : > { %1175 = vmatpush.bf16.msrb.mxu0 %v983_v54  ;;  %v978_v54 = vpack.c.bf16 %v907_v60, %v905_v15  ;;  %v1783_v60 = vld [vmem:[%s3991_s8 + $0x18] sm:$0xff] }
 0x190   : > { %1204 = vmatpush.bf16.msrb.mxu1 %v984_v51  ;;  %v960_v51 = vpack.c.bf16 %v3179_v57, %v3158_v41 }
 0x193   : > { %v863_v58 = vpop.f32.mrf.mxu2  ;;  %1176 = vmatpush.bf16.msrb.mxu0 %v975_v12 }
 0x194   : > { %v985_v17 = vpack.c.bf16 %v863_v58, %v861_v4  ;;  %v912_v43 = vpop.f32.mrf.mxu3  ;;  %1205 = vmatpush.bf16.msrb.mxu1 %v976_v34  ;;  %v969_v58 = vpack.c.bf16 %v853_v9, %v851_v2  ;;  %v951_v34 = vpack.c.bf16 %v3138_v61, %v3128_v27  ;;  %v953_v27 = vpack.c.bf16 %v3149_v40, %v3134_v29  ;;  %v4070_v29 = vld [vmem:[#allocation17_spill] sm:$0xff] }
 0x195   : > { %v986_v16 = vpack.c.bf16 %v912_v43, %v910_v35  ;;  %v970_v43 = vpack.c.bf16 %v902_v10, %v900_v8  ;;  %v954_v61 = vpack.c.bf16 %v3151_v42, %v3136_v30  ;;  %v4071_v30 = vld [vmem:[#allocation2_spill] sm:$0xff]  ;;  %v4077_v40 = vld [vmem:[#allocation13_spill] sm:$0xff]  ;;  %v4078_v42 = vld [vmem:[#allocation16_spill] sm:$0xff] }
 0x196   : > { %1233 = vmatpush.bf16.msrb.mxu2 %v985_v17  ;;  %v962_v17 = vpack.c.bf16 %v3188_v6, %v3167_v56  ;;  %v937_v35 = vpack.c.bf16 %v4071_v30, %v4070_v29  ;;  %v930_v44 = vpack.c.bf16 %v4078_v42, %v4077_v40  ;;  %v1782_v56 = vld [vmem:[%s3991_s8 + $0x10] sm:$0xff]  ;;  %v1780_v10 = vld [vmem:[%s3991_s8] sm:$0xff]  ;;  %v3294_v45 = vpop.permute.xlu0 %1027 }
 0x197   : > { %1262 = vmatpush.bf16.msrb.mxu3 %v986_v16  ;;  %1177 = vmatpush.bf16.msrb.mxu0 %v967_v47  ;;  %v952_v16 = vpack.c.bf16 %v3145_v39, %v3130_v28  ;;  %v935_v28 = vpack.c.bf16 %v3076_v50, %v3044_v63  ;;  %v927_v63 = vpack.c.bf16 %v3020_v33, %v3008_v46  ;;  %v4073_v39 = vld [vmem:[#allocation10_spill] sm:$0xff]  ;;  %v4074_v33 = vld [vmem:[#allocation5_spill] sm:$0xff]  ;;  %v4079_v6 = vld [vmem:[#allocation8_spill] sm:$0xff]  ;;  %v3287_v55 = vpop.permute.xlu1 %1017  ;;  %v3298_v47 = vpop.permute.xlu2 %1007 }
 0x198   : > { %1206 = vmatpush.bf16.msrb.mxu1 %v968_v5  ;;  %v961_v5 = vpack.c.bf16 %v3186_v62, %v3165_v52  ;;  %v946_v50 = vpack.c.bf16 %v3126_v26, %v3111_v21  ;;  %v4076_v21 = vld [vmem:[#allocation15_spill] sm:$0xff]  ;;  %1796 = vperm.xlu1 %2580, %v1782_v56  }
 0x199   : > { %1786 = vperm.xlu2 %2581, %v1780_v10  }
 0x19a   : > { %1234 = vmatpush.bf16.msrb.mxu2 %v977_v38  ;;  %v943_v38 = vpack.c.bf16 %v3113_v22, %v3103_v18  ;;  %v936_v18 = vpack.c.bf16 %v3083_v59, %v3046_v1  ;;  %v945_v22 = vpack.c.bf16 %v3124_v25, %v3109_v20  ;;  %v4069_v1 = vld [vmem:[#allocation14_spill] sm:$0xff] }
 0x19b   : > { %1263 = vmatpush.bf16.msrb.mxu3 %v978_v54  ;;  %1178 = vmatpush.bf16.msrb.mxu0 %v959_v53  ;;  %v928_v59 = vpack.c.bf16 %v4069_v1, %v3010_v31  ;;  %v4072_v25 = vld [vmem:[#allocation18_spill] sm:$0xff]  ;;  %v4075_v31 = vld [vmem:[#allocation12_spill] sm:$0xff] }
 0x19c   : > { %1207 = vmatpush.bf16.msrb.mxu1 %v960_v51  ;;  %v938_v46 = vpack.c.bf16 %v4073_v39, %v4072_v25  ;;  %v929_v26 = vpack.c.bf16 %v4076_v21, %v4075_v31  ;;  %v4081_v51 = vld [vmem:[#allocation9_spill] sm:$0xff] }
 0x19e   : > { %1235 = vmatpush.bf16.msrb.mxu2 %v969_v58 }
 0x19f   : > { %1264 = vmatpush.bf16.msrb.mxu3 %v970_v43  ;;  %1179 = vmatpush.bf16.msrb.mxu0 %v951_v34  ;;  %v3301_v58 = vpop.permute.xlu1 %1022 }
 0x1a0   : > { %1208 = vmatpush.bf16.msrb.mxu1 %v952_v16 }
 0x1a1   : > { %1801 = vperm.xlu2 %2581, %v1783_v60  }
 0x1a2   : > { %1236 = vmatpush.bf16.msrb.mxu2 %v961_v5 }
 0x1a3   : > { %1265 = vmatpush.bf16.msrb.mxu3 %v962_v17  ;;  %1180 = vmatpush.bf16.msrb.mxu0 %v943_v38 }
 0x1a4   : > { %1209 = vmatpush.bf16.msrb.mxu1 %v944_v23  ;;  %v3308_v23 = vpop.permute.xlu0 %1032 }
 0x1a6   : > { %1237 = vmatpush.bf16.msrb.mxu2 %v953_v27 }
 0x1a7   : > { %1266 = vmatpush.bf16.msrb.mxu3 %v954_v61  ;;  %1181 = vmatpush.bf16.msrb.mxu0 %v935_v28  ;;  %v3322_v42 = vpop.permute.xlu1 %1002 }
 0x1a8   : > { %1210 = vmatpush.bf16.msrb.mxu1 %v936_v18  ;;  %v3312_v18 = vpop.permute.xlu2 %1012 }
 0x1aa   : > { %1238 = vmatpush.bf16.msrb.mxu2 %v945_v22 }
 0x1ab   : > { %1267 = vmatpush.bf16.msrb.mxu3 %v946_v50  ;;  %1182 = vmatpush.bf16.msrb.mxu0 %v927_v63  ;;  %v3239_v24 = vpop.f32.mrf.mxu0 }
 0x1ac   : > { %1211 = vmatpush.bf16.msrb.mxu1 %v928_v59  ;;  %v3243_v20 = vpop.f32.mrf.mxu1 }
 0x1ae   : > { %1239 = vmatpush.bf16.msrb.mxu2 %v937_v35  ;;  %1183 = vmatmul.bf16.vlgmr.msrb.gmra.mxu0 %v4074_v33 }
 0x1af   : > { %1268 = vmatpush.bf16.msrb.mxu3 %v938_v46  ;;  %1212 = vmatmul.bf16.vlgmr.msrb.gmra.mxu1 %v4074_v33 }
 0x1b2   : > { %1240 = vmatpush.bf16.msrb.mxu2 %v929_v26 }
 0x1b3   : > { %1269 = vmatpush.bf16.msrb.mxu3 %v930_v44  ;;  %v3253_v41 = vpop.f32.mrf.mxu0 }
 0x1b4   : > { %v3255_v52 = vpop.f32.mrf.mxu1 }
 0x1b5   : > { %1241 = vmatmul.bf16.vlgmr.msrb.gmra.mxu2 %v4074_v33 }
 0x1b6   : > { %1270 = vmatmul.bf16.vlgmr.msrb.gmra.mxu3 %v4074_v33 }
 0x1b8   : > { %v3262_v3 = vpop.f32.mrf.mxu2 }
 0x1b9   : > { %v3264_v4 = vpop.f32.mrf.mxu3 }
 0x1bb   : > { %v1073_v57 = vpop.f32.mrf.mxu0 }
 0x1bc   : > { %v1102_v62 = vpop.f32.mrf.mxu1  ;;  %v1074_v39 = vadd.f32 %v1073_v57, %v3298_v47 }
 0x1bd   : > { %v1103_v31 = vadd.f32 %v1102_v62, %v3298_v47  ;;  %v1071_v62 = vadd.f32 %v3253_v41, %v3322_v42 }
 0x1be   : > { %1188 = vmatmul.bf16.gmra.mxu0 %v4079_v6 }
 0x1bf   : > { %1217 = vmatmul.bf16.gmra.mxu1 %v4079_v6 }
 0x1c0   : > { %v3268_v48 = vpop.f32.mrf.mxu2 }
 0x1c1   : > { %v3270_v7 = vpop.f32.mrf.mxu3 }
 0x1c3   : > { %v1075_v2 = vpop.f32.mrf.mxu0 }
 0x1c4   : > { %v1104_v8 = vpop.f32.mrf.mxu1  ;;  %v1076_v46 = vadd.f32 %v1075_v2, %v3312_v18 }
 0x1c5   : > { %1246 = vmatmul.bf16.gmra.mxu2 %v4079_v6  ;;  %v1105_v21 = vadd.f32 %v1104_v8, %v3312_v18  ;;  %v1308_v8 = vmax.f32 %v1103_v31, 0.0 }
 0x1c6   : > { %1275 = vmatmul.bf16.gmra.mxu3 %v4079_v6  ;;  %v3324_v6 = vpop.permute.xlu0 %997  ;;  %v1315_v57 = vmax.f32 %v1076_v46, 0.0 }
 0x1c7   : > { %v1069_v2 = vadd.f32 %v3239_v24, %v3324_v6 }
 0x1c8   : > { %v3274_v32 = vpop.f32.mrf.mxu2 }
 0x1c9   : > { %v3276_v36 = vpop.f32.mrf.mxu3 }
 0x1cb   : > { %v1078_v9 = vpop.f32.mrf.mxu0 }
 0x1cc   : > { %v1107_v11 = vpop.f32.mrf.mxu1  ;;  %v1079_v16 = vadd.f32 %v1078_v9, %v3287_v55 }
 0x1cd   : > { %v1108_v27 = vadd.f32 %v1107_v11, %v3287_v55  ;;  %v1307_v11 = vmax.f32 %v1074_v39, 0.0 }
 0x1ce   : > { %1193 = vmatmul.bf16.gmra.mxu0 %v4080_v13  ;;  %v1323_v50 = vmax.f32 %v1079_v16, 0.0 }
 0x1cf   : > { %1222 = vmatmul.bf16.gmra.mxu1 %v4080_v13  ;;  %v1324_v30 = vmax.f32 %v1108_v27, 0.0  ;;  %v1363_v24 = vpack.c.bf16 %v1315_v57, %v1307_v11 }
 0x1d0   : > { %v3283_v14 = vpop.f32.mrf.mxu2 }
 0x1d1   : > { %v3285_v15 = vpop.f32.mrf.mxu3 }
 0x1d3   : > { %v1080_v37 = vpop.f32.mrf.mxu0 }
 0x1d4   : > { %v1109_v49 = vpop.f32.mrf.mxu1  ;;  %v1081_v5 = vadd.f32 %v1080_v37, %v3301_v58  ;;  %v1098_v37 = vadd.f32 %v3243_v20, %v3324_v6 }
 0x1d5   : > { %1251 = vmatmul.bf16.gmra.mxu2 %v4080_v13  ;;  %v1110_v28 = vadd.f32 %v1109_v49, %v3301_v58  ;;  %v1100_v49 = vadd.f32 %v3255_v52, %v3322_v42 }
 0x1d6   : > { %1280 = vmatmul.bf16.gmra.mxu3 %v4080_v13  ;;  %v1331_v1 = vmax.f32 %v1081_v5, 0.0  ;;  %v1316_v13 = vmax.f32 %v1105_v21, 0.0  ;;  %v1292_v5 = vmax.f32 %v1098_v37, 0.0 }
 0x1d7   : > { %v1332_v35 = vmax.f32 %v1110_v28, 0.0 }
 0x1d8   : > { %v1136_v0 = vpop.f32.mrf.mxu2  ;;  %v1371_v9 = vpack.c.bf16 %v1331_v1, %v1323_v50  ;;  %v1364_v16 = vpack.c.bf16 %v1316_v13, %v1308_v8 }
 0x1d9   : > { %v3296_v12 = vpop.f32.mrf.mxu3  ;;  %v1372_v10 = vpack.c.bf16 %v1332_v35, %v1324_v30 }
 0x1da   : > { %v1166_v52 = vadd.f32 %v3296_v12, %v3287_v55 }
 0x1db   : > { %v1083_v53 = vpop.f32.mrf.mxu0 }
 0x1dc   : > { %v1112_v54 = vpop.f32.mrf.mxu1  ;;  %v1084_v43 = vadd.f32 %v1083_v53, %v3294_v45  ;;  %v1137_v53 = vadd.f32 %v1136_v0, %v3287_v55  ;;  %v1326_v35 = vmax.f32 %v1166_v52, 0.0 }
 0x1dd   : > { %v1113_v17 = vadd.f32 %v1112_v54, %v3294_v45 }
 0x1de   : > { %1198 = vmatmul.bf16.gmra.mxu0 %v4081_v51  ;;  %v1339_v19 = vmax.f32 %v1084_v43, 0.0  ;;  %v1299_v43 = vmax.f32 %v1071_v62, 0.0  ;;  %v1325_v50 = vmax.f32 %v1137_v53, 0.0 }
 0x1df   : > { %1227 = vmatmul.bf16.gmra.mxu1 %v4081_v51  ;;  %v1340_v59 = vmax.f32 %v1113_v17, 0.0  ;;  %v1300_v17 = vmax.f32 %v1100_v49, 0.0 }
 0x1e0   : > { %v1138_v34 = vpop.f32.mrf.mxu2 }
 0x1e1   : > { %v1167_v38 = vpop.f32.mrf.mxu3  ;;  %v1139_v41 = vadd.f32 %v1138_v34, %v3301_v58  ;;  %v1134_v34 = vadd.f32 %v3283_v14, %v3312_v18 }
 0x1e2   : > { %v1168_v27 = vadd.f32 %v1167_v38, %v3301_v58  ;;  %v1161_v38 = vadd.f32 %v3276_v36, %v3298_v47 }
 0x1e3   : > { %v1085_v61 = vpop.f32.mrf.mxu0  ;;  %v1333_v12 = vmax.f32 %v1139_v41, 0.0  ;;  %v1317_v31 = vmax.f32 %v1134_v34, 0.0 }
 0x1e4   : > { %v1086_v22 = vadd.f32 %v1085_v61, %v3308_v23  ;;  %v1114_v63 = vpop.f32.mrf.mxu1 }
 0x1e5   : > { %1256 = vmatmul.bf16.gmra.mxu2 %v4081_v51  ;;  %v1115_v29 = vadd.f32 %v1114_v63, %v3308_v23  ;;  %v1373_v46 = vpack.c.bf16 %v1333_v12, %v1325_v50 }
 0x1e6   : > { %1285 = vmatmul.bf16.gmra.mxu3 %v4081_v51  ;;  %v1347_v25 = vmax.f32 %v1086_v22, 0.0  ;;  %v1291_v51 = vmax.f32 %v1069_v2, 0.0 }
 0x1e7   : > { %v1348_v33 = vmax.f32 %v1115_v29, 0.0  ;;  %v1356_v29 = vpack.c.bf16 %v1300_v17, %v1292_v5  ;;  %v3393_v17 = vld [vmem:[%s3990_s7 + $0x8] sm:$0xff] }
 0x1e8   : > { %v1141_v26 = vpop.f32.mrf.mxu2  ;;  %v1379_v40 = vpack.c.bf16 %v1347_v25, %v1339_v19  ;;  %v1132_v19 = vadd.f32 %v3274_v32, %v3298_v47  ;;  %v1355_v1 = vpack.c.bf16 %v1299_v43, %v1291_v51  ;;  %v1334_v25 = vmax.f32 %v1168_v27, 0.0 }
 0x1e9   : > { %v1170_v44 = vpop.f32.mrf.mxu3  ;;  %v1380_v56 = vpack.c.bf16 %v1348_v33, %v1340_v59  ;;  %v1142_v60 = vadd.f32 %v1141_v26, %v3294_v45  ;;  %v1163_v32 = vadd.f32 %v3285_v15, %v3312_v18  ;;  %v1310_v26 = vmax.f32 %v1161_v38, 0.0 }
 0x1ea   : > { %1424 = vmatpush.bf16.msra.mxu0 %v1379_v40  ;;  %v1171_v54 = vadd.f32 %v1170_v44, %v3294_v45  ;;  %v1309_v33 = vmax.f32 %v1132_v19, 0.0  ;;  %v1374_v21 = vpack.c.bf16 %v1334_v25, %v1326_v35  ;;  %v1127_v40 = vadd.f32 %v3262_v3, %v3324_v6 }
 0x1eb   : > { %1443 = vmatpush.bf16.msra.mxu1 %v1380_v56  ;;  %v1341_v28 = vmax.f32 %v1142_v60, 0.0  ;;  %v1318_v36 = vmax.f32 %v1163_v32, 0.0  ;;  %v1129_v44 = vadd.f32 %v3268_v48, %v3322_v42  ;;  %v1156_v15 = vadd.f32 %v3264_v4, %v3324_v6  ;;  %v3372_v60 = vld [vmem:[%s3990_s7] sm:$0xff] }
 0x1ec   : > { %v1342_v22 = vmax.f32 %v1171_v54, 0.0  ;;  %v1158_v56 = vadd.f32 %v3270_v7, %v3322_v42  ;;  %v1293_v11 = vmax.f32 %v1127_v40, 0.0 }
 0x1ed   : > { %v1301_v57 = vmax.f32 %v1129_v44, 0.0  ;;  %v1294_v2 = vmax.f32 %v1156_v15, 0.0 }
 0x1ee   : > { %1425 = vmatpush.bf16.msra.mxu0 %v1371_v9  ;;  %v1365_v9 = vpack.c.bf16 %v1317_v31, %v1309_v33  ;;  %v1302_v62 = vmax.f32 %v1158_v56, 0.0 }
 0x1ef   : > { %1444 = vmatpush.bf16.msra.mxu1 %v1372_v10  ;;  %v1366_v10 = vpack.c.bf16 %v1318_v36, %v1310_v26  ;;  %v1357_v3 = vpack.c.bf16 %v1301_v57, %v1293_v11 }
 0x1f0   : > { %v1143_v20 = vpop.f32.mrf.mxu2  ;;  %v1358_v8 = vpack.c.bf16 %v1302_v62, %v1294_v2 }
 0x1f1   : > { %v1144_v0 = vadd.f32 %v1143_v20, %v3308_v23  ;;  %v1172_v61 = vpop.f32.mrf.mxu3 }
 0x1f2   : > { %v1173_v63 = vadd.f32 %v1172_v61, %v3308_v23  ;;  %1426 = vmatpush.bf16.msra.mxu0 %v1363_v24 }
 0x1f3   : > { %v1349_v59 = vmax.f32 %v1144_v0, 0.0  ;;  %1445 = vmatpush.bf16.msra.mxu1 %v1364_v16 }
 0x1f4   : > { %v1350_v30 = vmax.f32 %v1173_v63, 0.0 }
 0x1f5   : > { %v1381_v14 = vpack.c.bf16 %v1349_v59, %v1341_v28 }
 0x1f6   : > { %v1382_v39 = vpack.c.bf16 %v1350_v30, %v1342_v22  ;;  %1427 = vmatpush.bf16.msra.mxu0 %v1355_v1 }
 0x1f7   : > { %1462 = vmatpush.bf16.msra.mxu2 %v1381_v14  ;;  %1446 = vmatpush.bf16.msra.mxu1 %v1356_v29 }
 0x1f8   : > { %1481 = vmatpush.bf16.msra.mxu3 %v1382_v39 }
 0x1f9   : > { %2459 = vmatmul.msk.bf16.vlgmr.msra.gmra.mxu0 %vm1413_vm1, %v3372_v60 }
 0x1fa   : > { %2461 = vmatmul.msk.bf16.vlgmr.msra.gmra.mxu1 %vm1413_vm1, %v3372_v60 }
 0x1fb   : > { %1463 = vmatpush.bf16.msra.mxu2 %v1373_v46 }
 0x1fc   : > { %1482 = vmatpush.bf16.msra.mxu3 %v1374_v21 }
 0x1ff   : > { %1464 = vmatpush.bf16.msra.mxu2 %v1365_v9 }
 0x200   : > { %1483 = vmatpush.bf16.msra.mxu3 %v1366_v10 }
 0x203   : > { %1465 = vmatpush.bf16.msra.mxu2 %v1357_v3 }
 0x204   : > { %1484 = vmatpush.bf16.msra.mxu3 %v1358_v8 }
 0x206   : > { %2463 = vmatmul.msk.bf16.vlgmr.msra.gmra.mxu2 %vm1413_vm1, %v3372_v60 }
 0x207   : > { %2465 = vmatmul.msk.bf16.vlgmr.msra.gmra.mxu3 %vm1413_vm1, %v3372_v60 }
 0x209   : > { %2460 = vmatmul.msk.bf16.gmra.mxu0 %vm1413_vm1, %v3393_v17 }
 0x20a   : > { %2462 = vmatmul.msk.bf16.gmra.mxu1 %vm1413_vm1, %v3393_v17 }
 0x216   : > { %2464 = vmatmul.msk.bf16.gmra.mxu2 %vm1413_vm1, %v3393_v17 }
 0x217   : > { %2466 = vmatmul.msk.bf16.gmra.mxu3 %vm1413_vm1, %v3393_v17 }
 0x22b   : > { %v3359_v48 = vpop.f32.mrf.mxu0 }
 0x22c   : > { %v3361_v4 = vpop.f32.mrf.mxu1  ;;  %v1185_v62 = vadd.f32 %v3359_v48, %v3324_v6 }
 0x233   : > { %v1186_v13 = vpop.f32.mrf.mxu0 }
 0x234   : > { %v3363_v7 = vpop.f32.mrf.mxu1  ;;  %v1187_v3 = vadd.f32 %v1186_v13, %v3322_v42 }
 0x236   : > { %v1303_v48 = vmax.f32 %v1187_v3, 0.0 }
 0x238   : > { %v3365_v37 = vpop.f32.mrf.mxu2 }
 0x239   : > { %v3367_v49 = vpop.f32.mrf.mxu3 }
 0x23b   : > { %v1189_v53 = vpop.f32.mrf.mxu0 }
 0x23c   : > { %v1218_v54 = vpop.f32.mrf.mxu1  ;;  %v1190_v26 = vadd.f32 %v1189_v53, %v3298_v47  ;;  %v1214_v53 = vadd.f32 %v3361_v4, %v3324_v6 }
 0x23d   : > { %v1219_v56 = vadd.f32 %v1218_v54, %v3298_v47 }
 0x240   : > { %v3382_v24 = vpop.f32.mrf.mxu2 }
 0x241   : > { %v3384_v51 = vpop.f32.mrf.mxu3 }
 0x243   : > { %v1191_v43 = vpop.f32.mrf.mxu0 }
 0x244   : > { %v1220_v41 = vpop.f32.mrf.mxu1  ;;  %v1192_v36 = vadd.f32 %v1191_v43, %v3312_v18  ;;  %v1311_v43 = vmax.f32 %v1190_v26, 0.0  ;;  %v2485_v26 = vld [vmem:[%s3438_s20] sm:$0xf] }
 0x245   : > { %v1221_v9 = vadd.f32 %v1220_v41, %v3312_v18  ;;  %v1216_v41 = vadd.f32 %v3363_v7, %v3322_v42 }
 0x248   : > { %v3386_v16 = vpop.f32.mrf.mxu2 }
 0x249   : > { %v3388_v5 = vpop.f32.mrf.mxu3 }
 0x24b   : > { %v1194_v20 = vpop.f32.mrf.mxu0 }
 0x24c   : > { %v1223_v52 = vpop.f32.mrf.mxu1  ;;  %v1195_v14 = vadd.f32 %v1194_v20, %v3287_v55  ;;  %v1319_v20 = vmax.f32 %v1192_v36, 0.0  ;;  %v2564_v36 = vld [vmem:[%s3438_s20 + $0x1c] sm:$0xf0] }
 0x24d   : > { %v1224_v33 = vadd.f32 %v1223_v52, %v3287_v55  ;;  %v1312_v52 = vmax.f32 %v1219_v56, 0.0  ;;  %v2486_v56 = vor.u32 %v2564_v36, %v2485_v26 }
 0x24e   : > { %v1327_v2 = vmax.f32 %v1195_v14, 0.0 }
 0x24f   : > { %v1328_v8 = vmax.f32 %v1224_v33, 0.0 }
 0x250   : > { %v3403_v27 = vpop.f32.mrf.mxu2 }
 0x251   : > { %v3405_v28 = vpop.f32.mrf.mxu3 }
 0x253   : > { %v1196_v0 = vpop.f32.mrf.mxu0 }
 0x254   : > { %v1225_v61 = vpop.f32.mrf.mxu1  ;;  %v1197_v29 = vadd.f32 %v1196_v0, %v3301_v58  ;;  %v1320_v0 = vmax.f32 %v1221_v9, 0.0  ;;  %v2487_v9 = vld [vmem:[%s3438_s20 + $0x20] sm:$0xf0] }
 0x255   : > { %v1226_v25 = vadd.f32 %v1225_v61, %v3301_v58 }
 0x256   : > { %v1335_v40 = vmax.f32 %v1197_v29, 0.0  ;;  %v1304_v29 = vmax.f32 %v1216_v41, 0.0  ;;  %v2495_v41 = vld [vmem:[%s3438_s20 + $0x28] sm:$0xf0] }
 0x257   : > { %v1336_v10 = vmax.f32 %v1226_v25, 0.0 }
 0x258   : > { %v3407_v19 = vpop.f32.mrf.mxu2  ;;  %v1375_v54 = vpack.c.bf16 %v1335_v40, %v1327_v2  ;;  %v2560_v40 = vld [vmem:[%s3438_s20 + $0x4] sm:$0xf] }
 0x259   : > { %v3409_v34 = vpop.f32.mrf.mxu3  ;;  %v1376_v61 = vpack.c.bf16 %v1336_v10, %v1328_v8  ;;  %v2490_v10 = vor.u32 %v2560_v40, %v2487_v9 }
 0x25b   : > { %v1199_v22 = vpop.f32.mrf.mxu0 }
 0x25c   : > { %v1228_v63 = vpop.f32.mrf.mxu1  ;;  %v1200_v59 = vadd.f32 %v1199_v22, %v3294_v45  ;;  %v1295_v22 = vmax.f32 %v1185_v62, 0.0  ;;  %v1272_v62 = vadd.f32 %v3367_v49, %v3324_v6 }
 0x25d   : > { %v1229_v12 = vadd.f32 %v1228_v63, %v3294_v45  ;;  %v1367_v63 = vpack.c.bf16 %v1319_v20, %v1311_v43 }
 0x25e   : > { %v1343_v39 = vmax.f32 %v1200_v59, 0.0 }
 0x25f   : > { %v1344_v31 = vmax.f32 %v1229_v12, 0.0 }
 0x260   : > { %v1254_v50 = vpop.f32.mrf.mxu2 }
 0x261   : > { %v1283_v1 = vpop.f32.mrf.mxu3  ;;  %v1255_v59 = vadd.f32 %v1254_v50, %v3301_v58 }
 0x262   : > { %v1284_v25 = vadd.f32 %v1283_v1, %v3301_v58 }
 0x263   : > { %v1201_v38 = vpop.f32.mrf.mxu0  ;;  %v1337_v33 = vmax.f32 %v1255_v59, 0.0  ;;  %v2503_v59 = vld [vmem:[%s3438_s20 + $0x30] sm:$0xf0] }
 0x264   : > { %v1202_v30 = vadd.f32 %v1201_v38, %v3308_v23  ;;  %v1230_v35 = vpop.f32.mrf.mxu1  ;;  %v1296_v38 = vmax.f32 %v1214_v53, 0.0 }
 0x265   : > { %v1231_v32 = vadd.f32 %v1230_v35, %v3308_v23 }
 0x266   : > { %v1351_v46 = vmax.f32 %v1202_v30, 0.0  ;;  %v1368_v30 = vpack.c.bf16 %v1320_v0, %v1312_v52  ;;  %v1360_v58 = vpack.c.bf16 %v1304_v29, %v1296_v38  ;;  %v1298_v0 = vmax.f32 %v1272_v62, 0.0  ;;  %v2567_v38 = vld [vmem:[%s3438_s20 + $0x34] sm:$0xf0]  ;;  %v2563_v29 = vld [vmem:[%s3438_s20 + $0x1c] sm:$0xf] }
 0x267   : > { %v1352_v21 = vmax.f32 %v1231_v32, 0.0  ;;  %v1253_v32 = vadd.f32 %v3407_v19, %v3287_v55  ;;  %v1279_v19 = vadd.f32 %v3405_v28, %v3312_v18 }
 0x268   : > { %v1383_v44 = vpack.c.bf16 %v1351_v46, %v1343_v39  ;;  %v1257_v15 = vpop.f32.mrf.mxu2  ;;  %v1282_v46 = vadd.f32 %v3409_v34, %v3287_v55  ;;  %v1248_v55 = vadd.f32 %v3386_v16, %v3298_v47  ;;  %v1274_v16 = vadd.f32 %v3384_v51, %v3322_v42  ;;  %v2565_v51 = vld [vmem:[%s3438_s20 + $0x24] sm:$0xf0] }
 0x269   : > { %v1384_v11 = vpack.c.bf16 %v1352_v21, %v1344_v31  ;;  %v1286_v57 = vpop.f32.mrf.mxu3  ;;  %v1258_v13 = vadd.f32 %v1257_v15, %v3294_v45  ;;  %v1329_v34 = vmax.f32 %v1253_v32, 0.0  ;;  %v1322_v2 = vmax.f32 %v1279_v19, 0.0 }
 0x26a   : > { %1500 = vmatpush.bf16.msrb.mxu0 %v1383_v44  ;;  %v1287_v4 = vadd.f32 %v1286_v57, %v3294_v45  ;;  %v1359_v45 = vpack.c.bf16 %v1303_v48, %v1295_v22  ;;  %v1338_v44 = vmax.f32 %v1284_v25, 0.0  ;;  %v1306_v43 = vmax.f32 %v1274_v16, 0.0  ;;  %v2558_v22 = vld [vmem:[%s3989_s6] sm:$0xff]  ;;  %v2501_v48 = vld [vmem:[%s3438_s20 + $0x10] sm:$0xf]  ;;  %v2559_v25 = vld [vmem:[%s3989_s6 + $0x8] sm:$0xff] }
 0x26b   : > { %1519 = vmatpush.bf16.msrb.mxu1 %v1384_v11  ;;  %v1345_v14 = vmax.f32 %v1258_v13, 0.0  ;;  %v1330_v11 = vmax.f32 %v1282_v46, 0.0  ;;  %v1377_v57 = vpack.c.bf16 %v1337_v33, %v1329_v34  ;;  %v2566_v13 = vld [vmem:[%s3438_s20 + $0x2c] sm:$0xf0] }
 0x26c   : > { %v1346_v31 = vmax.f32 %v1287_v4, 0.0  ;;  %v1362_v49 = vpack.c.bf16 %v1306_v43, %v1298_v0 }
 0x26e   : > { %1501 = vmatpush.bf16.msrb.mxu0 %v1375_v54  ;;  %v2561_v54 = vld [vmem:[%s3438_s20 + $0xc] sm:$0xf] }
 0x26f   : > { %1520 = vmatpush.bf16.msrb.mxu1 %v1376_v61 }
 0x270   : > { %v1259_v12 = vpop.f32.mrf.mxu2 }
 0x271   : > { %v1260_v7 = vadd.f32 %v1259_v12, %v3308_v23  ;;  %v1288_v35 = vpop.f32.mrf.mxu3  ;;  %v2509_v12 = vld [vmem:[%s3438_s20 + $0x18] sm:$0xf] }
 0x272   : > { %v1289_v50 = vadd.f32 %v1288_v35, %v3308_v23  ;;  %1502 = vmatpush.bf16.msrb.mxu0 %v1367_v63  ;;  %v1250_v23 = vadd.f32 %v3403_v27, %v3312_v18  ;;  %v1277_v27 = vadd.f32 %v3388_v5, %v3298_v47  ;;  %v1245_v18 = vadd.f32 %v3382_v24, %v3322_v42  ;;  %v2493_v42 = vld [vmem:[%s3438_s20 + $0x8] sm:$0xf]  ;;  %v2562_v63 = vld [vmem:[%s3438_s20 + $0x14] sm:$0xf] }
 0x273   : > { %v1353_v39 = vmax.f32 %v1260_v7, 0.0  ;;  %1521 = vmatpush.bf16.msrb.mxu1 %v1368_v30  ;;  %v1378_v47 = vpack.c.bf16 %v1338_v44, %v1330_v11  ;;  %v1243_v24 = vadd.f32 %v3365_v37, %v3324_v6  ;;  %v1313_v5 = vmax.f32 %v1248_v55, 0.0  ;;  %v2511_v7 = vld [vmem:[%s3438_s20 + $0x38] sm:$0xf0] }
 0x274   : > { %v1354_v21 = vmax.f32 %v1289_v50, 0.0  ;;  %v1321_v28 = vmax.f32 %v1250_v23, 0.0  ;;  %v1314_v3 = vmax.f32 %v1277_v27, 0.0  ;;  %v1305_v8 = vmax.f32 %v1245_v18, 0.0 }
 0x275   : > { %v1385_v1 = vpack.c.bf16 %v1353_v39, %v1345_v14  ;;  %v1297_v52 = vmax.f32 %v1243_v24, 0.0  ;;  %v2494_v37 = vor.u32 %v2565_v51, %v2493_v42  ;;  %v2498_v6 = vor.u32 %v2561_v54, %v2495_v41 }
 0x276   : > { %v1386_v15 = vpack.c.bf16 %v1354_v21, %v1346_v31  ;;  %1503 = vmatpush.bf16.msrb.mxu0 %v1359_v45  ;;  %v1369_v53 = vpack.c.bf16 %v1321_v28, %v1313_v5  ;;  %v1370_v20 = vpack.c.bf16 %v1322_v2, %v1314_v3  ;;  %v2506_v4 = vor.u32 %v2562_v63, %v2503_v59 }
 0x277   : > { %1522 = vmatpush.bf16.msrb.mxu1 %v1360_v58  ;;  %1538 = vmatpush.bf16.msrb.mxu2 %v1385_v1  ;;  %v1361_v61 = vpack.c.bf16 %v1305_v8, %v1297_v52  ;;  %v2510_v30 = vor.u32 %v2567_v38, %v2509_v12  ;;  %v2514_v35 = vor.u32 %v2563_v29, %v2511_v7  ;;  %v1448_v50 = vpop.f32.mrf.mxu1 }
 0x278   : > { %1557 = vmatpush.bf16.msrb.mxu3 %v1386_v15 }
 0x279   : > { %2467 = vmatmul.msk.bf16.vlgmr.msrb.gmra.mxu0 %vm1413_vm1, %v3372_v60 }
 0x27a   : > { %1635 = vmatpush.bf16.msra.mxu0 %v2486_v56  ;;  %2469 = vmatmul.msk.bf16.vlgmr.msrb.gmra.mxu1 %vm1413_vm1, %v3372_v60 }
 0x27b   : > { %1654 = vmatpush.bf16.msra.mxu1 %v2490_v10  ;;  %1539 = vmatpush.bf16.msrb.mxu2 %v1377_v57 }
 0x27c   : > { %1558 = vmatpush.bf16.msrb.mxu3 %v1378_v47 }
 0x27f   : > { %1540 = vmatpush.bf16.msrb.mxu2 %v1369_v53  ;;  %1730 = vmatpush.bf16.msrb.mxu1 %v2506_v4  ;;  %v1450_v32 = vpop.f32.mrf.mxu1 }
 0x280   : > { %1559 = vmatpush.bf16.msrb.mxu3 %v1370_v20 }
 0x283   : > { %1541 = vmatpush.bf16.msrb.mxu2 %v1361_v61 }
 0x284   : > { %1560 = vmatpush.bf16.msrb.mxu3 %v1362_v49 }
 0x286   : > { %2471 = vmatmul.msk.bf16.vlgmr.msrb.gmra.mxu2 %vm1413_vm1, %v3372_v60 }
 0x287   : > { %1673 = vmatpush.bf16.msra.mxu2 %v2494_v37  ;;  %2473 = vmatmul.msk.bf16.vlgmr.msrb.gmra.mxu3 %vm1413_vm1, %v3372_v60  ;;  %v2502_v60 = vor.u32 %v2566_v13, %v2501_v48  ;;  %v3518_v39 = vpop.f32.mrf.mxu1 }
 0x288   : > { %1692 = vmatpush.bf16.msra.mxu3 %v2498_v6  ;;  %v3566_v6 = vpop.permute.xlu2 %1786 }
 0x289   : > { %2468 = vmatmul.msk.bf16.gmra.mxu0 %vm1413_vm1, %v3393_v17  ;;  %v1467_v46 = vpop.f32.mrf.mxu2 }
 0x28a   : > { %2470 = vmatmul.msk.bf16.gmra.mxu1 %vm1413_vm1, %v3393_v17  ;;  %1711 = vmatpush.bf16.msrb.mxu0 %v2502_v60  ;;  %v1486_v33 = vpop.f32.mrf.mxu3 }
 0x28b   : > { %1749 = vmatpush.bf16.msrb.mxu2 %v2510_v30 }
 0x28c   : > { %1768 = vmatpush.bf16.msrb.mxu3 %v2514_v35 }
 0x28f   : > { %v3522_v21 = vpop.f32.mrf.mxu1 }
 0x291   : > { %v1469_v58 = vpop.f32.mrf.mxu2 }
 0x292   : > { %v3524_v23 = vpop.f32.mrf.mxu3 }
 0x296   : > { %2472 = vmatmul.msk.bf16.gmra.mxu2 %vm1413_vm1, %v3393_v17 }
 0x297   : > { %2474 = vmatmul.msk.bf16.gmra.mxu3 %vm1413_vm1, %v3393_v17  ;;  %v1429_v17 = vpop.f32.mrf.mxu0 }
 0x299   : > { %2515 = vmatmul.msk.bf16.vlgmr.msra.gmra.mxu0 %vm498_vm0, %v2558_v22  ;;  %v3528_v36 = vpop.f32.mrf.mxu2 }
 0x29a   : > { %2517 = vmatmul.msk.bf16.vlgmr.msra.gmra.mxu1 %vm498_vm0, %v2558_v22  ;;  %v3530_v40 = vpop.f32.mrf.mxu3 }
 0x29f   : > { %v1431_v45 = vpop.f32.mrf.mxu0 }
 0x2a1   : > { %v3536_v15 = vpop.f32.mrf.mxu2 }
 0x2a2   : > { %v3538_v56 = vpop.f32.mrf.mxu3 }
 0x2a6   : > { %2519 = vmatmul.msk.bf16.vlgmr.msra.gmra.mxu2 %vm498_vm0, %v2558_v22 }
 0x2a7   : > { %2521 = vmatmul.msk.bf16.vlgmr.msra.gmra.mxu3 %vm498_vm0, %v2558_v22  ;;  %v3516_v14 = vpop.f32.mrf.mxu0 }
 0x2a9   : > { %2516 = vmatmul.msk.bf16.gmra.mxu0 %vm498_vm0, %v2559_v25 }
 0x2aa   : > { %2518 = vmatmul.msk.bf16.gmra.mxu1 %vm498_vm0, %v2559_v25 }
 0x2af   : > { %v3520_v31 = vpop.f32.mrf.mxu0 }
 0x2b6   : > { %2520 = vmatmul.msk.bf16.gmra.mxu2 %vm498_vm0, %v2559_v25 }
 0x2b7   : > { %2522 = vmatmul.msk.bf16.gmra.mxu3 %vm498_vm0, %v2559_v25 }
 0x2b9   : > { %2523 = vmatmul.msk.bf16.vlgmr.msrb.gmra.mxu0 %vm498_vm0, %v2558_v22 }
 0x2ba   : > { %2525 = vmatmul.msk.bf16.vlgmr.msrb.gmra.mxu1 %vm498_vm0, %v2558_v22 }
 0x2c6   : > { %2527 = vmatmul.msk.bf16.vlgmr.msrb.gmra.mxu2 %vm498_vm0, %v2558_v22 }
 0x2c7   : > { %2529 = vmatmul.msk.bf16.vlgmr.msrb.gmra.mxu3 %vm498_vm0, %v2558_v22 }
 0x2c9   : > { %2524 = vmatmul.msk.bf16.gmra.mxu0 %vm498_vm0, %v2559_v25 }
 0x2ca   : > { %2526 = vmatmul.msk.bf16.gmra.mxu1 %vm498_vm0, %v2559_v25 }
 0x2d6   : > { %2528 = vmatmul.msk.bf16.gmra.mxu2 %vm498_vm0, %v2559_v25 }
 0x2d7   : > { %2530 = vmatmul.msk.bf16.gmra.mxu3 %vm498_vm0, %v2559_v25  ;;  %v3579_v25 = vpop.permute.xlu0 %1791 }
 0x2f6   : > { %v1505_v1 = vpop.f32.mrf.mxu0 }
 0x2f7   : > { %v3526_v26 = vpop.f32.mrf.mxu1 }
 0x2fe   : > { %v3532_v19 = vpop.f32.mrf.mxu0 }
 0x2ff   : > { %v3534_v44 = vpop.f32.mrf.mxu1 }
 0x306   : > { %v3540_v9 = vpop.f32.mrf.mxu0 }
 0x307   : > { %v3542_v55 = vpop.f32.mrf.mxu1 }
 0x309   : > { %v3544_v34 = vpop.f32.mrf.mxu2 }
 0x30a   : > { %v3546_v10 = vpop.f32.mrf.mxu3 }
 0x30e   : > { %v3548_v27 = vpop.f32.mrf.mxu0 }
 0x30f   : > { %v3550_v11 = vpop.f32.mrf.mxu1 }
 0x311   : > { %v3552_v18 = vpop.f32.mrf.mxu2 }
 0x312   : > { %v3554_v28 = vpop.f32.mrf.mxu3 }
 0x316   : > { %v1637_v57 = vpop.f32.mrf.mxu0 }
 0x317   : > { %v1656_v16 = vpop.f32.mrf.mxu1  ;;  %v1638_v52 = vadd.f32 %v1637_v57, %v1429_v17 }
 0x318   : > { %v1657_v0 = vadd.f32 %v1656_v16, %v1448_v50 }
 0x319   : > { %v3556_v2 = vpop.f32.mrf.mxu2  ;;  %v3569_v22 = vadd.f32 %v3566_v6, %v1638_v52 }
 0x31a   : > { %v3558_v47 = vpop.f32.mrf.mxu3  ;;  %v3572_v48 = vadd.f32 %v3566_v6, %v1657_v0 }
 0x31b   : > { %v1836_v12 = vmax.f32 %v3569_v22, 0.0 }
 0x31c   : > { %v1837_v38 = vmax.f32 %v3572_v48, 0.0 }
 0x31e   : > { %v1639_v24 = vpop.f32.mrf.mxu0 }
 0x31f   : > { %v1658_v5 = vpop.f32.mrf.mxu1  ;;  %v1640_v59 = vadd.f32 %v1639_v24, %v1431_v45 }
 0x320   : > { %v1659_v4 = vadd.f32 %v1658_v5, %v1450_v32  ;;  %v1868_v32 = vmax.f32 %v1836_v12, %v1837_v38 }
 0x321   : > { %v3560_v62 = vpop.f32.mrf.mxu2  ;;  %v3583_v50 = vadd.f32 %v3579_v25, %v1640_v59 }
 0x322   : > { %v3562_v3 = vpop.f32.mrf.mxu3 }
 0x326   : > { %v1642_v8 = vpop.f32.mrf.mxu0 }
 0x327   : > { %v1661_v53 = vpop.f32.mrf.mxu1 }
 0x328   : > { %v1662_v24 = vadd.f32 %v1661_v53, %v3518_v39 }
 0x329   : > { %v1675_v42 = vpop.f32.mrf.mxu2 }
 0x32a   : > { %v1694_v51 = vpop.f32.mrf.mxu3  ;;  %v1676_v61 = vadd.f32 %v1675_v42, %v1467_v46  ;;  %v3586_v46 = vadd.f32 %v3579_v25, %v1659_v4 }
 0x32b   : > { %v1695_v29 = vadd.f32 %v1694_v51, %v1486_v33  ;;  %v1643_v33 = vadd.f32 %v1642_v8, %v3516_v14  ;;  %v3608_v51 = vpop.permute.xlu1 %1796  ;;  %v1844_v14 = vmax.f32 %v3583_v50, 0.0 }
 0x32c   : > { %v3575_v60 = vadd.f32 %v3566_v6, %v1676_v61  ;;  %v1845_v8 = vmax.f32 %v3586_v46, 0.0 }
 0x32d   : > { %v3614_v0 = vadd.f32 %v3608_v51, %v1643_v33 }
 0x32e   : > { %v1644_v43 = vpop.f32.mrf.mxu0  ;;  %v1838_v17 = vmax.f32 %v3575_v60, 0.0  ;;  %v1877_v59 = vmax.f32 %v1844_v14, %v1845_v8 }
 0x32f   : > { %v3564_v20 = vpop.f32.mrf.mxu1 }
 0x330   : > { %v1869_v5 = vmax.f32 %v1868_v32, %v1838_v17  ;;  %v1645_v32 = vadd.f32 %v1644_v43, %v3520_v31  ;;  %v1664_v31 = vadd.f32 %v3564_v20, %v3522_v21 }
 0x331   : > { %v1677_v54 = vpop.f32.mrf.mxu2 }
 0x332   : > { %v1696_v41 = vpop.f32.mrf.mxu3  ;;  %v1678_v7 = vadd.f32 %v1677_v54, %v1469_v58  ;;  %v3594_v58 = vadd.f32 %v3566_v6, %v1695_v29 }
 0x333   : > { %v1697_v54 = vadd.f32 %v1696_v41, %v3524_v23 }
 0x334   : > { %v3602_v16 = vadd.f32 %v3579_v25, %v1678_v7 }
 0x336   : > { %v1713_v37 = vpop.f32.mrf.mxu0 }
 0x337   : > { %v1732_v63 = vpop.f32.mrf.mxu1  ;;  %v1714_v30 = vadd.f32 %v1713_v37, %v1505_v1  ;;  %v1839_v37 = vmax.f32 %v3594_v58, 0.0 }
 0x338   : > { %v1733_v42 = vadd.f32 %v1732_v63, %v3526_v26  ;;  %v1846_v26 = vmax.f32 %v3602_v16, 0.0  ;;  %v3622_v63 = vadd.f32 %v3608_v51, %v1662_v24 }
 0x339   : > { %v1680_v49 = vpop.f32.mrf.mxu2  ;;  %v3597_v1 = vadd.f32 %v3566_v6, %v1714_v30  ;;  %v1870_v23 = vmax.f32 %v1869_v5, %v1839_v37 }
 0x33a   : > { %v1699_v13 = vpop.f32.mrf.mxu3  ;;  %v1681_v61 = vadd.f32 %v1680_v49, %v3528_v36  ;;  %v3627_v41 = vadd.f32 %v3566_v6, %v1733_v42  ;;  %v4012_v36 = vmax.f32 %v3614_v0, 0.0  ;;  %v1878_v33 = vmax.f32 %v1877_v59, %v1846_v26 }
 0x33b   : > { %v1840_v39 = vmax.f32 %v3597_v1, 0.0  ;;  %v4011_v42 = vmax.f32 %v3622_v63, 0.0  ;;  %v1700_v43 = vadd.f32 %v1699_v13, %v3530_v40 }
 0x33c   : > { %v3647_v24 = vadd.f32 %v3608_v51, %v1681_v61 }
 0x33d   : > { %v1871_v49 = vmax.f32 %v1870_v23, %v1840_v39 }
 0x33e   : > { %v1715_v35 = vpop.f32.mrf.mxu0  ;;  %v4014_v20 = vmax.f32 %v3647_v24, 0.0 }
 0x33f   : > { %v1734_v52 = vpop.f32.mrf.mxu1  ;;  %v1716_v53 = vadd.f32 %v1715_v35, %v3532_v19  ;;  %v3634_v19 = vadd.f32 %v3579_v25, %v1697_v54  ;;  %v1841_v54 = vmax.f32 %v3627_v41, 0.0 }
 0x341   : > { %v1682_v45 = vpop.f32.mrf.mxu2  ;;  %v3640_v30 = vadd.f32 %v3579_v25, %v1716_v53  ;;  %v1735_v53 = vadd.f32 %v1734_v52, %v3534_v44  ;;  %v1872_v59 = vmax.f32 %v1871_v49, %v1841_v54 }
 0x342   : > { %v3599_v57 = vpop.f32.mrf.mxu3  ;;  %v1683_v49 = vadd.f32 %v1682_v45, %v3536_v15 }
 0x343   : > { %v1848_v44 = vmax.f32 %v3640_v30, 0.0  ;;  %v3677_v13 = vadd.f32 %v3579_v25, %v1735_v53 }
 0x346   : > { %v1718_v4 = vpop.f32.mrf.mxu0 }
 0x347   : > { %v1719_v52 = vadd.f32 %v1718_v4, %v3540_v9  ;;  %v1886_v4 = vmax.f32 %v4012_v36, %v4011_v42 }
 0x349   : > { %v1751_v29 = vpop.f32.mrf.mxu2  ;;  %v3696_v45 = vadd.f32 %v3608_v51, %v1719_v52 }
 0x34a   : > { %v1752_v7 = vadd.f32 %v1751_v29, %v3544_v34  ;;  %v1770_v35 = vpop.f32.mrf.mxu3  ;;  %v4013_v34 = vmax.f32 %v3634_v19, 0.0 }
 0x34b   : > { %v1771_v5 = vadd.f32 %v1770_v35, %v3546_v10  ;;  %v3663_v10 = vpop.permute.xlu2 %1801 }
 0x34c   : > { %v3654_v23 = vadd.f32 %v3566_v6, %v1752_v7  ;;  %v3671_v21 = vadd.f32 %v3663_v10, %v1645_v32  ;;  %v1879_v40 = vmax.f32 %v1878_v33, %v4013_v34  ;;  %v3688_v35 = vadd.f32 %v3663_v10, %v1664_v31 }
 0x34d   : > { %v3661_v61 = vadd.f32 %v3566_v6, %v1771_v5  ;;  %v1737_v6 = vpop.f32.mrf.mxu1  ;;  %v3691_v32 = vadd.f32 %v3608_v51, %v1700_v43  ;;  %v1887_v31 = vmax.f32 %v1886_v4, %v4014_v20  ;;  %v1849_v34 = vmax.f32 %v3677_v13, 0.0 }
 0x34e   : > { %v1842_v29 = vmax.f32 %v3654_v23, 0.0  ;;  %v1880_v15 = vmax.f32 %v1879_v40, %v1848_v44  ;;  %v4018_v42 = vmax.f32 %v3671_v21, 0.0  ;;  %v1720_v43 = vpop.f32.mrf.mxu0  ;;  %v3707_v40 = vadd.f32 %v3663_v10, %v1683_v49 }
 0x34f   : > { %v1843_v7 = vmax.f32 %v3661_v61, 0.0  ;;  %v1738_v52 = vadd.f32 %v1737_v6, %v3542_v55  ;;  %v1702_v4 = vadd.f32 %v3599_v57, %v3538_v56  ;;  %v1721_v55 = vadd.f32 %v1720_v43, %v3548_v27 }
 0x350   : > { %v1873_v9 = vmax.f32 %v1872_v59, %v1842_v29  ;;  %v1881_v49 = vmax.f32 %v1880_v15, %v1849_v34  ;;  %v4082_v23 = vmax.f32 %v3634_v19, 0.0 }
 0x351   : > { %v1753_v33 = vpop.f32.mrf.mxu2  ;;  %v3729_v20 = vadd.f32 %v3608_v51, %v1738_v52  ;;  %v3739_v57 = vadd.f32 %v3663_v10, %v1702_v4  ;;  %v3744_v43 = vadd.f32 %v3663_v10, %v1721_v55 }
 0x352   : > { %v1754_v5 = vadd.f32 %v1753_v33, %v3552_v18  ;;  %v1772_v53 = vpop.f32.mrf.mxu3  ;;  %v1874_v59 = vmax.f32 %v1873_v9, %v1843_v7  ;;  %v4017_v9 = vmax.f32 %v3688_v35, 0.0  ;;  %v4015_v33 = vmax.f32 %v3691_v32, 0.0 }
 0x353   : > { %v1773_v36 = vadd.f32 %v1772_v53, %v3554_v28  ;;  %v1856_v53 = vmax.f32 %v3696_v45, 0.0  ;;  %v2040_v45 = vld [vmem:[%s3828_s27 + $0x20] sm:$0xff] }
 0x354   : > { %v3711_v18 = vadd.f32 %v3579_v25, %v1754_v5  ;;  %1875 = vmax.xlane.f32.xlu0 %v1874_v59  ;;  %v1888_v5 = vmax.f32 %v1887_v31, %v4015_v33  ;;  %v1862_v59 = vmax.f32 %v3707_v40, 0.0  ;;  %v1895_v27 = vmax.f32 %v4018_v42, %v4017_v9 }
 0x355   : > { %v3718_v28 = vadd.f32 %v3579_v25, %v1773_v36  ;;  %v1739_v36 = vpop.f32.mrf.mxu1  ;;  %v1857_v9 = vmax.f32 %v3729_v20, 0.0 }
 0x356   : > { %v4016_v6 = vmax.f32 %v3711_v18, 0.0  ;;  %v1889_v31 = vmax.f32 %v1888_v5, %v1856_v53  ;;  %v1896_v4 = vmax.f32 %v1895_v27, %v1862_v59  ;;  %v1740_v42 = vadd.f32 %v1739_v36, %v3550_v11 }
 0x357   : > { %v1851_v56 = vmax.f32 %v3718_v28, 0.0  ;;  %v4083_v46 = vmax.f32 %v3711_v18, 0.0 }
 0x358   : > { %v1882_v25 = vmax.f32 %v1881_v49, %v4016_v6  ;;  %v3768_v11 = vadd.f32 %v3663_v10, %v1740_v42 }
 0x359   : > { %v1756_v15 = vpop.f32.mrf.mxu2 }
 0x35a   : > { %v1757_v52 = vadd.f32 %v1756_v15, %v3556_v2  ;;  %v1775_v33 = vpop.f32.mrf.mxu3  ;;  %v1883_v49 = vmax.f32 %v1882_v25, %v1851_v56  ;;  %v4019_v2 = vmax.f32 %v3739_v57, 0.0  ;;  %v1890_v25 = vmax.f32 %v1889_v31, %v1857_v9 }
 0x35b   : > { %v1776_v6 = vadd.f32 %v1775_v33, %v3558_v47  ;;  %v1864_v47 = vmax.f32 %v3744_v43, 0.0  ;;  %v1865_v42 = vmax.f32 %v3768_v11, 0.0  ;;  %v2043_v11 = vld [vmem:[%s3828_s27 + $0x38] sm:$0xff] }
 0x35c   : > { %v3755_v5 = vadd.f32 %v3608_v51, %v1757_v52  ;;  %1884 = vmax.xlane.f32.xlu1 %v1883_v49  ;;  %v1897_v27 = vmax.f32 %v1896_v4, %v4019_v2 }
 0x35d   : > { %v3758_v55 = vadd.f32 %v3608_v51, %v1776_v6 }
 0x35e   : > { %v1858_v33 = vmax.f32 %v3755_v5, 0.0  ;;  %v1898_v15 = vmax.f32 %v1897_v27, %v1864_v47 }
 0x35f   : > { %v1859_v36 = vmax.f32 %v3758_v55, 0.0 }
 0x360   : > { %v1891_v51 = vmax.f32 %v1890_v25, %v1858_v33  ;;  %v1899_v27 = vmax.f32 %v1898_v15, %v1865_v42 }
 0x361   : > { %v1758_v6 = vpop.f32.mrf.mxu2 }
 0x362   : > { %v1759_v31 = vadd.f32 %v1758_v6, %v3560_v62  ;;  %v1777_v52 = vpop.f32.mrf.mxu3  ;;  %v1892_v49 = vmax.f32 %v1891_v51, %v1859_v36 }
 0x363   : > { %v1778_v4 = vadd.f32 %v1777_v52, %v3562_v3 }
 0x364   : > { %v3781_v2 = vadd.f32 %v3663_v10, %v1759_v31  ;;  %1893 = vmax.xlane.f32.xlu2 %v1892_v49 }
 0x365   : > { %v3784_v25 = vadd.f32 %v3663_v10, %v1778_v4 }
 0x366   : > { %v1866_v62 = vmax.f32 %v3781_v2, 0.0 }
 0x367   : > { %v1867_v6 = vmax.f32 %v3784_v25, 0.0 }
 0x368   : > { %v1900_v51 = vmax.f32 %v1899_v27, %v1866_v62 }
 0x36a   : > { %v1901_v3 = vmax.f32 %v1900_v51, %v1867_v6 }
 0x36c   : > { %1902 = vmax.xlane.f32.xlu2 %v1901_v3 }
 0x3c7   : > { %v1876_v31 = vpop.xlane.xlu0 %1875 }
 0x3c8   : > { %v1904_v52 = vsub.f32 %v1836_v12, %v1876_v31  ;;  %v1905_v10 = vsub.f32 %v1837_v38, %v1876_v31  ;;  %v1906_v15 = vsub.f32 %v1838_v17, %v1876_v31  ;;  %v1907_v49 = vsub.f32 %v1839_v37, %v1876_v31 }
 0x3c9   : > { %v1908_v4 = vsub.f32 %v1840_v39, %v1876_v31  ;;  %v1909_v27 = vsub.f32 %v1841_v54, %v1876_v31  ;;  %v1910_v22 = vsub.f32 %v1842_v29, %v1876_v31  ;;  %v1911_v60 = vsub.f32 %v1843_v7, %v1876_v31 }
 0x3ca   : > { %v1936_v51 = vmul.f32 1.442695, %v1904_v52  ;;  %v1938_v3 = vmul.f32 1.442695, %v1905_v10  ;;  %v1940_v48 = vmul.f32 1.442695, %v1906_v15 }
 0x3cb   : > { %v1942_v12 = vmul.f32 1.442695, %v1907_v49  ;;  %v1944_v38 = vmul.f32 1.442695, %v1908_v4  ;;  %v1946_v17 = vmul.f32 1.442695, %v1909_v27 }
 0x3cc   : > { %2582 = vpow2.f32 %v1936_v51  ;;  %v1948_v58 = vmul.f32 1.442695, %v1910_v22  ;;  %v1950_v37 = vmul.f32 1.442695, %v1911_v60  ;;  %v2036_v49 = vld [vmem:[%s3828_s27] sm:$0xff] }
 0x3cd   : > { %2584 = vpow2.f32 %v1938_v3  ;;  %v4084_v3 = vmax.f32 %v3614_v0, 0.0 }
 0x3ce   : > { %2586 = vpow2.f32 %v1940_v48  ;;  %v4085_v48 = vmax.f32 %v3622_v63, 0.0 }
 0x3cf   : > { %v1885_v1 = vpop.xlane.xlu1 %1884  ;;  %2588 = vpow2.f32 %v1942_v12 }
 0x3d0   : > { %v1912_v39 = vsub.f32 %v1844_v14, %v1885_v1  ;;  %v1913_v41 = vsub.f32 %v1845_v8, %v1885_v1  ;;  %2590 = vpow2.f32 %v1944_v38  ;;  %v1914_v54 = vsub.f32 %v1846_v26, %v1885_v1  ;;  %v2037_v38 = vld [vmem:[%s3828_s27 + $0x8] sm:$0xff] }
 0x3d1   : > { %2592 = vpow2.f32 %v1946_v17  ;;  %v1915_v61 = vsub.f32 %v4082_v23, %v1885_v1  ;;  %v1916_v29 = vsub.f32 %v1848_v44, %v1885_v1  ;;  %v1917_v7 = vsub.f32 %v1849_v34, %v1885_v1 }
 0x3d2   : > { %v2583_v31 = vpop.eup %2582  ;;  %v1952_v50 = vmul.f32 1.442695, %v1912_v39  ;;  %v1954_v14 = vmul.f32 1.442695, %v1913_v41  ;;  %2594 = vpow2.f32 %v1948_v58  ;;  %v1918_v8 = vsub.f32 %v4083_v46, %v1885_v1 }
 0x3d3   : > { %v2585_v52 = vpop.eup %2584  ;;  %2596 = vpow2.f32 %v1950_v37  ;;  %v1919_v16 = vsub.f32 %v1851_v56, %v1885_v1  ;;  %v1956_v26 = vmul.f32 1.442695, %v1914_v54  ;;  %v1958_v19 = vmul.f32 1.442695, %v1915_v61 }
 0x3d4   : > { %v2587_v30 = vpop.eup %2586  ;;  %v2000_v34 = vadd.f32 %v2585_v52, %v2583_v31  ;;  %2598 = vpow2.f32 %v1952_v50  ;;  %v1960_v44 = vmul.f32 1.442695, %v1916_v29  ;;  %v1962_v18 = vmul.f32 1.442695, %v1917_v7  ;;  %v2038_v29 = vld [vmem:[%s3828_s27 + $0x10] sm:$0xff] }
 0x3d5   : > { %v2589_v13 = vpop.eup %2588  ;;  %2600 = vpow2.f32 %v1954_v14  ;;  %v1964_v28 = vmul.f32 1.442695, %v1918_v8  ;;  %v1966_v56 = vmul.f32 1.442695, %v1919_v16  ;;  %v4086_v58 = vmax.f32 %v3647_v24, 0.0  ;;  %v2039_v16 = vld [vmem:[%s3828_s27 + $0x18] sm:$0xff] }
 0x3d6   : > { %v2591_v10 = vpop.eup %2590  ;;  %v2001_v15 = vadd.f32 %v2587_v30, %v2000_v34  ;;  %2602 = vpow2.f32 %v1956_v26  ;;  %v4087_v37 = vmax.f32 %v3691_v32, 0.0  ;;  %v2068_v41 = vmul.f32 %v2583_v31, %v2036_v49  ;;  %v2044_v49 = vld [vmem:[%s3828_s27 + $0x40] sm:$0xff] }
 0x3d7   : > { %v3833_v4 = vpop.eup %2592  ;;  %v1894_v27 = vpop.xlane.xlu2 %1893  ;;  %2604 = vpow2.f32 %v1958_v19  ;;  %v2069_v50 = vmul.f32 %v2585_v52, %v2037_v38 }
 0x3d8   : > { %v3835_v51 = vpop.eup %2594  ;;  %v1920_v22 = vsub.f32 %v4084_v3, %v1894_v27  ;;  %v1921_v60 = vsub.f32 %v4085_v48, %v1894_v27  ;;  %v2002_v12 = vadd.f32 %v2589_v13, %v2001_v15  ;;  %2606 = vpow2.f32 %v1960_v44  ;;  %v2045_v48 = vld [vmem:[%s3828_s27 + $0x48] sm:$0xff] }
 0x3d9   : > { %v3842_v17 = vpop.eup %2596  ;;  %2608 = vpow2.f32 %v1962_v18  ;;  %v1922_v1 = vsub.f32 %v4086_v58, %v1894_v27  ;;  %v1923_v39 = vsub.f32 %v4087_v37, %v1894_v27  ;;  %v1924_v61 = vsub.f32 %v1856_v53, %v1894_v27  ;;  %v2046_v37 = vld [vmem:[%s3828_s27 + $0x50] sm:$0xff] }
 0x3da   : > { %v2599_v54 = vpop.eup %2598  ;;  %v1968_v0 = vmul.f32 1.442695, %v1920_v22  ;;  %v1970_v23 = vmul.f32 1.442695, %v1921_v60  ;;  %v2003_v63 = vadd.f32 %v2591_v10, %v2002_v12  ;;  %2610 = vpow2.f32 %v1964_v28  ;;  %v2042_v22 = vld [vmem:[%s3828_s27 + $0x30] sm:$0xff] }
 0x3db   : > { %v2601_v7 = vpop.eup %2600  ;;  %v1925_v24 = vsub.f32 %v1857_v9, %v1894_v27  ;;  %v1926_v32 = vsub.f32 %v1858_v33, %v1894_v27  ;;  %v1972_v8 = vmul.f32 1.442695, %v1922_v1  ;;  %v1927_v26 = vsub.f32 %v1859_v36, %v1894_v27  ;;  %v2041_v36 = vld [vmem:[%s3828_s27 + $0x28] sm:$0xff] }
 0x3dc   : > { %v2603_v31 = vpop.eup %2602  ;;  %v2004_v14 = vadd.f32 %v3833_v4, %v2003_v63  ;;  %v2009_v46 = vadd.f32 %v2601_v7, %v2599_v54  ;;  %2612 = vpow2.f32 %v1968_v0  ;;  %v1974_v20 = vmul.f32 1.442695, %v1923_v39  ;;  %v2047_v63 = vld [vmem:[%s3828_s27 + $0x58] sm:$0xff] }
 0x3dd   : > { %v2605_v53 = vpop.eup %2604  ;;  %2614 = vpow2.f32 %v1970_v23  ;;  %v2070_v9 = vmul.f32 %v2587_v30, %v2038_v29  ;;  %v1976_v19 = vmul.f32 1.442695, %v1924_v61  ;;  %v1978_v55 = vmul.f32 1.442695, %v1925_v24 }
 0x3de   : > { %v3860_v5 = vpop.eup %2606  ;;  %v2005_v33 = vadd.f32 %v3835_v51, %v2004_v14  ;;  %2616 = vpow2.f32 %v1966_v56  ;;  %v2010_v52 = vadd.f32 %v2603_v31, %v2009_v46  ;;  %v2071_v18 = vmul.f32 %v2589_v13, %v2039_v16 }
 0x3df   : > { %v3863_v34 = vpop.eup %2608  ;;  %v3865_v44 = vpop.xlane.xlu2 %1902  ;;  %2618 = vpow2.f32 %v1972_v8  ;;  %v2072_v15 = vmul.f32 %v2591_v10, %v2040_v45  ;;  %v4088_v30 = vmax.f32 %v3671_v21, 0.0  ;;  %v1980_v3 = vmul.f32 1.442695, %v1926_v32 }
 0x3e0   : > { %v2006_v28 = vadd.f32 %v3842_v17, %v2005_v33  ;;  %v2011_v56 = vadd.f32 %v2605_v53, %v2010_v52  ;;  %v3875_v60 = vpop.eup %2610  ;;  %v4089_v12 = vmax.f32 %v3688_v35, 0.0  ;;  %2620 = vpow2.f32 %v1974_v20 }
 0x3e1   : > { %v1928_v27 = vsub.f32 %v4088_v30, %v3865_v44  ;;  %v1982_v10 = vmul.f32 1.442695, %v1927_v26  ;;  %v2100_v38 = vadd.f32 %v2069_v50, %v2068_v41  ;;  %2622 = vpow2.f32 %v1976_v19  ;;  %v2049_v30 = vld [vmem:[%s3828_s27 + $0x68] sm:$0xff] }
 0x3e2   : > { %v1929_v13 = vsub.f32 %v4089_v12, %v3865_v44  ;;  %v3880_v58 = vpop.eup %2612  ;;  %2007 = vadd.xlane.f32.xlu0 %v2006_v28  ;;  %v2012_v21 = vadd.f32 %v3860_v5, %v2011_v56  ;;  %v2073_v1 = vmul.f32 %v3833_v4, %v2041_v36  ;;  %v2076_v39 = vmul.f32 %v2599_v54, %v2044_v49 }
 0x3e3   : > { %v3885_v0 = vpop.eup %2614  ;;  %2624 = vpow2.f32 %v1978_v55  ;;  %v2074_v35 = vmul.f32 %v3835_v51, %v2042_v22  ;;  %v2101_v23 = vadd.f32 %v2100_v38, %v2070_v9  ;;  %v2077_v61 = vmul.f32 %v2601_v7, %v2045_v48  ;;  %v2048_v7 = vld [vmem:[%s3828_s27 + $0x60] sm:$0xff]  ;;  %v2053_v48 = vld [vmem:[%s3828_s27 + $0x88] sm:$0xff] }
 0x3e4   : > { %v3889_v41 = vpop.eup %2616  ;;  %v1984_v29 = vmul.f32 1.442695, %v1928_v27  ;;  %v2013_v24 = vadd.f32 %v3863_v34, %v2012_v21  ;;  %2626 = vpow2.f32 %v1980_v3  ;;  %v2018_v4 = vadd.f32 %v3885_v0, %v3880_v58  ;;  %v2052_v22 = vld [vmem:[%s3828_s27 + $0x80] sm:$0xff] }
 0x3e5   : > { %v3894_v32 = vpop.eup %2618  ;;  %v1986_v54 = vmul.f32 1.442695, %v1929_v13  ;;  %2628 = vpow2.f32 %v1982_v10  ;;  %v2102_v50 = vadd.f32 %v2101_v23, %v2071_v18  ;;  %v2078_v14 = vmul.f32 %v2603_v31, %v2046_v37  ;;  %v2060_v13 = vld [vmem:[%s3828_s27 + $0xc0] sm:$0xff] }
 0x3e6   : > { %v2014_v51 = vadd.f32 %v3875_v60, %v2013_v24  ;;  %v2019_v46 = vadd.f32 %v3894_v32, %v2018_v4  ;;  %v2079_v8 = vmul.f32 %v2605_v53, %v2047_v63  ;;  %v2109_v16 = vadd.f32 %v2077_v61, %v2076_v39  ;;  %v3899_v45 = vpop.eup %2620  ;;  %v2054_v39 = vld [vmem:[%s3828_s27 + $0x90] sm:$0xff] }
 0x3e7   : > { %v2103_v26 = vadd.f32 %v2102_v50, %v2072_v15  ;;  %v1930_v20 = vsub.f32 %v1862_v59, %v3865_v44  ;;  %v4090_v9 = vmax.f32 %v3739_v57, 0.0  ;;  %v1932_v31 = vsub.f32 %v1864_v47, %v3865_v44  ;;  %v3910_v52 = vpop.eup %2622 }
 0x3e8   : > { %v2015_v53 = vadd.f32 %v3889_v41, %v2014_v51  ;;  %v2020_v19 = vadd.f32 %v3899_v45, %v2019_v46  ;;  %v2110_v55 = vadd.f32 %v2109_v16, %v2078_v14  ;;  %v1933_v40 = vsub.f32 %v1865_v42, %v3865_v44  ;;  %v2051_v46 = vld [vmem:[%s3828_s27 + $0x78] sm:$0xff] }
 0x3e9   : > { %v1931_v33 = vsub.f32 %v4090_v9, %v3865_v44  ;;  %v3917_v59 = vpop.eup %2624  ;;  %v2104_v57 = vadd.f32 %v2103_v26, %v2073_v1  ;;  %v2080_v36 = vmul.f32 %v3860_v5, %v2048_v7  ;;  %v1934_v43 = vsub.f32 %v1866_v62, %v3865_v44  ;;  %v2050_v1 = vld [vmem:[%s3828_s27 + $0x70] sm:$0xff]  ;;  %v2056_v26 = vld [vmem:[%s3828_s27 + $0xa0] sm:$0xff] }
 0x3ea   : > { %2630 = vpow2.f32 %v1984_v29  ;;  %v3923_v47 = vpop.eup %2626  ;;  %2016 = vadd.xlane.f32.xlu1 %v2015_v53  ;;  %v2021_v18 = vadd.f32 %v3910_v52, %v2020_v19  ;;  %v2111_v15 = vadd.f32 %v2110_v55, %v2079_v8  ;;  %v1988_v42 = vmul.f32 1.442695, %v1930_v20 }
 0x3eb   : > { %2632 = vpow2.f32 %v1986_v54  ;;  %v3927_v49 = vpop.eup %2628  ;;  %v2105_v5 = vadd.f32 %v2104_v57, %v2074_v35  ;;  %v1935_v2 = vsub.f32 %v1867_v6, %v3865_v44  ;;  %v1990_v62 = vmul.f32 1.442695, %v1931_v33  ;;  %v2061_v44 = vld [vmem:[%s3828_s27 + $0xc8] sm:$0xff]  ;;  %v2055_v54 = vld [vmem:[%s3828_s27 + $0x98] sm:$0xff] }
 0x3ec   : > { %v1992_v27 = vmul.f32 1.442695, %v1932_v31  ;;  %v2022_v28 = vadd.f32 %v3917_v59, %v2021_v18  ;;  %v2112_v56 = vadd.f32 %v2111_v15, %v2080_v36  ;;  %2634 = vpow2.f32 %v1988_v42  ;;  %v2064_v31 = vld [vmem:[%s3828_s27 + $0xe0] sm:$0xff]  ;;  %v2065_v36 = vld [vmem:[%s3828_s27 + $0xe8] sm:$0xff] }
 0x3ed   : > { %v1994_v3 = vmul.f32 1.442695, %v1933_v40  ;;  %v2075_v12 = vmul.f32 %v3842_v17, %v2043_v11  ;;  %2636 = vpow2.f32 %v1990_v62  ;;  %v2081_v25 = vmul.f32 %v3863_v34, %v2049_v30  ;;  %v2062_v34 = vld [vmem:[%s3828_s27 + $0xd0] sm:$0xff] }
 0x3ee   : > { %v2023_v10 = vadd.f32 %v3923_v47, %v2022_v28  ;;  %2638 = vpow2.f32 %v1992_v27  ;;  %v1996_v6 = vmul.f32 1.442695, %v1934_v43  ;;  %v1998_v37 = vmul.f32 1.442695, %v1935_v2  ;;  %v2057_v2 = vld [vmem:[%s3828_s27 + $0xa8] sm:$0xff] }
 0x3ef   : > { %v2106_v21 = vadd.f32 %v2105_v5, %v2075_v12  ;;  %v2084_v35 = vmul.f32 %v3880_v58, %v2052_v22  ;;  %v2085_v17 = vmul.f32 %v3885_v0, %v2053_v48  ;;  %v2113_v61 = vadd.f32 %v2112_v56, %v2081_v25  ;;  %v2063_v0 = vld [vmem:[%s3828_s27 + $0xd8] sm:$0xff] }
 0x3f0   : > { %v2631_v38 = vpop.eup %2630  ;;  %v2024_v63 = vadd.f32 %v3927_v49, %v2023_v10  ;;  %2640 = vpow2.f32 %v1994_v3  ;;  %v2082_v58 = vmul.f32 %v3875_v60, %v2050_v1  ;;  %v2086_v14 = vmul.f32 %v3894_v32, %v2054_v39  ;;  %v2059_v1 = vld [vmem:[%s3828_s27 + $0xb8] sm:$0xff] }
 0x3f1   : > { %v2633_v23 = vpop.eup %2632  ;;  %v2092_v29 = vmul.f32 %v2631_v38, %v2060_v13  ;;  %2642 = vpow2.f32 %v1996_v6  ;;  %v2118_v20 = vadd.f32 %v2085_v17, %v2084_v35  ;;  %v2087_v53 = vmul.f32 %v3899_v45, %v2055_v54  ;;  %v2066_v45 = vld [vmem:[%s3828_s27 + $0xf0] sm:$0xff] }
 0x3f2   : > { %v2027_v24 = vadd.f32 %v2633_v23, %v2631_v38  ;;  %v2093_v4 = vmul.f32 %v2633_v23, %v2061_v44  ;;  %v2635_v50 = vpop.eup %2634  ;;  %2025 = vadd.xlane.f32.xlu2 %v2024_v63  ;;  %2107 = vadd.xlane.f32.xlu1 %v2106_v21  ;;  %v2114_v33 = vadd.f32 %v2113_v61, %v2082_v58  ;;  %2644 = vpow2.f32 %v1998_v37  ;;  %v2058_v13 = vld [vmem:[%s3828_s27 + $0xb0] sm:$0xff] }
 0x3f3   : > { %v2637_v51 = vpop.eup %2636  ;;  %v2094_v8 = vmul.f32 %v2635_v50, %v2062_v34  ;;  %v2119_v32 = vadd.f32 %v2118_v20, %v2086_v14  ;;  %v2083_v57 = vmul.f32 %v3889_v41, %v2051_v46  ;;  %v2088_v43 = vmul.f32 %v3910_v52, %v2056_v26  ;;  %v2067_v41 = vld [vmem:[%s3828_s27 + $0xf8] sm:$0xff] }
 0x3f4   : > { %v2028_v7 = vadd.f32 %v2635_v50, %v2027_v24  ;;  %v2127_v16 = vadd.f32 %v2093_v4, %v2092_v29  ;;  %v2639_v9 = vpop.eup %2638  ;;  %v2095_v19 = vmul.f32 %v2637_v51, %v2063_v0  ;;  %v2089_v12 = vmul.f32 %v3917_v59, %v2057_v2 }
 0x3f5   : > { %v2096_v11 = vmul.f32 %v2639_v9, %v2064_v31  ;;  %v2120_v42 = vadd.f32 %v2119_v32, %v2087_v53  ;;  %v2115_v30 = vadd.f32 %v2114_v33, %v2083_v57  ;;  %v2090_v21 = vmul.f32 %v3923_v47, %v2058_v13 }
 0x3f6   : > { %v2029_v60 = vadd.f32 %v2637_v51, %v2028_v7  ;;  %v2128_v55 = vadd.f32 %v2127_v16, %v2094_v8  ;;  %v2641_v40 = vpop.eup %2640  ;;  %v2091_v39 = vmul.f32 %v3927_v49, %v2059_v1 }
 0x3f7   : > { %v2643_v5 = vpop.eup %2642  ;;  %v2097_v27 = vmul.f32 %v2641_v40, %v2065_v36  ;;  %v2121_v56 = vadd.f32 %v2120_v42, %v2088_v43 }
 0x3f8   : > { %v2030_v18 = vadd.f32 %v2639_v9, %v2029_v60  ;;  %v2129_v15 = vadd.f32 %v2128_v55, %v2095_v19  ;;  %v2645_v3 = vpop.eup %2644  ;;  %v2098_v48 = vmul.f32 %v2643_v5, %v2066_v45 }
 0x3f9   : > { %v2099_v25 = vmul.f32 %v2645_v3, %v2067_v41  ;;  %v2122_v44 = vadd.f32 %v2121_v56, %v2089_v12 }
 0x3fa   : > { %v2031_v62 = vadd.f32 %v2641_v40, %v2030_v18  ;;  %v2130_v28 = vadd.f32 %v2129_v15, %v2096_v11  ;;  %2116 = vadd.xlane.f32.xlu2 %v2115_v30 }
 0x3fb   : > { %v2123_v37 = vadd.f32 %v2122_v44, %v2090_v21 }
 0x3fc   : > { %v2032_v22 = vadd.f32 %v2643_v5, %v2031_v62  ;;  %v2131_v52 = vadd.f32 %v2130_v28, %v2097_v27 }
 0x3fd   : > { %v2124_v35 = vadd.f32 %v2123_v37, %v2091_v39 }
 0x3fe   : > { %v2033_v10 = vadd.f32 %v2645_v3, %v2032_v22  ;;  %v2132_v6 = vadd.f32 %v2131_v52, %v2098_v48 }
 0x400   : > { %2034 = vadd.xlane.f32.xlu0 %v2033_v10  ;;  %v2133_v38 = vadd.f32 %v2132_v6, %v2099_v25 }
 0x402   : > { %2134 = vadd.xlane.f32.xlu1 %v2133_v38 }
 0x408   : > { %2125 = vadd.xlane.f32.xlu0 %v2124_v35 }
 0x455   : > { %v2008_v17 = vpop.xlane.xlu0 %2007 }
 0x456   : > { %2646 = vrcp.f32 %v2008_v17  ;;  %v2147_v34 = vand.u32 2147483648, %v2008_v17  ;;  %v2145_v24 = vand.u32 2147483647, %v2008_v17  ;;  %vm2141_vm3 = vweird.f32 %v2008_v17 }
 0x458   : > { %v2148_v54 = vor.u32 1.1754944e-38, %v2147_v34  ;;  %vm2146_vm5 = vcmp.eq.f32.partialorder %v2145_v24, 8.507059e+37 }
 0x45c   : > { %v2647_v59 = vpop.eup %2646 }
 0x45d   : > { %v2137_v23 = vmul.f32 %v2647_v59, %v2008_v17  ;;  %v2017_v63 = vpop.xlane.xlu1 %2016  ;;  %vm2142_vm2 = vweird.f32 %v2647_v59 }
 0x45e   : > { %2648 = vrcp.f32 %v2017_v63  ;;  %vm2143_vm4 = vmor %vm2141_vm3, %vm2142_vm2  ;;  %v2162_v7 = vand.u32 2147483648, %v2017_v63  ;;  %v2160_v16 = vand.u32 2147483647, %v2017_v63  ;;  %vm2156_vm8 = vweird.f32 %v2017_v63 }
 0x45f   : > { %v2138_v61 = vsub.f32 1.0, %v2137_v23 }
 0x460   : > { %v2163_v9 = vor.u32 1.1754944e-38, %v2162_v7  ;;  %vm2161_vm10 = vcmp.eq.f32.partialorder %v2160_v16, 8.507059e+37 }
 0x461   : > { %v2139_v29 = vmul.f32 %v2647_v59, %v2138_v61 }
 0x463   : > { %v2140_v47 = vadd.f32 %v2647_v59, %v2139_v29 }
 0x464   : > { %v2649_v4 = vpop.eup %2648 }
 0x465   : > { %v2152_v49 = vmul.f32 %v2649_v4, %v2017_v63  ;;  %v2026_v50 = vpop.xlane.xlu2 %2025  ;;  %v2108_v58 = vpop.xlane.xlu1 %2107  ;;  %v2144_v0 = vsel %vm2143_vm4, %v2647_v59, %v2140_v47  ;;  %vm2157_vm7 = vweird.f32 %v2649_v4 }
 0x466   : > { %2650 = vrcp.f32 %v2026_v50  ;;  %v2149_v14 = vsel %vm2146_vm5, %v2148_v54, %v2144_v0  ;;  %vm2158_vm9 = vmor %vm2156_vm8, %vm2157_vm7  ;;  %v2177_v57 = vand.u32 2147483648, %v2026_v50  ;;  %v2175_v36 = vand.u32 2147483647, %v2026_v50 }
 0x467   : > { %v2153_v51 = vsub.f32 1.0, %v2152_v49  ;;  %v2150_v46 = vmul.f32 %v2149_v14, %v2108_v58  ;;  %vm2171_vm12 = vweird.f32 %v2026_v50 }
 0x468   : > { %v2178_v11 = vor.u32 1.1754944e-38, %v2177_v57  ;;  %vm2176_vm14 = vcmp.eq.f32.partialorder %v2175_v36, 8.507059e+37 }
 0x469   : > { %2197 = vst.msk [vmem:[%s3970_s13] sm:$0xff] %vm2196_vm6, %v2150_v46  ;;  %v2154_v8 = vmul.f32 %v2649_v4, %v2153_v51 }
 0x46b   : > { %v2155_v26 = vadd.f32 %v2649_v4, %v2154_v8 }
 0x46c   : > { %v2651_v20 = vpop.eup %2650 }
 0x46d   : > { %v2167_v33 = vmul.f32 %v2651_v20, %v2026_v50  ;;  %v2117_v31 = vpop.xlane.xlu2 %2116  ;;  %v2159_v53 = vsel %vm2158_vm9, %v2649_v4, %v2155_v26  ;;  %vm2172_vm11 = vweird.f32 %v2651_v20 }
 0x46e   : > { %v2164_v60 = vsel %vm2161_vm10, %v2163_v9, %v2159_v53  ;;  %vm2173_vm13 = vmor %vm2171_vm12, %vm2172_vm11 }
 0x46f   : > { %v2168_v19 = vsub.f32 1.0, %v2167_v33  ;;  %v2165_v55 = vmul.f32 %v2164_v60, %v2117_v31 }
 0x471   : > { %2198 = vst.msk [vmem:[%s3970_s13 + $0x8] sm:$0xff] %vm2196_vm6, %v2165_v55  ;;  %v2169_v32 = vmul.f32 %v2651_v20, %v2168_v19 }
 0x473   : > { %v2035_v40 = vpop.xlane.xlu0 %2034  ;;  %v2170_v43 = vadd.f32 %v2651_v20, %v2169_v32 }
 0x474   : > { %2652 = vrcp.f32 %v2035_v40  ;;  %v2192_v62 = vand.u32 2147483648, %v2035_v40  ;;  %v2190_v28 = vand.u32 2147483647, %v2035_v40  ;;  %vm2186_vm0 = vweird.f32 %v2035_v40 }
 0x475   : > { %v2174_v18 = vsel %vm2173_vm13, %v2651_v20, %v2170_v43  ;;  %v2135_v22 = vpop.xlane.xlu1 %2134 }
 0x476   : > { %v2179_v15 = vsel %vm2176_vm14, %v2178_v11, %v2174_v18  ;;  %v2193_v3 = vor.u32 1.1754944e-38, %v2192_v62  ;;  %vm2191_vm2 = vcmp.eq.f32.partialorder %v2190_v28, 8.507059e+37 }
 0x47a   : > { %v2653_v42 = vpop.eup %2652 }
 0x47b   : > { %v2182_v5 = vmul.f32 %v2653_v42, %v2035_v40  ;;  %v2126_v30 = vpop.xlane.xlu0 %2125  ;;  %vm2187_vm15 = vweird.f32 %v2653_v42 }
 0x47c   : > { %v2180_v45 = vmul.f32 %v2179_v15, %v2126_v30  ;;  %vm2188_vm1 = vmor %vm2186_vm0, %vm2187_vm15 }
 0x47d   : > { %v2183_v2 = vsub.f32 1.0, %v2182_v5 }
 0x47e   : > { %2199 = vst.msk [vmem:[%s3970_s13 + $0x10] sm:$0xff] %vm2196_vm6, %v2180_v45 }
 0x47f   : > { %v2184_v27 = vmul.f32 %v2653_v42, %v2183_v2 }
 0x481   : > { %v2185_v56 = vadd.f32 %v2653_v42, %v2184_v27 }
 0x483   : > { %v2189_v41 = vsel %vm2188_vm1, %v2653_v42, %v2185_v56 }
 0x484   : > { %v2194_v48 = vsel %vm2191_vm2, %v2193_v3, %v2189_v41 }
 0x485   : > { %v2195_v52 = vmul.f32 %v2194_v48, %v2135_v22 }
 0x487   : > { %2200 = vst.msk [vmem:[%s3970_s13 + $0x18] sm:$0xff] %vm2196_vm6, %v2195_v52 }
 0x488 PF: > { %s19_s30 = sadd.s32 1, %s2660_s30  }
 0x489   : > { %p16_p4 = scmp.ge.s32.totalorder %s19_s30, 4  }
 0x48b   :  { %18 = sbr.rel (!%p16_p4) target bundleno = 1 (0x1), region = 95 }

// kernel: _lambda_.6
= control target key start
LH: loop header
LB: loop body
LE: loop exit
PB: predicated region body
PF: predicated region fallthrough
CT: control target
= control target key end

     0   :  { %s727_s24 = smov 0   ;;  %s794_s0 = inlined_call_operand.vmem [shape: bf16[2,32,256], index: 0, kind: input, shape index: {}]   ;;  %s795_s1 = inlined_call_operand.vmem [shape: bf16[2,32,32], index: 1, kind: input, shape index: {}]   ;;  %s796_s2 = inlined_call_operand.vmem [shape: bf16[32,32], index: 2, kind: input, shape index: {}]   ;;  %s797_s3 = inlined_call_operand.vmem [shape: f32[32,1], index: 3, kind: input, shape index: {}]   ;;  %s798_s4 = inlined_call_operand.vmem [shape: bf16[16,32], index: 4, kind: input, shape index: {}]   ;;  %s799_s5 = inlined_call_operand.vmem [shape: f32[16,1], index: 5, kind: input, shape index: {}]   ;;  %s800_s6 = inlined_call_operand.vmem [shape: bf16[2,32,256], index: 6, kind: output, shape index: {0}]   ;;  %s801_s7 = inlined_call_operand.vmem [shape: bf16[2,16,32], index: 7, kind: output, shape index: {1}]  }
   0x1 LB: > { %s595_s25 = sadd.s32 4294967295, %s684_s24   ;;  %p599_p0 = scmp.ge.s32.totalorder %s684_s24, 1  ;;  %s684_s24 = sphi %s727_s24, %s18_s24  }
   0x2   : > { %p250_p1 = scmp.lt.s32.totalorder %s684_s24, 3 }
   0x4   : > { %p251_p2 = pnand %p599_p0, %p250_p1 }
   0x5   : > { %p292_p3 = scmp.lt.s32.totalorder (!%p251_p2), %s595_s25, 1 }
   0x6   : > { %254 = sbr.rel (%p251_p2) target bundleno = 183 (0xb7), region = 44 }
   0xb   : > { %v686_v0 = vmov 0   ;;  %v321_v1 = vld [vmem:[%s797_s3] sm:$0xff]  ;;  %v323_v2 = vld [vmem:[%s797_s3 + $0x10] sm:$0xff]  ;;  %s803_s25 = smov (!%p292_p3, %s595_s25), 1  ;;  %v322_v7 = vld [vmem:[%s797_s3 + $0x8] sm:$0xff]  ;;  %vm375_vm0 = vcmask 261120  }
   0xc   : > { %675 = vset.pattern.permute.xlu0 %v686_v0  ;;  %676 = vset.pattern.permute.xlu1 %v686_v0  ;;  %v442_v3 = vld [vmem:[%s799_s5] sm:$0xff]  ;;  %s651_s9 = sshll.u32 %s803_s25, 5  ;;  %s652_s10 = sshll.u32 %s803_s25, 4  ;;  %v324_v8 = vld [vmem:[%s797_s3 + $0x18] sm:$0xff]  ;;  %v443_v18 = vld [vmem:[%s799_s5 + $0x8] sm:$0xff]  ;;  %vm492_vm1 = vcmask 257024  }
   0xd   : > { %327 = vperm.xlu0 %675, %v321_v1   ;;  %337 = vperm.xlu1 %676, %v323_v2   ;;  %s296_s13 = scalar_lea.vmem %s794_s0, %s651_s9  ;;  %s301_s16 = scalar_lea.vmem %s795_s1, %s652_s10  ;;  %v655_v21 = vld [vmem:[%s796_s2] sm:$0xff]  ;;  %v656_v22 = vld [vmem:[%s796_s2 + $0x8] sm:$0xff] }
   0xe   : > { %677 = vset.pattern.permute.xlu2 %v686_v0  ;;  %v626_v4 = vld [vmem:[%s296_s13 + $0x10] sm:$0xf]  ;;  %v660_v5 = vld [vmem:[%s296_s13 + $0x14] sm:$0xf0]  ;;  %v659_v6 = vld [vmem:[%s296_s13 + $0x14] sm:$0xf]  ;;  %s779_s11 = scalar_lea.vmem %s800_s6, %s651_s9 }
   0xf   : > { %446 = vperm.xlu2 %677, %v442_v3   ;;  %v627_v9 = vor.u32 %v660_v5, %v626_v4  ;;  %v628_v10 = vld [vmem:[%s296_s13 + $0x18] sm:$0xf0]  ;;  %v663_v11 = vld [vmem:[%s301_s16 + $0x8] sm:$0xff]  ;;  %v618_v12 = vld [vmem:[%s296_s13] sm:$0xf]  ;;  %s654_s12 = sshll.u32 %s803_s25, 3 }
  0x10   : > { %v631_v13 = vor.u32 %v659_v6, %v628_v10  ;;  %v658_v14 = vld [vmem:[%s296_s13 + $0x4] sm:$0xf0]  ;;  %v657_v15 = vld [vmem:[%s296_s13 + $0x4] sm:$0xf]  ;;  %v620_v16 = vld [vmem:[%s296_s13 + $0x8] sm:$0xf0]  ;;  %480 = vmatpush.bf16.msra.mxu2 %v663_v11  ;;  %s311_s9 = scalar_lea.vmem %s801_s7, %s654_s12 }
  0x11   : > { %388 = vmatpush.bf16.msra.mxu0 %v627_v9  ;;  %664 = vmatpush.bf16.msra.mxu3 %v627_v9  ;;  %v619_v17 = vor.u32 %v658_v14, %v618_v12  ;;  %v623_v19 = vor.u32 %v657_v15, %v620_v16  ;;  %v662_v20 = vld [vmem:[%s301_s16] sm:$0xff] }
  0x12   : > { %407 = vmatpush.bf16.msra.mxu1 %v631_v13  ;;  %v661_v23 = vld [vmem:[%s798_s4] sm:$0xff] }
  0x14   : > { %481 = vmatpush.bf16.msra.mxu2 %v662_v20 }
  0x15   : > { %332 = vperm.xlu0 %675, %v322_v7   ;;  %342 = vperm.xlu1 %676, %v324_v8  }
  0x16   : > { %389 = vmatpush.bf16.msra.mxu0 %v619_v17  ;;  %665 = vmatpush.bf16.msra.mxu3 %v619_v17 }
  0x17   : > { %451 = vperm.xlu2 %677, %v443_v18   ;;  %408 = vmatpush.bf16.msra.mxu1 %v623_v19 }
  0x18   : > { %648 = vmatmul.msk.bf16.vlgmr.msra.gmra.mxu2 %vm375_vm0, %v661_v23 }
  0x19   : > { %632 = vmatmul.msk.bf16.vlgmr.msra.gmra.mxu0 %vm375_vm0, %v655_v21  ;;  %633 = vmatmul.msk.bf16.vlgmr.msra.gmra.mxu3 %vm375_vm0, %v656_v22 }
  0x1a   : > { %634 = vmatmul.msk.bf16.vlgmr.msra.gmra.mxu1 %vm375_vm0, %v655_v21 }
  0x2a   : > { %635 = vmatmul.msk.bf16.gmra.mxu1 %vm375_vm0, %v656_v22 }
  0x69   : > { %v447_v30 = vpop.permute.xlu2 %446 }
  0x71   : > { %v452_v46 = vpop.permute.xlu2 %451 }
  0x7f   : > { %v328_v24 = vpop.permute.xlu0 %327  ;;  %v338_v41 = vpop.permute.xlu1 %337 }
  0x87   : > { %v333_v33 = vpop.permute.xlu0 %332  ;;  %v343_v57 = vpop.permute.xlu1 %342 }
  0x96   : > { %v391_v25 = vpop.f32.mrf.mxu0 }
  0x97   : > { %v392_v26 = vadd.f32 %v391_v25, %v328_v24  ;;  %v410_v27 = vpop.f32.mrf.mxu1 }
  0x98   : > { %v411_v28 = vadd.f32 %v410_v27, %v328_v24 }
  0x99   : > { %v420_v29 = vmax.f32 %v392_v26, 0.0 }
  0x9a   : > { %v421_v31 = vmax.f32 %v411_v28, 0.0 }
  0x9b   : > { %v483_v34 = vpop.f32.mrf.mxu2 }
  0x9c   : > { %v428_v32 = vpack.c.bf16 %v421_v31, %v420_v29  ;;  %v484_v36 = vadd.f32 %v483_v34, %v447_v30  ;;  %v396_v43 = vpop.f32.mrf.mxu3 }
  0x9d   : > { %v397_v47 = vadd.f32 %v396_v43, %v338_v41 }
  0x9e   : > { %432 = vst [vmem:[%s779_s11] sm:$0xff] %v428_v32  ;;  %v393_v35 = vpop.f32.mrf.mxu0  ;;  %v488_v40 = vmax.f32 %v484_v36, 0.0 }
  0x9f   : > { %v394_v37 = vadd.f32 %v393_v35, %v333_v33  ;;  %v412_v38 = vpop.f32.mrf.mxu1  ;;  %v424_v52 = vmax.f32 %v397_v47, 0.0 }
  0xa0   : > { %v413_v39 = vadd.f32 %v412_v38, %v333_v33  ;;  %v490_v45 = vpack.c.bf16 %v488_v40, %v488_v40 }
  0xa1   : > { %v422_v42 = vmax.f32 %v394_v37, 0.0 }
  0xa2   : > { %v423_v44 = vmax.f32 %v413_v39, 0.0  ;;  %493 = vst.msk [vmem:[%s311_s9] sm:$0xf] %vm492_vm1, %v490_v45 }
  0xa3   : > { %v485_v49 = vpop.f32.mrf.mxu2 }
  0xa4   : > { %v429_v48 = vpack.c.bf16 %v423_v44, %v422_v42  ;;  %v486_v50 = vadd.f32 %v485_v49, %v452_v46  ;;  %v398_v58 = vpop.f32.mrf.mxu3 }
  0xa5   : > { %v399_v60 = vadd.f32 %v398_v58, %v343_v57 }
  0xa6   : > { %433 = vst [vmem:[%s779_s11 + $0x8] sm:$0xff] %v429_v48  ;;  %v489_v54 = vmax.f32 %v486_v50, 0.0 }
  0xa7   : > { %v415_v51 = vpop.f32.mrf.mxu1  ;;  %v426_v63 = vmax.f32 %v399_v60, 0.0 }
  0xa8   : > { %v416_v53 = vadd.f32 %v415_v51, %v338_v41  ;;  %v491_v56 = vpack.c.bf16 %v489_v54, %v489_v54 }
  0xaa   : > { %v425_v55 = vmax.f32 %v416_v53, 0.0  ;;  %494 = vst.msk [vmem:[%s311_s9 + $0x4] sm:$0xf] %vm492_vm1, %v491_v56 }
  0xac   : > { %v430_v59 = vpack.c.bf16 %v425_v55, %v424_v52 }
  0xae   : > { %434 = vst [vmem:[%s779_s11 + $0x10] sm:$0xff] %v430_v59 }
  0xaf   : > { %v417_v61 = vpop.f32.mrf.mxu1 }
  0xb0   : > { %v418_v62 = vadd.f32 %v417_v61, %v343_v57 }
  0xb2   : > { %v427_v0 = vmax.f32 %v418_v62, 0.0 }
  0xb4   : > { %v431_v1 = vpack.c.bf16 %v427_v0, %v426_v63 }
  0xb6   : > { %435 = vst [vmem:[%s779_s11 + $0x18] sm:$0xff] %v431_v1 }
  0xb7 PF: > { %s18_s24 = sadd.s32 1, %s684_s24  }
  0xb8   : > { %p15_p4 = scmp.ge.s32.totalorder %s18_s24, 4  }
  0xba   :  { %17 = sbr.rel (!%p15_p4) target bundleno = 1 (0x1), region = 89 }

// kernel: _lambda_.7
= control target key start
LH: loop header
LB: loop body
LE: loop exit
PB: predicated region body
PF: predicated region fallthrough
CT: control target
= control target key end

     0   :  { %s1112_s30 = smov 0   ;;  %s1213_s0 = inlined_call_operand.vmem [shape: bf16[2,32,16], index: 0, kind: input, shape index: {}]   ;;  %s1214_s1 = inlined_call_operand.vmem [shape: bf16[2,16,256], index: 1, kind: input, shape index: {}]   ;;  %s1215_s2 = inlined_call_operand.vmem [shape: bf16[2,16,256], index: 2, kind: input, shape index: {}]   ;;  %s1216_s3 = inlined_call_operand.vmem [shape: f32[2,32,256], index: 3, kind: input, shape index: {}]   ;;  %s1217_s4 = inlined_call_operand.vmem [shape: bf16[16,32], index: 4, kind: input, shape index: {}]   ;;  %s1218_s5 = inlined_call_operand.vmem [shape: f32[16,1], index: 5, kind: input, shape index: {}]   ;;  %s1219_s6 = inlined_call_operand.vmem [shape: bf16[32,16], index: 6, kind: input, shape index: {}]   ;;  %s1220_s7 = inlined_call_operand.vmem [shape: bf16[32,16], index: 7, kind: input, shape index: {}]   ;;  %s1221_s8 = inlined_call_operand.vmem [shape: f32[32,1], index: 8, kind: input, shape index: {}]   ;;  %s1222_s9 = inlined_call_operand.vmem [shape: f32[2,32,1], index: 9, kind: output, shape index: {}]  }
   0x1 LB: > { %s926_s10 = sadd.s32 4294967295, %s1059_s30   ;;  %p930_p0 = scmp.ge.s32.totalorder %s1059_s30, 1  ;;  %s1059_s30 = sphi %s1112_s30, %s19_s30  }
   0x2   : > { %p317_p1 = scmp.lt.s32.totalorder %s1059_s30, 3 }
   0x4   : > { %p318_p2 = pnand %p930_p0, %p317_p1 }
   0x5   : > { %p368_p3 = scmp.lt.s32.totalorder (!%p318_p2), %s926_s10, 1 }
   0x6   : > { %321 = sbr.rel (%p318_p2) target bundleno = 759 (0x2f7), region = 56 }
   0xb   : > { %s1224_s10 = smov (!%p368_p3, %s926_s10), 1  ;;  %vm420_vm0 = vcmask 130048   ;;  %v471_v10 = vld [vmem:[%s1218_s5] sm:$0xff]  ;;  %v1061_v11 = vmov 0   ;;  %v472_v14 = vld [vmem:[%s1218_s5 + $0x8] sm:$0xff]  ;;  %vm488_vm1 = vcmask 261120  }
   0xc   : > { %s1123_s11 = sshll.u32 %s1224_s10, 4  ;;  %1026 = vset.pattern.permute.xlu0 %v1061_v11  ;;  %1027 = vset.pattern.permute.xlu1 %v1061_v11  ;;  %v1010_v23 = vld [vmem:[%s1217_s4] sm:$0xff]  ;;  %v1012_v32 = vld [vmem:[%s1219_s6 + $0x8] sm:$0xff]  ;;  %v656_v36 = vld [vmem:[%s1221_s8 + $0x10] sm:$0xff]  ;;  %s1004_s24 = sshll.u32 %s1224_s10, 6  ;;  %vm830_vm6 = vcmask 7168  }
   0xd   : > { %s377_s14 = scalar_lea.vmem %s1214_s1, %s1123_s11  ;;  %s372_s17 = scalar_lea.vmem %s1213_s0, %s1123_s11  ;;  %475 = vperm.xlu0 %1026, %v471_v10   ;;  %1028 = vset.pattern.permute.xlu2 %v1061_v11  ;;  %v1011_v30 = vld [vmem:[%s1219_s6] sm:$0xff]  ;;  %v655_v43 = vld [vmem:[%s1221_s8 + $0x8] sm:$0xff]  ;;  %v657_v44 = vld [vmem:[%s1221_s8 + $0x18] sm:$0xff] }
   0xe   : > { %v951_v0 = vld [vmem:[%s377_s14] sm:$0xf]  ;;  %v1009_v1 = vld [vmem:[%s377_s14 + $0x4] sm:$0xf0]  ;;  %v1008_v2 = vld [vmem:[%s377_s14 + $0x4] sm:$0xf]  ;;  %s382_s26 = scalar_lea.vmem %s1215_s2, %s1123_s11  ;;  %670 = vperm.xlu2 %1028, %v656_v36   ;;  %s1186_s27 = scalar_lea.vmem %s1216_s3, %s1004_s24 }
   0xf   : > { %v952_v3 = vor.u32 %v1009_v1, %v951_v0  ;;  %v953_v4 = vld [vmem:[%s377_s14 + $0x8] sm:$0xf0]  ;;  %v1006_v6 = vld [vmem:[%s372_s17] sm:$0xff]  ;;  %v1014_v25 = vld [vmem:[%s382_s26 + $0x4] sm:$0xf0]  ;;  %s1005_s28 = sshll.u32 %s1224_s10, 5 }
  0x10   : > { %v956_v5 = vor.u32 %v1008_v2, %v953_v4  ;;  %v1007_v7 = vld [vmem:[%s372_s17 + $0x8] sm:$0xff]  ;;  %v989_v24 = vld [vmem:[%s382_s26] sm:$0xf]  ;;  %v1013_v26 = vld [vmem:[%s382_s26 + $0x4] sm:$0xf]  ;;  %s1200_s11 = scalar_lea.vmem %s1222_s9, %s1005_s28 }
  0x11   : > { %434 = vmatpush.bf16.msra.mxu0 %v952_v3  ;;  %v990_v27 = vor.u32 %v1014_v25, %v989_v24  ;;  %v991_v28 = vld [vmem:[%s382_s26 + $0x8] sm:$0xf0]  ;;  %v654_v35 = vld [vmem:[%s1221_s8] sm:$0xff] }
  0x12   : > { %453 = vmatpush.bf16.msra.mxu1 %v956_v5  ;;  %v994_v29 = vor.u32 %v1013_v26, %v991_v28  ;;  %660 = vperm.xlu1 %1027, %v654_v35   ;;  %v1015_v52 = vld [vmem:[%s1220_s7] sm:$0xff]  ;;  %v1016_v53 = vld [vmem:[%s1220_s7 + $0x8] sm:$0xff] }
  0x14   : > { %957 = vmatmul.msk.bf16.vlgmr.msra.gmra.mxu0 %vm420_vm0, %v1006_v6 }
  0x15   : > { %959 = vmatmul.msk.bf16.vlgmr.msra.gmra.mxu1 %vm420_vm0, %v1006_v6  ;;  %480 = vperm.xlu0 %1026, %v472_v14  }
  0x16   : > { %623 = vmatpush.bf16.msrb.mxu0 %v990_v27  ;;  %642 = vmatpush.bf16.msrb.mxu1 %v994_v29 }
  0x17   : > { %675 = vperm.xlu2 %1028, %v657_v44  }
  0x1a   : > { %665 = vperm.xlu1 %1027, %v655_v43  }
  0x24   : > { %958 = vmatmul.msk.bf16.gmra.mxu0 %vm420_vm0, %v1007_v7 }
  0x25   : > { %960 = vmatmul.msk.bf16.gmra.mxu1 %vm420_vm0, %v1007_v7 }
  0x34   : > { %995 = vmatmul.msk.bf16.vlgmr.msrb.gmra.mxu0 %vm420_vm0, %v1011_v30 }
  0x35   : > { %997 = vmatmul.msk.bf16.vlgmr.msrb.gmra.mxu1 %vm420_vm0, %v1011_v30 }
  0x44   : > { %996 = vmatmul.msk.bf16.gmra.mxu0 %vm420_vm0, %v1012_v32 }
  0x45   : > { %998 = vmatmul.msk.bf16.gmra.mxu1 %vm420_vm0, %v1012_v32 }
  0x7f   : > { %v476_v31 = vpop.permute.xlu0 %475 }
  0x84   : > { %v661_v56 = vpop.permute.xlu1 %660 }
  0x87   : > { %v481_v38 = vpop.permute.xlu0 %480 }
  0x8c   : > { %v666_v5 = vpop.permute.xlu1 %665 }
  0x91   : > { %v436_v8 = vpop.f32.mrf.mxu0 }
  0x92   : > { %v455_v9 = vpop.f32.mrf.mxu1 }
  0x99   : > { %v438_v12 = vpop.f32.mrf.mxu0 }
  0x9a   : > { %v457_v13 = vpop.f32.mrf.mxu1  ;;  %v467_v21 = vpack.c.bf16 %v438_v12, %v436_v8 }
  0x9b   : > { %v468_v22 = vpack.c.bf16 %v457_v13, %v455_v9 }
  0xa1   : > { %v441_v15 = vpop.f32.mrf.mxu0 }
  0xa2   : > { %v460_v16 = vpop.f32.mrf.mxu1 }
  0xa9   : > { %v443_v17 = vpop.f32.mrf.mxu0 }
  0xaa   : > { %v462_v18 = vpop.f32.mrf.mxu1  ;;  %v469_v19 = vpack.c.bf16 %v443_v17, %v441_v15  ;;  %v671_v17 = vpop.permute.xlu2 %670 }
  0xab   : > { %v470_v20 = vpack.c.bf16 %v462_v18, %v460_v16 }
  0xac   : > { %498 = vmatpush.bf16.msra.mxu2 %v469_v19 }
  0xad   : > { %512 = vmatpush.bf16.msra.mxu3 %v470_v20 }
  0xb0   : > { %499 = vmatpush.bf16.msra.mxu2 %v467_v21 }
  0xb1   : > { %513 = vmatpush.bf16.msra.mxu3 %v468_v22  ;;  %v625_v54 = vpop.f32.mrf.mxu0 }
  0xb2   : > { %v644_v55 = vpop.f32.mrf.mxu1  ;;  %v676_v32 = vpop.permute.xlu2 %675 }
  0xb3   : > { %965 = vmatmul.msk.bf16.vlgmr.msra.gmra.mxu2 %vm488_vm1, %v1010_v23 }
  0xb4   : > { %966 = vmatmul.msk.bf16.vlgmr.msra.gmra.mxu3 %vm488_vm1, %v1010_v23 }
  0xb9   : > { %v627_v63 = vpop.f32.mrf.mxu0 }
  0xba   : > { %v646_v1 = vpop.f32.mrf.mxu1 }
  0xc1   : > { %v630_v13 = vpop.f32.mrf.mxu0 }
  0xc2   : > { %v649_v14 = vpop.f32.mrf.mxu1 }
  0xc9   : > { %v632_v26 = vpop.f32.mrf.mxu0 }
  0xca   : > { %v651_v30 = vpop.f32.mrf.mxu1 }
 0x136   : > { %v501_v33 = vpop.f32.mrf.mxu2 }
 0x137   : > { %v515_v34 = vpop.f32.mrf.mxu3  ;;  %v502_v37 = vadd.f32 %v501_v33, %v476_v31 }
 0x138   : > { %v516_v39 = vadd.f32 %v515_v34, %v476_v31 }
 0x139   : > { %v520_v46 = vmax.f32 %v502_v37, 0.0 }
 0x13a   : > { %v521_v48 = vmax.f32 %v516_v39, 0.0 }
 0x13e   : > { %v503_v40 = vpop.f32.mrf.mxu2 }
 0x13f   : > { %v504_v41 = vadd.f32 %v503_v40, %v481_v38  ;;  %v517_v42 = vpop.f32.mrf.mxu3 }
 0x140   : > { %v518_v45 = vadd.f32 %v517_v42, %v481_v38 }
 0x141   : > { %v522_v47 = vmax.f32 %v504_v41, 0.0 }
 0x142   : > { %v523_v49 = vmax.f32 %v518_v45, 0.0 }
 0x143   : > { %v524_v50 = vpack.c.bf16 %v522_v47, %v520_v46 }
 0x144   : > { %v525_v51 = vpack.c.bf16 %v523_v49, %v521_v48 }
 0x145   : > { %559 = vmatpush.bf16.msrb.mxu2 %v524_v50 }
 0x146   : > { %578 = vmatpush.bf16.msrb.mxu3 %v525_v51 }
 0x148   : > { %975 = vmatmul.msk.bf16.vlgmr.msrb.gmra.mxu2 %vm420_vm0, %v1015_v52 }
 0x149   : > { %977 = vmatmul.msk.bf16.vlgmr.msrb.gmra.mxu3 %vm420_vm0, %v1015_v52 }
 0x158   : > { %976 = vmatmul.msk.bf16.gmra.mxu2 %vm420_vm0, %v1016_v53 }
 0x159   : > { %978 = vmatmul.msk.bf16.gmra.mxu3 %vm420_vm0, %v1016_v53 }
 0x1cb   : > { %v561_v57 = vpop.f32.mrf.mxu2 }
 0x1cc   : > { %v580_v58 = vpop.f32.mrf.mxu3  ;;  %v626_v59 = vadd.f32 %v625_v54, %v561_v57 }
 0x1cd   : > { %v645_v60 = vadd.f32 %v644_v55, %v580_v58 }
 0x1ce   : > { %v678_v61 = vadd.f32 %v661_v56, %v626_v59  ;;  %v742_v59 = vld [vmem:[%s1186_s27] sm:$0xff] }
 0x1cf   : > { %v679_v62 = vadd.f32 %v661_v56, %v645_v60  ;;  %v743_v60 = vld [vmem:[%s1186_s27 + $0x8] sm:$0xff] }
 0x1d0   : > { %v686_v0 = vmax.f32 %v678_v61, 0.0 }
 0x1d1   : > { %v687_v2 = vmax.f32 %v679_v62, 0.0 }
 0x1d3   : > { %v563_v3 = vpop.f32.mrf.mxu2  ;;  %v694_v4 = vmax.f32 %v686_v0, %v687_v2 }
 0x1d4   : > { %v582_v6 = vpop.f32.mrf.mxu3  ;;  %v628_v7 = vadd.f32 %v627_v63, %v563_v3 }
 0x1d5   : > { %v647_v8 = vadd.f32 %v646_v1, %v582_v6  ;;  %695 = vmax.xlane.f32.xlu0 %v694_v4 }
 0x1d6   : > { %v680_v9 = vadd.f32 %v666_v5, %v628_v7 }
 0x1d7   : > { %v681_v10 = vadd.f32 %v666_v5, %v647_v8  ;;  %v744_v8 = vld [vmem:[%s1186_s27 + $0x10] sm:$0xff] }
 0x1d8   : > { %v688_v11 = vmax.f32 %v680_v9, 0.0  ;;  %v745_v9 = vld [vmem:[%s1186_s27 + $0x18] sm:$0xff] }
 0x1d9   : > { %v689_v12 = vmax.f32 %v681_v10, 0.0 }
 0x1db   : > { %v566_v15 = vpop.f32.mrf.mxu2  ;;  %v697_v16 = vmax.f32 %v688_v11, %v689_v12 }
 0x1dc   : > { %v585_v18 = vpop.f32.mrf.mxu3  ;;  %v631_v19 = vadd.f32 %v630_v13, %v566_v15  ;;  %v749_v13 = vld [vmem:[%s1186_s27 + $0x38] sm:$0xff] }
 0x1dd   : > { %v650_v20 = vadd.f32 %v649_v14, %v585_v18  ;;  %698 = vmax.xlane.f32.xlu1 %v697_v16 }
 0x1de   : > { %v682_v21 = vadd.f32 %v671_v17, %v631_v19 }
 0x1df   : > { %v683_v22 = vadd.f32 %v671_v17, %v650_v20  ;;  %v746_v20 = vld [vmem:[%s1186_s27 + $0x20] sm:$0xff] }
 0x1e0   : > { %v690_v23 = vmax.f32 %v682_v21, 0.0  ;;  %v747_v21 = vld [vmem:[%s1186_s27 + $0x28] sm:$0xff] }
 0x1e1   : > { %v691_v24 = vmax.f32 %v683_v22, 0.0 }
 0x1e3   : > { %v568_v25 = vpop.f32.mrf.mxu2  ;;  %v700_v27 = vmax.f32 %v690_v23, %v691_v24 }
 0x1e4   : > { %v587_v28 = vpop.f32.mrf.mxu3  ;;  %v633_v29 = vadd.f32 %v632_v26, %v568_v25 }
 0x1e5   : > { %v652_v31 = vadd.f32 %v651_v30, %v587_v28  ;;  %701 = vmax.xlane.f32.xlu2 %v700_v27 }
 0x1e6   : > { %v684_v33 = vadd.f32 %v676_v32, %v633_v29 }
 0x1e7   : > { %v685_v34 = vadd.f32 %v676_v32, %v652_v31 }
 0x1e8   : > { %v692_v35 = vmax.f32 %v684_v33, 0.0 }
 0x1e9   : > { %v693_v36 = vmax.f32 %v685_v34, 0.0 }
 0x1eb   : > { %v703_v37 = vmax.f32 %v692_v35, %v693_v36 }
 0x1ed   : > { %704 = vmax.xlane.f32.xlu2 %v703_v37 }
 0x248   : > { %v696_v38 = vpop.xlane.xlu0 %695 }
 0x249   : > { %v706_v39 = vsub.f32 %v686_v0, %v696_v38  ;;  %v707_v40 = vsub.f32 %v687_v2, %v696_v38 }
 0x24b   : > { %v714_v41 = vmul.f32 1.442695, %v706_v39  ;;  %v716_v42 = vmul.f32 1.442695, %v707_v40 }
 0x24d   : > { %1029 = vpow2.f32 %v714_v41 }
 0x24e   : > { %1031 = vpow2.f32 %v716_v42 }
 0x250   : > { %v699_v43 = vpop.xlane.xlu1 %698 }
 0x251   : > { %v708_v44 = vsub.f32 %v688_v11, %v699_v43  ;;  %v709_v45 = vsub.f32 %v689_v12, %v699_v43  ;;  %v748_v12 = vld [vmem:[%s1186_s27 + $0x30] sm:$0xff] }
 0x253   : > { %v1030_v46 = vpop.eup %1029  ;;  %v718_v47 = vmul.f32 1.442695, %v708_v44  ;;  %v720_v48 = vmul.f32 1.442695, %v709_v45 }
 0x254   : > { %v1032_v49 = vpop.eup %1031  ;;  %v750_v0 = vmul.f32 %v1030_v46, %v742_v59 }
 0x255   : > { %1033 = vpow2.f32 %v718_v47  ;;  %v730_v50 = vadd.f32 %v1032_v49, %v1030_v46  ;;  %v751_v1 = vmul.f32 %v1032_v49, %v743_v60 }
 0x256   : > { %1035 = vpow2.f32 %v720_v48 }
 0x257   : > { %731 = vadd.xlane.f32.xlu0 %v730_v50  ;;  %v758_v6 = vadd.f32 %v751_v1, %v750_v0 }
 0x258   : > { %v702_v51 = vpop.xlane.xlu2 %701 }
 0x259   : > { %v710_v52 = vsub.f32 %v690_v23, %v702_v51  ;;  %v711_v53 = vsub.f32 %v691_v24, %v702_v51 }
 0x25b   : > { %v1034_v54 = vpop.eup %1033  ;;  %v722_v55 = vmul.f32 1.442695, %v710_v52  ;;  %v724_v56 = vmul.f32 1.442695, %v711_v53 }
 0x25c   : > { %v1036_v57 = vpop.eup %1035  ;;  %v752_v10 = vmul.f32 %v1034_v54, %v744_v8 }
 0x25d   : > { %1037 = vpow2.f32 %v722_v55  ;;  %v733_v58 = vadd.f32 %v1036_v57, %v1034_v54  ;;  %v753_v11 = vmul.f32 %v1036_v57, %v745_v9 }
 0x25e   : > { %1039 = vpow2.f32 %v724_v56 }
 0x25f   : > { %734 = vadd.xlane.f32.xlu1 %v733_v58  ;;  %v761_v17 = vadd.f32 %v753_v11, %v752_v10 }
 0x260   : > { %v705_v61 = vpop.xlane.xlu2 %704 }
 0x261   : > { %v712_v62 = vsub.f32 %v692_v35, %v705_v61  ;;  %v713_v63 = vsub.f32 %v693_v36, %v705_v61 }
 0x263   : > { %v1038_v2 = vpop.eup %1037  ;;  %v726_v3 = vmul.f32 1.442695, %v712_v62  ;;  %v728_v4 = vmul.f32 1.442695, %v713_v63 }
 0x264   : > { %v1040_v5 = vpop.eup %1039  ;;  %v754_v23 = vmul.f32 %v1038_v2, %v746_v20 }
 0x265   : > { %1041 = vpow2.f32 %v726_v3  ;;  %v736_v7 = vadd.f32 %v1040_v5, %v1038_v2  ;;  %v755_v24 = vmul.f32 %v1040_v5, %v747_v21 }
 0x266   : > { %1043 = vpow2.f32 %v728_v4 }
 0x267   : > { %759 = vadd.xlane.f32.xlu1 %v758_v6  ;;  %737 = vadd.xlane.f32.xlu2 %v736_v7  ;;  %v764_v25 = vadd.f32 %v755_v24, %v754_v23 }
 0x26b   : > { %v1042_v14 = vpop.eup %1041 }
 0x26c   : > { %v1044_v15 = vpop.eup %1043  ;;  %v756_v16 = vmul.f32 %v1042_v14, %v748_v12 }
 0x26d   : > { %v739_v18 = vadd.f32 %v1044_v15, %v1042_v14  ;;  %v757_v19 = vmul.f32 %v1044_v15, %v749_v13 }
 0x26f   : > { %762 = vadd.xlane.f32.xlu2 %v761_v17  ;;  %740 = vadd.xlane.f32.xlu0 %v739_v18  ;;  %v767_v22 = vadd.f32 %v757_v19, %v756_v16 }
 0x271   : > { %768 = vadd.xlane.f32.xlu1 %v767_v22 }
 0x277   : > { %765 = vadd.xlane.f32.xlu0 %v764_v25 }
 0x2ca   : > { %v732_v26 = vpop.xlane.xlu0 %731 }
 0x2cb   : > { %1045 = vrcp.f32 %v732_v26  ;;  %v781_v31 = vand.u32 2147483648, %v732_v26  ;;  %v779_v33 = vand.u32 2147483647, %v732_v26  ;;  %vm775_vm3 = vweird.f32 %v732_v26 }
 0x2cd   : > { %v782_v36 = vor.u32 1.1754944e-38, %v781_v31  ;;  %vm780_vm5 = vcmp.eq.f32.partialorder %v779_v33, 8.507059e+37 }
 0x2d1   : > { %v1046_v27 = vpop.eup %1045 }
 0x2d2   : > { %v771_v28 = vmul.f32 %v1046_v27, %v732_v26  ;;  %v735_v29 = vpop.xlane.xlu1 %734  ;;  %vm776_vm2 = vweird.f32 %v1046_v27 }
 0x2d3   : > { %1047 = vrcp.f32 %v735_v29  ;;  %vm777_vm4 = vmor %vm775_vm3, %vm776_vm2  ;;  %v796_v44 = vand.u32 2147483648, %v735_v29  ;;  %v794_v46 = vand.u32 2147483647, %v735_v29  ;;  %vm790_vm8 = vweird.f32 %v735_v29 }
 0x2d4   : > { %v772_v30 = vsub.f32 1.0, %v771_v28 }
 0x2d5   : > { %v797_v49 = vor.u32 1.1754944e-38, %v796_v44  ;;  %vm795_vm10 = vcmp.eq.f32.partialorder %v794_v46, 8.507059e+37 }
 0x2d6   : > { %v773_v32 = vmul.f32 %v1046_v27, %v772_v30 }
 0x2d8   : > { %v774_v34 = vadd.f32 %v1046_v27, %v773_v32 }
 0x2d9   : > { %v1048_v35 = vpop.eup %1047 }
 0x2da   : > { %v786_v37 = vmul.f32 %v1048_v35, %v735_v29  ;;  %v778_v38 = vsel %vm777_vm4, %v1046_v27, %v774_v34  ;;  %v760_v39 = vpop.xlane.xlu1 %759  ;;  %v738_v40 = vpop.xlane.xlu2 %737  ;;  %vm791_vm7 = vweird.f32 %v1048_v35 }
 0x2db   : > { %v783_v41 = vsel %vm780_vm5, %v782_v36, %v778_v38  ;;  %1049 = vrcp.f32 %v738_v40  ;;  %vm792_vm9 = vmor %vm790_vm8, %vm791_vm7  ;;  %v811_v57 = vand.u32 2147483648, %v738_v40  ;;  %v809_v59 = vand.u32 2147483647, %v738_v40 }
 0x2dc   : > { %v787_v42 = vsub.f32 1.0, %v786_v37  ;;  %v784_v43 = vmul.f32 %v783_v41, %v760_v39  ;;  %vm805_vm12 = vweird.f32 %v738_v40 }
 0x2dd   : > { %v812_v62 = vor.u32 1.1754944e-38, %v811_v57  ;;  %vm810_vm14 = vcmp.eq.f32.partialorder %v809_v59, 8.507059e+37 }
 0x2de   : > { %831 = vst.msk [vmem:[%s1200_s11] sm:$0xff] %vm830_vm6, %v784_v43  ;;  %v788_v45 = vmul.f32 %v1048_v35, %v787_v42 }
 0x2e0   : > { %v789_v47 = vadd.f32 %v1048_v35, %v788_v45 }
 0x2e1   : > { %v1050_v48 = vpop.eup %1049 }
 0x2e2   : > { %v801_v50 = vmul.f32 %v1050_v48, %v738_v40  ;;  %v741_v51 = vpop.xlane.xlu0 %740  ;;  %v793_v52 = vsel %vm792_vm9, %v1048_v35, %v789_v47  ;;  %v763_v53 = vpop.xlane.xlu2 %762  ;;  %vm806_vm11 = vweird.f32 %v1050_v48 }
 0x2e3   : > { %1051 = vrcp.f32 %v741_v51  ;;  %v798_v54 = vsel %vm795_vm10, %v797_v49, %v793_v52  ;;  %vm807_vm13 = vmor %vm805_vm12, %vm806_vm11  ;;  %v826_v5 = vand.u32 2147483648, %v741_v51  ;;  %v824_v7 = vand.u32 2147483647, %v741_v51 }
 0x2e4   : > { %v802_v55 = vsub.f32 1.0, %v801_v50  ;;  %v799_v56 = vmul.f32 %v798_v54, %v763_v53  ;;  %vm820_vm0 = vweird.f32 %v741_v51  ;;  %v769_v11 = vpop.xlane.xlu1 %768 }
 0x2e5   : > { %v827_v9 = vor.u32 1.1754944e-38, %v826_v5  ;;  %vm825_vm2 = vcmp.eq.f32.partialorder %v824_v7, 8.507059e+37 }
 0x2e6   : > { %832 = vst.msk [vmem:[%s1200_s11 + $0x8] sm:$0xff] %vm830_vm6, %v799_v56  ;;  %v803_v58 = vmul.f32 %v1050_v48, %v802_v55 }
 0x2e8   : > { %v804_v60 = vadd.f32 %v1050_v48, %v803_v58 }
 0x2e9   : > { %v1052_v61 = vpop.eup %1051 }
 0x2ea   : > { %v816_v63 = vmul.f32 %v1052_v61, %v741_v51  ;;  %v766_v0 = vpop.xlane.xlu0 %765  ;;  %v808_v1 = vsel %vm807_vm13, %v1050_v48, %v804_v60  ;;  %vm821_vm15 = vweird.f32 %v1052_v61 }
 0x2eb   : > { %v813_v2 = vsel %vm810_vm14, %v812_v62, %v808_v1  ;;  %vm822_vm1 = vmor %vm820_vm0, %vm821_vm15 }
 0x2ec   : > { %v817_v3 = vsub.f32 1.0, %v816_v63  ;;  %v814_v4 = vmul.f32 %v813_v2, %v766_v0 }
 0x2ee   : > { %v818_v6 = vmul.f32 %v1052_v61, %v817_v3  ;;  %833 = vst.msk [vmem:[%s1200_s11 + $0x10] sm:$0xff] %vm830_vm6, %v814_v4 }
 0x2f0   : > { %v819_v8 = vadd.f32 %v1052_v61, %v818_v6 }
 0x2f2   : > { %v823_v10 = vsel %vm822_vm1, %v1052_v61, %v819_v8 }
 0x2f3   : > { %v828_v12 = vsel %vm825_vm2, %v827_v9, %v823_v10 }
 0x2f4   : > { %v829_v13 = vmul.f32 %v828_v12, %v769_v11 }
 0x2f6   : > { %834 = vst.msk [vmem:[%s1200_s11 + $0x18] sm:$0xff] %vm830_vm6, %v829_v13 }
 0x2f7 PF: > { %s19_s30 = sadd.s32 1, %s1059_s30  }
 0x2f8   : > { %p16_p4 = scmp.ge.s32.totalorder %s19_s30, 4  }
 0x2fa   :  { %18 = sbr.rel (!%p16_p4) target bundleno = 1 (0x1), region = 95 }

</bundles_post_ra>
